<compile_context>
chip_gen: v7x
topology: tpu7x:2x2x1
jax: 0.10.0
libtpu: 0.0.40
codegen_flags: <defaults>
</compile_context>

<pallas_src>
import jax
import jax.numpy as jnp
import numpy as np
from jax.experimental import pallas as pl
from jax.experimental.pallas import tpu as pltpu

LANE = 128
SUBLANE = 8
CARRY_DTYPE = jnp.float32          # inter-layer activations (see TODO: bf16)
MXU_DTYPE = jnp.bfloat16           # MXU operand dtype (weights + im2col slab)


def _round_up(x, m):
    return ((x + m - 1) // m) * m


def _c_store(c):
    """Stored channel count: lane-dense (128) only for real VGG-sized layers."""
    return _round_up(c, LANE) if c >= 64 else _round_up(c, SUBLANE)


# ------------------------------ in-kernel helpers ----------------------------

def _pool2x2_hwc(r):
    """2x2 stride-2 max pool of an (H, W, C) value (floor / ceil_mode=False)."""
    H, W, C = r.shape
    He, We = (H // 2) * 2, (W // 2) * 2
    r = r[:He, :We, :]
    r4 = r.reshape(He // 2, 2, We, C)          # split H (major dim): cheap
    m = jnp.maximum(r4[:, 0], r4[:, 1])        # (He//2, We, C)
    m4 = m.reshape(He // 2, We // 2, 2, C)     # split W into even/odd pairs
    # TODO(synk): a pltpu.roll + stride-2 slice variant would keep this on the
    #             XLU and avoid the sublane regather; negligible at these sizes.
    return jnp.maximum(m4[:, :, 0, :], m4[:, :, 1, :])


def _store_padded_carry(cr, val):
    """Store `val` into the interior of carry ref `cr`, zero 1-px halo around it."""
    zh, zw, _ = val.shape
    cr[...] = jnp.zeros(cr.shape, cr.dtype)
    cr[0, 1:1 + zh, 1:1 + zw, :] = val.astype(cr.dtype)


def _make_conv_block_kernel(H, W, fold_k, do_relu, do_pool,
                            emit_conv, emit_relu, emit_post):
    """Fused 3x3/pad-1 conv + bias (+ReLU) (+2x2 maxpool) on one (image, Cout tile).

    Refs: x (1, H+2, W+2, Cin_s) f32 carry with zero halo, w (9*Cin_s, TC) bf16,
    b (1, TC) f32; outputs in order:
      [conv pre-activation f32], [post-ReLU pre-pool f32],
      [final value f32 (if collected)], carry (1, ho+2, wo+2, TC) with zero halo.
    """

    def kernel(x_ref, w_ref, b_ref, *o_refs):
        cin = x_ref.shape[-1]
        tc = w_ref.shape[-1]
        # 9 shifted tap views of the spatially pre-padded block, (kh, kw) order,
        # cast to bf16 so the MXU runs its fast path (accumulate in f32).
        cols = [x_ref[0, kh:kh + H, kw:kw + W, :]
                .reshape(H * W, cin).astype(MXU_DTYPE)
                for kh in range(3) for kw in range(3)]
        if fold_k:
            # Lane-aligned channels: one K = 9*Cin_s matmul fills the MXU
            # (v6e/v7x 256-deep) and removes 8 accumulator adds.
            a = jnp.concatenate(cols, axis=-1)               # (H*W, 9*Cin_s)
            y = jnp.dot(a, w_ref[...], preferred_element_type=jnp.float32)
        else:
            # Tiny-C stem: per-tap accumulation (K is tiny either way); the
            # accumulator is only a few vregs, no scratch needed.
            y = jnp.zeros((H * W, tc), jnp.float32)
            for k, col in enumerate(cols):
                y = y + jnp.dot(col, w_ref[k * cin:(k + 1) * cin, :],
                                preferred_element_type=jnp.float32)
        y = y + b_ref[...]                                   # f32 epilogue
        i = 0
        if emit_conv:                                        # pre-activation feature
            o_refs[i][0] = y.reshape(H, W, tc)
            i += 1
        z = jnp.maximum(y, 0.0) if do_relu else y
        if emit_relu:                                        # post-ReLU, pre-pool
            o_refs[i][0] = z.reshape(H, W, tc)
            i += 1
        z = z.reshape(H, W, tc)
        if do_pool:
            z = _pool2x2_hwc(z)
        if emit_post:                                        # final collected value
            o_refs[i][0] = z
            i += 1
        _store_padded_carry(o_refs[i], z)                    # next layer's input

    return kernel


# ------------------------------ pallas_call wrappers --------------------------

def conv_block(x_pad, w_mat, b_row, *, cout_s, do_relu, do_pool,
               emit_conv, emit_relu, emit_post):
    """x_pad: (N, H+2, W+2, Cin_s) carry with zero 1-px spatial halo."""
    N, Hp, Wp, cin_s = x_pad.shape
    H, W = Hp - 2, Wp - 2
    K = w_mat.shape[0]
    assert K == 9 * cin_s and w_mat.shape[1] == cout_s
    ho, wo = (H // 2, W // 2) if do_pool else (H, W)
    tc = min(cout_s, LANE)               # Cout tile -> second parallel grid axis
    n_ct = cout_s // tc
    fold_k = (cin_s % LANE == 0)         # fold K only when chunks are lane-aligned

    def tiled(h, w):
        return pl.BlockSpec((1, h, w, tc), lambda n, j: (n, 0, 0, j))

    out_shapes, out_specs = [], []
    if emit_conv:
        out_shapes.append(jax.ShapeDtypeStruct((N, H, W, cout_s), jnp.float32))
        out_specs.append(tiled(H, W))
    if emit_relu:
        out_shapes.append(jax.ShapeDtypeStruct((N, H, W, cout_s), jnp.float32))
        out_specs.append(tiled(H, W))
    if emit_post:
        out_shapes.append(jax.ShapeDtypeStruct((N, ho, wo, cout_s), jnp.float32))
        out_specs.append(tiled(ho, wo))
    out_shapes.append(jax.ShapeDtypeStruct((N, ho + 2, wo + 2, cout_s), CARRY_DTYPE))
    out_specs.append(tiled(ho + 2, wo + 2))

    outs = pl.pallas_call(
        _make_conv_block_kernel(H, W, fold_k, do_relu, do_pool,
                                emit_conv, emit_relu, emit_post),
        out_shape=tuple(out_shapes),
        grid=(N, n_ct),
        in_specs=[
            pl.BlockSpec((1, Hp, Wp, cin_s), lambda n, j: (n, 0, 0, 0)),
            # TODO(synk): at real VGG sizes, single-buffer (pl.Buffered(1)) or
            #             K-tile these resident weights for v7x's 64 MiB VMEM.
            pl.BlockSpec((K, tc), lambda n, j: (0, j)),
            pl.BlockSpec((1, tc), lambda n, j: (0, j)),
        ],
        out_specs=tuple(out_specs),
        compiler_params=pltpu.CompilerParams(
            dimension_semantics=("parallel", "parallel")),
    )(x_pad, w_mat, b_row)
    if not isinstance(outs, (tuple, list)):
        outs = (outs,)
    return tuple(outs)


def relu_block(x_pad, *, emit):
    """Standalone ReLU on a halo-padded carry (only used when not fused)."""
    N, Hp, Wp, C = x_pad.shape
    H, W = Hp - 2, Wp - 2

    def kernel(x_ref, *o_refs):
        z = jnp.maximum(x_ref[...], 0.0).astype(x_ref.dtype)
        i = 0
        if emit:
            o_refs[i][0] = z[0, 1:1 + H, 1:1 + W, :].astype(jnp.float32)
            i += 1
        o_refs[i][...] = z                      # zero halo stays zero under ReLU

    spec = pl.BlockSpec((1, Hp, Wp, C), lambda n: (n, 0, 0, 0))
    out_shapes, out_specs = [], []
    if emit:
        out_shapes.append(jax.ShapeDtypeStruct((N, H, W, C), jnp.float32))
        out_specs.append(pl.BlockSpec((1, H, W, C), lambda n: (n, 0, 0, 0)))
    out_shapes.append(jax.ShapeDtypeStruct((N, Hp, Wp, C), CARRY_DTYPE))
    out_specs.append(spec)

    outs = pl.pallas_call(
        kernel, out_shape=tuple(out_shapes), grid=(N,),
        in_specs=[spec], out_specs=tuple(out_specs),
        compiler_params=pltpu.CompilerParams(dimension_semantics=("parallel",)),
    )(x_pad)
    if not isinstance(outs, (tuple, list)):
        outs = (outs,)
    return tuple(outs)


def pool_block(x_pad, *, emit):
    """Standalone 2x2 max pool on a halo-padded carry (only used when not fused)."""
    N, Hp, Wp, C = x_pad.shape
    H, W = Hp - 2, Wp - 2
    ho, wo = H // 2, W // 2

    def kernel(x_ref, *o_refs):
        z = _pool2x2_hwc(x_ref[0, 1:1 + H, 1:1 + W, :].astype(jnp.float32))
        i = 0
        if emit:
            o_refs[i][0] = z
            i += 1
        _store_padded_carry(o_refs[i], z)

    out_shapes, out_specs = [], []
    if emit:
        out_shapes.append(jax.ShapeDtypeStruct((N, ho, wo, C), jnp.float32))
        out_specs.append(pl.BlockSpec((1, ho, wo, C), lambda n: (n, 0, 0, 0)))
    out_shapes.append(jax.ShapeDtypeStruct((N, ho + 2, wo + 2, C), CARRY_DTYPE))
    out_specs.append(pl.BlockSpec((1, ho + 2, wo + 2, C), lambda n: (n, 0, 0, 0)))

    outs = pl.pallas_call(
        kernel, out_shape=tuple(out_shapes), grid=(N,),
        in_specs=[pl.BlockSpec((1, Hp, Wp, C), lambda n: (n, 0, 0, 0))],
        out_specs=tuple(out_specs),
        compiler_params=pltpu.CompilerParams(dimension_semantics=("parallel",)),
    )(x_pad)
    if not isinstance(outs, (tuple, list)):
        outs = (outs,)
    return tuple(outs)


# ------------------------------ StyleContentModel -----------------------------

class StyleContentModel:
    """JAX/Pallas port of the PyTorch StyleContentModel feature extractor.

    `layers`: list of ('conv', (w, b)) | ('relu', None) | ('pool', None),
    mirroring the nn.Sequential children walked by the PyTorch module.
    """

    def __init__(self, layers, style_layers, content_layers):
        self.style_layers = tuple(style_layers)
        self.content_layers = tuple(content_layers)
        self._collected = set(self.style_layers) | set(self.content_layers)

        self.layer_names = []      # kept for parity with the PyTorch module
        self.blocks = []
        layers = list(layers)
        i = 1
        idx = 0
        while idx < len(layers):
            kind, params = layers[idx]
            if kind == 'conv':
                w, b = params
                assert w.shape[2] == 3 and w.shape[3] == 3, "only 3x3 convs supported"
                conv_name = f'conv_{i}'
                i += 1
                self.layer_names.append(conv_name)
                has_relu = has_pool = False
                relu_name = pool_name = None
                j = idx + 1
                if j < len(layers) and layers[j][0] == 'relu':
                    has_relu, relu_name = True, f'relu_{i - 1}'
                    self.layer_names.append(relu_name)
                    j += 1
                if j < len(layers) and layers[j][0] == 'pool':
                    has_pool, pool_name = True, f'pool_{i - 1}'
                    self.layer_names.append(pool_name)
                    j += 1
                cout, cin = int(w.shape[0]), int(w.shape[1])
                cin_s, cout_s = _c_store(cin), _c_store(cout)
                # OIHW -> (kh, kw, cin, cout), pad stored channels, fold taps
                # into K: (9*Cin_s, Cout_s), stored in bf16 for the MXU.
                w4 = jnp.transpose(jnp.asarray(w, jnp.float32), (2, 3, 1, 0))
                w4 = jnp.pad(w4, ((0, 0), (0, 0),
                                  (0, cin_s - cin), (0, cout_s - cout)))
                w_mat = w4.reshape(9 * cin_s, cout_s).astype(MXU_DTYPE)
                b_row = jnp.pad(jnp.asarray(b, jnp.float32),
                                (0, cout_s - cout)).reshape(1, cout_s)
                final_name = (pool_name if has_pool
                              else (relu_name if has_relu else conv_name))
                self.blocks.append(dict(
                    kind='conv_block', w_mat=w_mat, b_row=b_row,
                    cout=cout, cout_s=cout_s,
                    conv_name=conv_name, relu_name=relu_name,
                    pool_name=pool_name, final_name=final_name,
                    has_relu=has_relu, has_pool=has_pool,
                    emit_conv=(conv_name in self._collected) and (has_relu or has_pool),
                    emit_relu=has_relu and has_pool and (relu_name in self._collected),
                    emit_post=(final_name in self._collected)))
                idx = j
            elif kind == 'relu':
                name = f'relu_{i - 1}'
                self.layer_names.append(name)
                self.blocks.append(dict(kind='relu', name=name))
                idx += 1
            elif kind == 'pool':
                name = f'pool_{i - 1}'
                self.layer_names.append(name)
                self.blocks.append(dict(kind='pool', name=name))
                idx += 1
            else:
                # TODO(synk): BatchNorm2d ('bn_{i-1}') not implemented here.
                idx += 1

        self._forward = jax.jit(self._forward_impl)

    def _forward_impl(self, x_nchw):
        N, C, H, W = x_nchw.shape
        # One-time prologue: NCHW -> NHWC, stored-channel pad, 1-px spatial halo.
        x = jnp.transpose(x_nchw, (0, 2, 3, 1)).astype(CARRY_DTYPE)
        c0 = _c_store(C)
        if c0 != C:
            x = jnp.pad(x, ((0, 0), (0, 0), (0, 0), (0, c0 - C)))
        x = jnp.pad(x, ((0, 0), (1, 1), (1, 1), (0, 0)))
        c_valid = C

        style_feats, content_feats = [], []

        def collect(name, feat_nhwc, c):
            if feat_nhwc.shape[-1] != c:
                feat_nhwc = feat_nhwc[..., :c]                # drop channel pad
            feat = jnp.transpose(feat_nhwc, (0, 3, 1, 2))     # -> NCHW (API parity)
            if name in self.style_layers:
                style_feats.append(feat)
            if name in self.content_layers:
                content_feats.append(feat)

        for blk in self.blocks:
            if blk['kind'] == 'conv_block':
                outs = conv_block(x, blk['w_mat'], blk['b_row'],
                                  cout_s=blk['cout_s'],
                                  do_relu=blk['has_relu'], do_pool=blk['has_pool'],
                                  emit_conv=blk['emit_conv'],
                                  emit_relu=blk['emit_relu'],
                                  emit_post=blk['emit_post'])
                c_valid = blk['cout']
                k = 0
                if blk['emit_conv']:
                    collect(blk['conv_name'], outs[k], c_valid)
                    k += 1
                if blk['emit_relu']:
                    collect(blk['relu_name'], outs[k], c_valid)
                    k += 1
                if blk['emit_post']:
                    collect(blk['final_name'], outs[k], c_valid)
                    k += 1
                x = outs[k]
            elif blk['kind'] == 'relu':
                emit = blk['name'] in self._collected
                outs = relu_block(x, emit=emit)
                k = 0
                if emit:
                    collect(blk['name'], outs[k], c_valid)
                    k += 1
                x = outs[k]
            elif blk['kind'] == 'pool':
                emit = blk['name'] in self._collected
                outs = pool_block(x, emit=emit)
                k = 0
                if emit:
                    collect(blk['name'], outs[k], c_valid)
                    k += 1
                x = outs[k]

        return style_feats, content_feats

    def __call__(self, x_nchw):
        return self._forward(x_nchw)


# ----------------------------------- main ------------------------------------

if __name__ == "__main__":
    key = jax.random.PRNGKey(0)
    ks = jax.random.split(key, 8)

    def conv_params(k, cin, cout):
        kw, kb = jax.random.split(k)
        w = jax.random.normal(kw, (cout, cin, 3, 3), jnp.float32) * 0.1
        b = jax.random.normal(kb, (cout,), jnp.float32) * 0.05
        return w, b

    p1 = conv_params(ks[1], 3, 8)
    p2 = conv_params(ks[2], 8, 8)
    p3 = conv_params(ks[3], 8, 16)
    p4 = conv_params(ks[4], 16, 16)

    # Small VGG-style stack (conv/relu/conv/relu/pool/conv/relu/conv/relu)
    layers = [('conv', p1), ('relu', None),
              ('conv', p2), ('relu', None),
              ('pool', None),
              ('conv', p3), ('relu', None),
              ('conv', p4), ('relu', None)]

    style_layer_names = ('conv_1', 'conv_2', 'conv_3')
    content_layer_names = ('conv_4',)

    model = StyleContentModel(layers, style_layer_names, content_layer_names)

    x = jax.random.normal(ks[0], (2, 3, 16, 16), jnp.float32)  # NCHW, like PyTorch

    style_feats, content_feats = model(x)
    jax.block_until_ready(style_feats + content_feats)

    # ---- pure-JAX reference (NCHW, f32) to verify semantics ----
    def ref_conv(t, w, b):
        y = jax.lax.conv_general_dilated(
            t, w, (1, 1), ((1, 1), (1, 1)),
            dimension_numbers=('NCHW', 'OIHW', 'NCHW'))
        return y + b[None, :, None, None]

    def ref_pool(t):
        return jax.lax.reduce_window(t, -jnp.inf, jax.lax.max,
                                     (1, 1, 2, 2), (1, 1, 2, 2), 'VALID')

    ref_specs = [('conv_1', lambda t: ref_conv(t, *p1)), ('relu_1', jax.nn.relu),
                 ('conv_2', lambda t: ref_conv(t, *p2)), ('relu_2', jax.nn.relu),
                 ('pool_2', ref_pool),
                 ('conv_3', lambda t: ref_conv(t, *p3)), ('relu_3', jax.nn.relu),
                 ('conv_4', lambda t: ref_conv(t, *p4)), ('relu_4', jax.nn.relu)]
    xr = x
    ref_style, ref_content = [], []
    for name, fn in ref_specs:
        xr = fn(xr)
        if name in style_layer_names:
            ref_style.append(xr)
        if name in content_layer_names:
            ref_content.append(xr)

    # Tolerances loosened for the bf16 MXU path (weights + activation operands).
    for got, want in zip(style_feats + content_feats, ref_style + ref_content):
        np.testing.assert_allclose(np.asarray(got), np.asarray(want),
                                   rtol=2e-2, atol=8e-2)

    print("KERNEL_OK")
</pallas_src>

<mosaic_0001>
module attributes {stable_mosaic.version = 11 : i64} {
  func.func @kernel(%arg0: i32, %arg1: i32, %arg2: memref<1x18x18x8xf32, #tpu.memory_space<vmem>>, %arg3: memref<72x8xbf16, #tpu.memory_space<vmem>>, %arg4: memref<1x8xf32, #tpu.memory_space<vmem>>, %arg5: memref<1x16x16x8xf32, #tpu.memory_space<vmem>>, %arg6: memref<1x18x18x8xf32, #tpu.memory_space<vmem>>) attributes {dimension_semantics = [#tpu.dimension_semantics<parallel>, #tpu.dimension_semantics<parallel>], iteration_bounds = array<i64: 2, 1>, scalar_prefetch = 0 : i64, scratch_operands = 0 : i64, tpu.core_type = #tpu.core_type<tc>, window_params = [{transform_indices = @transform_0, window_bounds = array<i64: 1, 18, 18, 8>}, {transform_indices = @transform_1, window_bounds = array<i64: 72, 8>}, {transform_indices = @transform_2, window_bounds = array<i64: 1, 8>}, {transform_indices = @transform_3, window_bounds = array<i64: 1, 16, 16, 8>}, {transform_indices = @transform_4, window_bounds = array<i64: 1, 18, 18, 8>}]} {
    %c0 = arith.constant 0 : index
    %c0_0 = arith.constant 0 : index
    %c0_1 = arith.constant 0 : index
    %c0_2 = arith.constant 0 : index
    %0 = vector.load %arg2[%c0, %c0_0, %c0_1, %c0_2] : memref<1x18x18x8xf32, #tpu.memory_space<vmem>>, vector<1x16x16x8xf32>
    %1 = vector.shape_cast %0 : vector<1x16x16x8xf32> to vector<16x16x8xf32>
    %2 = vector.shape_cast %1 : vector<16x16x8xf32> to vector<256x8xf32>
    %3 = arith.truncf %2 : vector<256x8xf32> to vector<256x8xbf16>
    %c0_3 = arith.constant 0 : index
    %c0_4 = arith.constant 0 : index
    %c1 = arith.constant 1 : index
    %c0_5 = arith.constant 0 : index
    %4 = vector.load %arg2[%c0_3, %c0_4, %c1, %c0_5] : memref<1x18x18x8xf32, #tpu.memory_space<vmem>>, vector<1x16x16x8xf32>
    %5 = vector.shape_cast %4 : vector<1x16x16x8xf32> to vector<16x16x8xf32>
    %6 = vector.shape_cast %5 : vector<16x16x8xf32> to vector<256x8xf32>
    %7 = arith.truncf %6 : vector<256x8xf32> to vector<256x8xbf16>
    %c0_6 = arith.constant 0 : index
    %c0_7 = arith.constant 0 : index
    %c2 = arith.constant 2 : index
    %c0_8 = arith.constant 0 : index
    %8 = vector.load %arg2[%c0_6, %c0_7, %c2, %c0_8] : memref<1x18x18x8xf32, #tpu.memory_space<vmem>>, vector<1x16x16x8xf32>
    %9 = vector.shape_cast %8 : vector<1x16x16x8xf32> to vector<16x16x8xf32>
    %10 = vector.shape_cast %9 : vector<16x16x8xf32> to vector<256x8xf32>
    %11 = arith.truncf %10 : vector<256x8xf32> to vector<256x8xbf16>
    %c0_9 = arith.constant 0 : index
    %c1_10 = arith.constant 1 : index
    %c0_11 = arith.constant 0 : index
    %c0_12 = arith.constant 0 : index
    %12 = vector.load %arg2[%c0_9, %c1_10, %c0_11, %c0_12] : memref<1x18x18x8xf32, #tpu.memory_space<vmem>>, vector<1x16x16x8xf32>
    %13 = vector.shape_cast %12 : vector<1x16x16x8xf32> to vector<16x16x8xf32>
    %14 = vector.shape_cast %13 : vector<16x16x8xf32> to vector<256x8xf32>
    %15 = arith.truncf %14 : vector<256x8xf32> to vector<256x8xbf16>
    %c0_13 = arith.constant 0 : index
    %c1_14 = arith.constant 1 : index
    %c1_15 = arith.constant 1 : index
    %c0_16 = arith.constant 0 : index
    %16 = vector.load %arg2[%c0_13, %c1_14, %c1_15, %c0_16] : memref<1x18x18x8xf32, #tpu.memory_space<vmem>>, vector<1x16x16x8xf32>
    %17 = vector.shape_cast %16 : vector<1x16x16x8xf32> to vector<16x16x8xf32>
    %18 = vector.shape_cast %17 : vector<16x16x8xf32> to vector<256x8xf32>
    %19 = arith.truncf %18 : vector<256x8xf32> to vector<256x8xbf16>
    %c0_17 = arith.constant 0 : index
    %c1_18 = arith.constant 1 : index
    %c2_19 = arith.constant 2 : index
    %c0_20 = arith.constant 0 : index
    %20 = vector.load %arg2[%c0_17, %c1_18, %c2_19, %c0_20] : memref<1x18x18x8xf32, #tpu.memory_space<vmem>>, vector<1x16x16x8xf32>
    %21 = vector.shape_cast %20 : vector<1x16x16x8xf32> to vector<16x16x8xf32>
    %22 = vector.shape_cast %21 : vector<16x16x8xf32> to vector<256x8xf32>
    %23 = arith.truncf %22 : vector<256x8xf32> to vector<256x8xbf16>
    %c0_21 = arith.constant 0 : index
    %c2_22 = arith.constant 2 : index
    %c0_23 = arith.constant 0 : index
    %c0_24 = arith.constant 0 : index
    %24 = vector.load %arg2[%c0_21, %c2_22, %c0_23, %c0_24] : memref<1x18x18x8xf32, #tpu.memory_space<vmem>>, vector<1x16x16x8xf32>
    %25 = vector.shape_cast %24 : vector<1x16x16x8xf32> to vector<16x16x8xf32>
    %26 = vector.shape_cast %25 : vector<16x16x8xf32> to vector<256x8xf32>
    %27 = arith.truncf %26 : vector<256x8xf32> to vector<256x8xbf16>
    %c0_25 = arith.constant 0 : index
    %c2_26 = arith.constant 2 : index
    %c1_27 = arith.constant 1 : index
    %c0_28 = arith.constant 0 : index
    %28 = vector.load %arg2[%c0_25, %c2_26, %c1_27, %c0_28] : memref<1x18x18x8xf32, #tpu.memory_space<vmem>>, vector<1x16x16x8xf32>
    %29 = vector.shape_cast %28 : vector<1x16x16x8xf32> to vector<16x16x8xf32>
    %30 = vector.shape_cast %29 : vector<16x16x8xf32> to vector<256x8xf32>
    %31 = arith.truncf %30 : vector<256x8xf32> to vector<256x8xbf16>
    %c0_29 = arith.constant 0 : index
    %c2_30 = arith.constant 2 : index
    %c2_31 = arith.constant 2 : index
    %c0_32 = arith.constant 0 : index
    %32 = vector.load %arg2[%c0_29, %c2_30, %c2_31, %c0_32] : memref<1x18x18x8xf32, #tpu.memory_space<vmem>>, vector<1x16x16x8xf32>
    %33 = vector.shape_cast %32 : vector<1x16x16x8xf32> to vector<16x16x8xf32>
    %34 = vector.shape_cast %33 : vector<16x16x8xf32> to vector<256x8xf32>
    %35 = arith.truncf %34 : vector<256x8xf32> to vector<256x8xbf16>
    %cst = arith.constant 0.000000e+00 : f32
    %36 = vector.broadcast %cst : f32 to vector<256x8xf32>
    %c0_33 = arith.constant 0 : index
    %c0_34 = arith.constant 0 : index
    %37 = vector.load %arg3[%c0_33, %c0_34] : memref<72x8xbf16, #tpu.memory_space<vmem>>, vector<8x8xbf16>
    %cst_35 = arith.constant dense<0.000000e+00> : vector<256x8xf32>
    %38 = tpu.matmul %3, %37, %cst_35 {dimension_numbers = #tpu.dot_dimension_numbers<[1], [0], [0], [1], [0, 0, 1, 1], [], []>} : vector<256x8xbf16>, vector<8x8xbf16>, vector<256x8xf32> -> vector<256x8xf32>
    %39 = arith.addf %36, %38 : vector<256x8xf32>
    %c8 = arith.constant 8 : index
    %c0_36 = arith.constant 0 : index
    %40 = vector.load %arg3[%c8, %c0_36] : memref<72x8xbf16, #tpu.memory_space<vmem>>, vector<8x8xbf16>
    %cst_37 = arith.constant dense<0.000000e+00> : vector<256x8xf32>
    %41 = tpu.matmul %7, %40, %cst_37 {dimension_numbers = #tpu.dot_dimension_numbers<[1], [0], [0], [1], [0, 0, 1, 1], [], []>} : vector<256x8xbf16>, vector<8x8xbf16>, vector<256x8xf32> -> vector<256x8xf32>
    %42 = arith.addf %39, %41 : vector<256x8xf32>
    %c16 = arith.constant 16 : index
    %c0_38 = arith.constant 0 : index
    %43 = vector.load %arg3[%c16, %c0_38] : memref<72x8xbf16, #tpu.memory_space<vmem>>, vector<8x8xbf16>
    %cst_39 = arith.constant dense<0.000000e+00> : vector<256x8xf32>
    %44 = tpu.matmul %11, %43, %cst_39 {dimension_numbers = #tpu.dot_dimension_numbers<[1], [0], [0], [1], [0, 0, 1, 1], [], []>} : vector<256x8xbf16>, vector<8x8xbf16>, vector<256x8xf32> -> vector<256x8xf32>
    %45 = arith.addf %42, %44 : vector<256x8xf32>
    %c24 = arith.constant 24 : index
    %c0_40 = arith.constant 0 : index
    %46 = vector.load %arg3[%c24, %c0_40] : memref<72x8xbf16, #tpu.memory_space<vmem>>, vector<8x8xbf16>
    %cst_41 = arith.constant dense<0.000000e+00> : vector<256x8xf32>
    %47 = tpu.matmul %15, %46, %cst_41 {dimension_numbers = #tpu.dot_dimension_numbers<[1], [0], [0], [1], [0, 0, 1, 1], [], []>} : vector<256x8xbf16>, vector<8x8xbf16>, vector<256x8xf32> -> vector<256x8xf32>
    %48 = arith.addf %45, %47 : vector<256x8xf32>
    %c32 = arith.constant 32 : index
    %c0_42 = arith.constant 0 : index
    %49 = vector.load %arg3[%c32, %c0_42] : memref<72x8xbf16, #tpu.memory_space<vmem>>, vector<8x8xbf16>
    %cst_43 = arith.constant dense<0.000000e+00> : vector<256x8xf32>
    %50 = tpu.matmul %19, %49, %cst_43 {dimension_numbers = #tpu.dot_dimension_numbers<[1], [0], [0], [1], [0, 0, 1, 1], [], []>} : vector<256x8xbf16>, vector<8x8xbf16>, vector<256x8xf32> -> vector<256x8xf32>
    %51 = arith.addf %48, %50 : vector<256x8xf32>
    %c40 = arith.constant 40 : index
    %c0_44 = arith.constant 0 : index
    %52 = vector.load %arg3[%c40, %c0_44] : memref<72x8xbf16, #tpu.memory_space<vmem>>, vector<8x8xbf16>
    %cst_45 = arith.constant dense<0.000000e+00> : vector<256x8xf32>
    %53 = tpu.matmul %23, %52, %cst_45 {dimension_numbers = #tpu.dot_dimension_numbers<[1], [0], [0], [1], [0, 0, 1, 1], [], []>} : vector<256x8xbf16>, vector<8x8xbf16>, vector<256x8xf32> -> vector<256x8xf32>
    %54 = arith.addf %51, %53 : vector<256x8xf32>
    %c48 = arith.constant 48 : index
    %c0_46 = arith.constant 0 : index
    %55 = vector.load %arg3[%c48, %c0_46] : memref<72x8xbf16, #tpu.memory_space<vmem>>, vector<8x8xbf16>
    %cst_47 = arith.constant dense<0.000000e+00> : vector<256x8xf32>
    %56 = tpu.matmul %27, %55, %cst_47 {dimension_numbers = #tpu.dot_dimension_numbers<[1], [0], [0], [1], [0, 0, 1, 1], [], []>} : vector<256x8xbf16>, vector<8x8xbf16>, vector<256x8xf32> -> vector<256x8xf32>
    %57 = arith.addf %54, %56 : vector<256x8xf32>
    %c56 = arith.constant 56 : index
    %c0_48 = arith.constant 0 : index
    %58 = vector.load %arg3[%c56, %c0_48] : memref<72x8xbf16, #tpu.memory_space<vmem>>, vector<8x8xbf16>
    %cst_49 = arith.constant dense<0.000000e+00> : vector<256x8xf32>
    %59 = tpu.matmul %31, %58, %cst_49 {dimension_numbers = #tpu.dot_dimension_numbers<[1], [0], [0], [1], [0, 0, 1, 1], [], []>} : vector<256x8xbf16>, vector<8x8xbf16>, vector<256x8xf32> -> vector<256x8xf32>
    %60 = arith.addf %57, %59 : vector<256x8xf32>
    %c64 = arith.constant 64 : index
    %c0_50 = arith.constant 0 : index
    %61 = vector.load %arg3[%c64, %c0_50] : memref<72x8xbf16, #tpu.memory_space<vmem>>, vector<8x8xbf16>
    %cst_51 = arith.constant dense<0.000000e+00> : vector<256x8xf32>
    %62 = tpu.matmul %35, %61, %cst_51 {dimension_numbers = #tpu.dot_dimension_numbers<[1], [0], [0], [1], [0, 0, 1, 1], [], []>} : vector<256x8xbf16>, vector<8x8xbf16>, vector<256x8xf32> -> vector<256x8xf32>
    %63 = arith.addf %60, %62 : vector<256x8xf32>
    %c0_52 = arith.constant 0 : index
    %c0_53 = arith.constant 0 : index
    %64 = vector.load %arg4[%c0_52, %c0_53] : memref<1x8xf32, #tpu.memory_space<vmem>>, vector<1x8xf32>
    %65 = vector.broadcast %64 : vector<1x8xf32> to vector<256x8xf32>
    %66 = arith.addf %63, %65 : vector<256x8xf32>
    %67 = vector.shape_cast %66 : vector<256x8xf32> to vector<16x16x8xf32>
    %c0_54 = arith.constant 0 : index
    %c0_55 = arith.constant 0 : index
    %c0_56 = arith.constant 0 : index
    %c0_57 = arith.constant 0 : index
    %68 = vector.load %arg5[%c0_54, %c0_55, %c0_56, %c0_57] : memref<1x16x16x8xf32, #tpu.memory_space<vmem>>, vector<1x16x16x8xf32>
    %69 = vector.shape_cast %68 : vector<1x16x16x8xf32> to vector<16x16x8xf32>
    %70 = vector.shape_cast %67 : vector<16x16x8xf32> to vector<1x16x16x8xf32>
    tpu.vector_store %arg5[%c0_54, %c0_55, %c0_56, %c0_57], %70 {strides = array<i32>} : memref<1x16x16x8xf32, #tpu.memory_space<vmem>>, vector<1x16x16x8xf32>,
    %cst_58 = arith.constant 0.000000e+00 : f32
    %71 = vector.broadcast %cst_58 : f32 to vector<256x8xf32>
    %72 = arith.maximumf %66, %71 : vector<256x8xf32>
    %73 = vector.shape_cast %72 : vector<256x8xf32> to vector<16x16x8xf32>
    %cst_59 = arith.constant 0.000000e+00 : f32
    %74 = vector.broadcast %cst_59 : f32 to vector<1x18x18x8xf32>
    %c0_60 = arith.constant 0 : index
    %c0_61 = arith.constant 0 : index
    %c0_62 = arith.constant 0 : index
    %c0_63 = arith.constant 0 : index
    %75 = vector.load %arg6[%c0_60, %c0_61, %c0_62, %c0_63] : memref<1x18x18x8xf32, #tpu.memory_space<vmem>>, vector<1x18x18x8xf32>
    tpu.vector_store %arg6[%c0_60, %c0_61, %c0_62, %c0_63], %74 {strides = array<i32>} : memref<1x18x18x8xf32, #tpu.memory_space<vmem>>, vector<1x18x18x8xf32>,
    %c0_64 = arith.constant 0 : index
    %c1_65 = arith.constant 1 : index
    %c1_66 = arith.constant 1 : index
    %c0_67 = arith.constant 0 : index
    %76 = vector.load %arg6[%c0_64, %c1_65, %c1_66, %c0_67] : memref<1x18x18x8xf32, #tpu.memory_space<vmem>>, vector<1x16x16x8xf32>
    %77 = vector.shape_cast %76 : vector<1x16x16x8xf32> to vector<16x16x8xf32>
    %78 = vector.shape_cast %73 : vector<16x16x8xf32> to vector<1x16x16x8xf32>
    tpu.vector_store %arg6[%c0_64, %c1_65, %c1_66, %c0_67], %78 {strides = array<i32>} : memref<1x18x18x8xf32, #tpu.memory_space<vmem>>, vector<1x16x16x8xf32>,
    return
  }
  func.func @transform_0(%arg0: i32, %arg1: i32) -> (i32, i32, i32, i32) {
    %c0_i32 = arith.constant 0 : i32
    %c0_i32_0 = arith.constant 0 : i32
    %c0_i32_1 = arith.constant 0 : i32
    %c0_i32_2 = arith.constant 0 : i32
    return %arg0, %c0_i32, %c0_i32_0, %c0_i32_1 : i32, i32, i32, i32
  }
  func.func @transform_1(%arg0: i32, %arg1: i32) -> (i32, i32) {
    %c0_i32 = arith.constant 0 : i32
    %c0_i32_0 = arith.constant 0 : i32
    return %c0_i32, %arg1 : i32, i32
  }
  func.func @transform_2(%arg0: i32, %arg1: i32) -> (i32, i32) {
    %c0_i32 = arith.constant 0 : i32
    %c0_i32_0 = arith.constant 0 : i32
    return %c0_i32, %arg1 : i32, i32
  }
  func.func @transform_3(%arg0: i32, %arg1: i32) -> (i32, i32, i32, i32) {
    %c0_i32 = arith.constant 0 : i32
    %c0_i32_0 = arith.constant 0 : i32
    %c0_i32_1 = arith.constant 0 : i32
    return %arg0, %c0_i32, %c0_i32_0, %arg1 : i32, i32, i32, i32
  }
  func.func @transform_4(%arg0: i32, %arg1: i32) -> (i32, i32, i32, i32) {
    %c0_i32 = arith.constant 0 : i32
    %c0_i32_0 = arith.constant 0 : i32
    %c0_i32_1 = arith.constant 0 : i32
    return %arg0, %c0_i32, %c0_i32_0, %arg1 : i32, i32, i32, i32
  }
}

module attributes {stable_mosaic.version = 11 : i64} {
  func.func @kernel(%arg0: i32, %arg1: i32, %arg2: memref<1x18x18x8xf32, #tpu.memory_space<vmem>>, %arg3: memref<72x8xbf16, #tpu.memory_space<vmem>>, %arg4: memref<1x8xf32, #tpu.memory_space<vmem>>, %arg5: memref<1x16x16x8xf32, #tpu.memory_space<vmem>>, %arg6: memref<1x10x10x8xf32, #tpu.memory_space<vmem>>) attributes {dimension_semantics = [#tpu.dimension_semantics<parallel>, #tpu.dimension_semantics<parallel>], iteration_bounds = array<i64: 2, 1>, scalar_prefetch = 0 : i64, scratch_operands = 0 : i64, tpu.core_type = #tpu.core_type<tc>, window_params = [{transform_indices = @transform_0, window_bounds = array<i64: 1, 18, 18, 8>}, {transform_indices = @transform_1, window_bounds = array<i64: 72, 8>}, {transform_indices = @transform_2, window_bounds = array<i64: 1, 8>}, {transform_indices = @transform_3, window_bounds = array<i64: 1, 16, 16, 8>}, {transform_indices = @transform_4, window_bounds = array<i64: 1, 10, 10, 8>}]} {
    %c0 = arith.constant 0 : index
    %c0_0 = arith.constant 0 : index
    %c0_1 = arith.constant 0 : index
    %c0_2 = arith.constant 0 : index
    %0 = vector.load %arg2[%c0, %c0_0, %c0_1, %c0_2] : memref<1x18x18x8xf32, #tpu.memory_space<vmem>>, vector<1x16x16x8xf32>
    %1 = vector.shape_cast %0 : vector<1x16x16x8xf32> to vector<16x16x8xf32>
    %2 = vector.shape_cast %1 : vector<16x16x8xf32> to vector<256x8xf32>
    %3 = arith.truncf %2 : vector<256x8xf32> to vector<256x8xbf16>
    %c0_3 = arith.constant 0 : index
    %c0_4 = arith.constant 0 : index
    %c1 = arith.constant 1 : index
    %c0_5 = arith.constant 0 : index
    %4 = vector.load %arg2[%c0_3, %c0_4, %c1, %c0_5] : memref<1x18x18x8xf32, #tpu.memory_space<vmem>>, vector<1x16x16x8xf32>
    %5 = vector.shape_cast %4 : vector<1x16x16x8xf32> to vector<16x16x8xf32>
    %6 = vector.shape_cast %5 : vector<16x16x8xf32> to vector<256x8xf32>
    %7 = arith.truncf %6 : vector<256x8xf32> to vector<256x8xbf16>
    %c0_6 = arith.constant 0 : index
    %c0_7 = arith.constant 0 : index
    %c2 = arith.constant 2 : index
    %c0_8 = arith.constant 0 : index
    %8 = vector.load %arg2[%c0_6, %c0_7, %c2, %c0_8] : memref<1x18x18x8xf32, #tpu.memory_space<vmem>>, vector<1x16x16x8xf32>
    %9 = vector.shape_cast %8 : vector<1x16x16x8xf32> to vector<16x16x8xf32>
    %10 = vector.shape_cast %9 : vector<16x16x8xf32> to vector<256x8xf32>
    %11 = arith.truncf %10 : vector<256x8xf32> to vector<256x8xbf16>
    %c0_9 = arith.constant 0 : index
    %c1_10 = arith.constant 1 : index
    %c0_11 = arith.constant 0 : index
    %c0_12 = arith.constant 0 : index
    %12 = vector.load %arg2[%c0_9, %c1_10, %c0_11, %c0_12] : memref<1x18x18x8xf32, #tpu.memory_space<vmem>>, vector<1x16x16x8xf32>
    %13 = vector.shape_cast %12 : vector<1x16x16x8xf32> to vector<16x16x8xf32>
    %14 = vector.shape_cast %13 : vector<16x16x8xf32> to vector<256x8xf32>
    %15 = arith.truncf %14 : vector<256x8xf32> to vector<256x8xbf16>
    %c0_13 = arith.constant 0 : index
    %c1_14 = arith.constant 1 : index
    %c1_15 = arith.constant 1 : index
    %c0_16 = arith.constant 0 : index
    %16 = vector.load %arg2[%c0_13, %c1_14, %c1_15, %c0_16] : memref<1x18x18x8xf32, #tpu.memory_space<vmem>>, vector<1x16x16x8xf32>
    %17 = vector.shape_cast %16 : vector<1x16x16x8xf32> to vector<16x16x8xf32>
    %18 = vector.shape_cast %17 : vector<16x16x8xf32> to vector<256x8xf32>
    %19 = arith.truncf %18 : vector<256x8xf32> to vector<256x8xbf16>
    %c0_17 = arith.constant 0 : index
    %c1_18 = arith.constant 1 : index
    %c2_19 = arith.constant 2 : index
    %c0_20 = arith.constant 0 : index
    %20 = vector.load %arg2[%c0_17, %c1_18, %c2_19, %c0_20] : memref<1x18x18x8xf32, #tpu.memory_space<vmem>>, vector<1x16x16x8xf32>
    %21 = vector.shape_cast %20 : vector<1x16x16x8xf32> to vector<16x16x8xf32>
    %22 = vector.shape_cast %21 : vector<16x16x8xf32> to vector<256x8xf32>
    %23 = arith.truncf %22 : vector<256x8xf32> to vector<256x8xbf16>
    %c0_21 = arith.constant 0 : index
    %c2_22 = arith.constant 2 : index
    %c0_23 = arith.constant 0 : index
    %c0_24 = arith.constant 0 : index
    %24 = vector.load %arg2[%c0_21, %c2_22, %c0_23, %c0_24] : memref<1x18x18x8xf32, #tpu.memory_space<vmem>>, vector<1x16x16x8xf32>
    %25 = vector.shape_cast %24 : vector<1x16x16x8xf32> to vector<16x16x8xf32>
    %26 = vector.shape_cast %25 : vector<16x16x8xf32> to vector<256x8xf32>
    %27 = arith.truncf %26 : vector<256x8xf32> to vector<256x8xbf16>
    %c0_25 = arith.constant 0 : index
    %c2_26 = arith.constant 2 : index
    %c1_27 = arith.constant 1 : index
    %c0_28 = arith.constant 0 : index
    %28 = vector.load %arg2[%c0_25, %c2_26, %c1_27, %c0_28] : memref<1x18x18x8xf32, #tpu.memory_space<vmem>>, vector<1x16x16x8xf32>
    %29 = vector.shape_cast %28 : vector<1x16x16x8xf32> to vector<16x16x8xf32>
    %30 = vector.shape_cast %29 : vector<16x16x8xf32> to vector<256x8xf32>
    %31 = arith.truncf %30 : vector<256x8xf32> to vector<256x8xbf16>
    %c0_29 = arith.constant 0 : index
    %c2_30 = arith.constant 2 : index
    %c2_31 = arith.constant 2 : index
    %c0_32 = arith.constant 0 : index
    %32 = vector.load %arg2[%c0_29, %c2_30, %c2_31, %c0_32] : memref<1x18x18x8xf32, #tpu.memory_space<vmem>>, vector<1x16x16x8xf32>
    %33 = vector.shape_cast %32 : vector<1x16x16x8xf32> to vector<16x16x8xf32>
    %34 = vector.shape_cast %33 : vector<16x16x8xf32> to vector<256x8xf32>
    %35 = arith.truncf %34 : vector<256x8xf32> to vector<256x8xbf16>
    %cst = arith.constant 0.000000e+00 : f32
    %36 = vector.broadcast %cst : f32 to vector<256x8xf32>
    %c0_33 = arith.constant 0 : index
    %c0_34 = arith.constant 0 : index
    %37 = vector.load %arg3[%c0_33, %c0_34] : memref<72x8xbf16, #tpu.memory_space<vmem>>, vector<8x8xbf16>
    %cst_35 = arith.constant dense<0.000000e+00> : vector<256x8xf32>
    %38 = tpu.matmul %3, %37, %cst_35 {dimension_numbers = #tpu.dot_dimension_numbers<[1], [0], [0], [1], [0, 0, 1, 1], [], []>} : vector<256x8xbf16>, vector<8x8xbf16>, vector<256x8xf32> -> vector<256x8xf32>
    %39 = arith.addf %36, %38 : vector<256x8xf32>
    %c8 = arith.constant 8 : index
    %c0_36 = arith.constant 0 : index
    %40 = vector.load %arg3[%c8, %c0_36] : memref<72x8xbf16, #tpu.memory_space<vmem>>, vector<8x8xbf16>
    %cst_37 = arith.constant dense<0.000000e+00> : vector<256x8xf32>
    %41 = tpu.matmul %7, %40, %cst_37 {dimension_numbers = #tpu.dot_dimension_numbers<[1], [0], [0], [1], [0, 0, 1, 1], [], []>} : vector<256x8xbf16>, vector<8x8xbf16>, vector<256x8xf32> -> vector<256x8xf32>
    %42 = arith.addf %39, %41 : vector<256x8xf32>
    %c16 = arith.constant 16 : index
    %c0_38 = arith.constant 0 : index
    %43 = vector.load %arg3[%c16, %c0_38] : memref<72x8xbf16, #tpu.memory_space<vmem>>, vector<8x8xbf16>
    %cst_39 = arith.constant dense<0.000000e+00> : vector<256x8xf32>
    %44 = tpu.matmul %11, %43, %cst_39 {dimension_numbers = #tpu.dot_dimension_numbers<[1], [0], [0], [1], [0, 0, 1, 1], [], []>} : vector<256x8xbf16>, vector<8x8xbf16>, vector<256x8xf32> -> vector<256x8xf32>
    %45 = arith.addf %42, %44 : vector<256x8xf32>
    %c24 = arith.constant 24 : index
    %c0_40 = arith.constant 0 : index
    %46 = vector.load %arg3[%c24, %c0_40] : memref<72x8xbf16, #tpu.memory_space<vmem>>, vector<8x8xbf16>
    %cst_41 = arith.constant dense<0.000000e+00> : vector<256x8xf32>
    %47 = tpu.matmul %15, %46, %cst_41 {dimension_numbers = #tpu.dot_dimension_numbers<[1], [0], [0], [1], [0, 0, 1, 1], [], []>} : vector<256x8xbf16>, vector<8x8xbf16>, vector<256x8xf32> -> vector<256x8xf32>
    %48 = arith.addf %45, %47 : vector<256x8xf32>
    %c32 = arith.constant 32 : index
    %c0_42 = arith.constant 0 : index
    %49 = vector.load %arg3[%c32, %c0_42] : memref<72x8xbf16, #tpu.memory_space<vmem>>, vector<8x8xbf16>
    %cst_43 = arith.constant dense<0.000000e+00> : vector<256x8xf32>
    %50 = tpu.matmul %19, %49, %cst_43 {dimension_numbers = #tpu.dot_dimension_numbers<[1], [0], [0], [1], [0, 0, 1, 1], [], []>} : vector<256x8xbf16>, vector<8x8xbf16>, vector<256x8xf32> -> vector<256x8xf32>
    %51 = arith.addf %48, %50 : vector<256x8xf32>
    %c40 = arith.constant 40 : index
    %c0_44 = arith.constant 0 : index
    %52 = vector.load %arg3[%c40, %c0_44] : memref<72x8xbf16, #tpu.memory_space<vmem>>, vector<8x8xbf16>
    %cst_45 = arith.constant dense<0.000000e+00> : vector<256x8xf32>
    %53 = tpu.matmul %23, %52, %cst_45 {dimension_numbers = #tpu.dot_dimension_numbers<[1], [0], [0], [1], [0, 0, 1, 1], [], []>} : vector<256x8xbf16>, vector<8x8xbf16>, vector<256x8xf32> -> vector<256x8xf32>
    %54 = arith.addf %51, %53 : vector<256x8xf32>
    %c48 = arith.constant 48 : index
    %c0_46 = arith.constant 0 : index
    %55 = vector.load %arg3[%c48, %c0_46] : memref<72x8xbf16, #tpu.memory_space<vmem>>, vector<8x8xbf16>
    %cst_47 = arith.constant dense<0.000000e+00> : vector<256x8xf32>
    %56 = tpu.matmul %27, %55, %cst_47 {dimension_numbers = #tpu.dot_dimension_numbers<[1], [0], [0], [1], [0, 0, 1, 1], [], []>} : vector<256x8xbf16>, vector<8x8xbf16>, vector<256x8xf32> -> vector<256x8xf32>
    %57 = arith.addf %54, %56 : vector<256x8xf32>
    %c56 = arith.constant 56 : index
    %c0_48 = arith.constant 0 : index
    %58 = vector.load %arg3[%c56, %c0_48] : memref<72x8xbf16, #tpu.memory_space<vmem>>, vector<8x8xbf16>
    %cst_49 = arith.constant dense<0.000000e+00> : vector<256x8xf32>
    %59 = tpu.matmul %31, %58, %cst_49 {dimension_numbers = #tpu.dot_dimension_numbers<[1], [0], [0], [1], [0, 0, 1, 1], [], []>} : vector<256x8xbf16>, vector<8x8xbf16>, vector<256x8xf32> -> vector<256x8xf32>
    %60 = arith.addf %57, %59 : vector<256x8xf32>
    %c64 = arith.constant 64 : index
    %c0_50 = arith.constant 0 : index
    %61 = vector.load %arg3[%c64, %c0_50] : memref<72x8xbf16, #tpu.memory_space<vmem>>, vector<8x8xbf16>
    %cst_51 = arith.constant dense<0.000000e+00> : vector<256x8xf32>
    %62 = tpu.matmul %35, %61, %cst_51 {dimension_numbers = #tpu.dot_dimension_numbers<[1], [0], [0], [1], [0, 0, 1, 1], [], []>} : vector<256x8xbf16>, vector<8x8xbf16>, vector<256x8xf32> -> vector<256x8xf32>
    %63 = arith.addf %60, %62 : vector<256x8xf32>
    %c0_52 = arith.constant 0 : index
    %c0_53 = arith.constant 0 : index
    %64 = vector.load %arg4[%c0_52, %c0_53] : memref<1x8xf32, #tpu.memory_space<vmem>>, vector<1x8xf32>
    %65 = vector.broadcast %64 : vector<1x8xf32> to vector<256x8xf32>
    %66 = arith.addf %63, %65 : vector<256x8xf32>
    %67 = vector.shape_cast %66 : vector<256x8xf32> to vector<16x16x8xf32>
    %c0_54 = arith.constant 0 : index
    %c0_55 = arith.constant 0 : index
    %c0_56 = arith.constant 0 : index
    %c0_57 = arith.constant 0 : index
    %68 = vector.load %arg5[%c0_54, %c0_55, %c0_56, %c0_57] : memref<1x16x16x8xf32, #tpu.memory_space<vmem>>, vector<1x16x16x8xf32>
    %69 = vector.shape_cast %68 : vector<1x16x16x8xf32> to vector<16x16x8xf32>
    %70 = vector.shape_cast %67 : vector<16x16x8xf32> to vector<1x16x16x8xf32>
    tpu.vector_store %arg5[%c0_54, %c0_55, %c0_56, %c0_57], %70 {strides = array<i32>} : memref<1x16x16x8xf32, #tpu.memory_space<vmem>>, vector<1x16x16x8xf32>,
    %cst_58 = arith.constant 0.000000e+00 : f32
    %71 = vector.broadcast %cst_58 : f32 to vector<256x8xf32>
    %72 = arith.maximumf %66, %71 : vector<256x8xf32>
    %73 = vector.shape_cast %72 : vector<256x8xf32> to vector<16x16x8xf32>
    %74 = vector.shape_cast %73 : vector<16x16x8xf32> to vector<8x2x16x8xf32>
    %75 = vector.extract_strided_slice %74 {offsets = [0, 0, 0, 0], sizes = [8, 1, 16, 8], strides = [1, 1, 1, 1]} : vector<8x2x16x8xf32> to vector<8x1x16x8xf32>
    %76 = vector.shape_cast %75 : vector<8x1x16x8xf32> to vector<8x16x8xf32>
    %77 = vector.extract_strided_slice %74 {offsets = [0, 1, 0, 0], sizes = [8, 1, 16, 8], strides = [1, 1, 1, 1]} : vector<8x2x16x8xf32> to vector<8x1x16x8xf32>
    %78 = vector.shape_cast %77 : vector<8x1x16x8xf32> to vector<8x16x8xf32>
    %79 = arith.maximumf %76, %78 : vector<8x16x8xf32>
    %80 = vector.shape_cast %79 : vector<8x16x8xf32> to vector<8x8x2x8xf32>
    %81 = vector.extract_strided_slice %80 {offsets = [0, 0, 0, 0], sizes = [8, 8, 1, 8], strides = [1, 1, 1, 1]} : vector<8x8x2x8xf32> to vector<8x8x1x8xf32>
    %82 = vector.shape_cast %81 : vector<8x8x1x8xf32> to vector<8x8x8xf32>
    %83 = vector.extract_strided_slice %80 {offsets = [0, 0, 1, 0], sizes = [8, 8, 1, 8], strides = [1, 1, 1, 1]} : vector<8x8x2x8xf32> to vector<8x8x1x8xf32>
    %84 = vector.shape_cast %83 : vector<8x8x1x8xf32> to vector<8x8x8xf32>
    %85 = arith.maximumf %82, %84 : vector<8x8x8xf32>
    %cst_59 = arith.constant 0.000000e+00 : f32
    %86 = vector.broadcast %cst_59 : f32 to vector<1x10x10x8xf32>
    %c0_60 = arith.constant 0 : index
    %c0_61 = arith.constant 0 : index
    %c0_62 = arith.constant 0 : index
    %c0_63 = arith.constant 0 : index
    %87 = vector.load %arg6[%c0_60, %c0_61, %c0_62, %c0_63] : memref<1x10x10x8xf32, #tpu.memory_space<vmem>>, vector<1x10x10x8xf32>
    tpu.vector_store %arg6[%c0_60, %c0_61, %c0_62, %c0_63], %86 {strides = array<i32>} : memref<1x10x10x8xf32, #tpu.memory_space<vmem>>, vector<1x10x10x8xf32>,
    %c0_64 = arith.constant 0 : index
    %c1_65 = arith.constant 1 : index
    %c1_66 = arith.constant 1 : index
    %c0_67 = arith.constant 0 : index
    %88 = vector.load %arg6[%c0_64, %c1_65, %c1_66, %c0_67] : memref<1x10x10x8xf32, #tpu.memory_space<vmem>>, vector<1x8x8x8xf32>
    %89 = vector.shape_cast %88 : vector<1x8x8x8xf32> to vector<8x8x8xf32>
    %90 = vector.shape_cast %85 : vector<8x8x8xf32> to vector<1x8x8x8xf32>
    tpu.vector_store %arg6[%c0_64, %c1_65, %c1_66, %c0_67], %90 {strides = array<i32>} : memref<1x10x10x8xf32, #tpu.memory_space<vmem>>, vector<1x8x8x8xf32>,
    return
  }
  func.func @transform_0(%arg0: i32, %arg1: i32) -> (i32, i32, i32, i32) {
    %c0_i32 = arith.constant 0 : i32
    %c0_i32_0 = arith.constant 0 : i32
    %c0_i32_1 = arith.constant 0 : i32
    %c0_i32_2 = arith.constant 0 : i32
    return %arg0, %c0_i32, %c0_i32_0, %c0_i32_1 : i32, i32, i32, i32
  }
  func.func @transform_1(%arg0: i32, %arg1: i32) -> (i32, i32) {
    %c0_i32 = arith.constant 0 : i32
    %c0_i32_0 = arith.constant 0 : i32
    return %c0_i32, %arg1 : i32, i32
  }
  func.func @transform_2(%arg0: i32, %arg1: i32) -> (i32, i32) {
    %c0_i32 = arith.constant 0 : i32
    %c0_i32_0 = arith.constant 0 : i32
    return %c0_i32, %arg1 : i32, i32
  }
  func.func @transform_3(%arg0: i32, %arg1: i32) -> (i32, i32, i32, i32) {
    %c0_i32 = arith.constant 0 : i32
    %c0_i32_0 = arith.constant 0 : i32
    %c0_i32_1 = arith.constant 0 : i32
    return %arg0, %c0_i32, %c0_i32_0, %arg1 : i32, i32, i32, i32
  }
  func.func @transform_4(%arg0: i32, %arg1: i32) -> (i32, i32, i32, i32) {
    %c0_i32 = arith.constant 0 : i32
    %c0_i32_0 = arith.constant 0 : i32
    %c0_i32_1 = arith.constant 0 : i32
    return %arg0, %c0_i32, %c0_i32_0, %arg1 : i32, i32, i32, i32
  }
}

module attributes {stable_mosaic.version = 11 : i64} {
  func.func @kernel(%arg0: i32, %arg1: i32, %arg2: memref<1x10x10x8xf32, #tpu.memory_space<vmem>>, %arg3: memref<72x16xbf16, #tpu.memory_space<vmem>>, %arg4: memref<1x16xf32, #tpu.memory_space<vmem>>, %arg5: memref<1x8x8x16xf32, #tpu.memory_space<vmem>>, %arg6: memref<1x10x10x16xf32, #tpu.memory_space<vmem>>) attributes {dimension_semantics = [#tpu.dimension_semantics<parallel>, #tpu.dimension_semantics<parallel>], iteration_bounds = array<i64: 2, 1>, scalar_prefetch = 0 : i64, scratch_operands = 0 : i64, tpu.core_type = #tpu.core_type<tc>, window_params = [{transform_indices = @transform_0, window_bounds = array<i64: 1, 10, 10, 8>}, {transform_indices = @transform_1, window_bounds = array<i64: 72, 16>}, {transform_indices = @transform_2, window_bounds = array<i64: 1, 16>}, {transform_indices = @transform_3, window_bounds = array<i64: 1, 8, 8, 16>}, {transform_indices = @transform_4, window_bounds = array<i64: 1, 10, 10, 16>}]} {
    %c0 = arith.constant 0 : index
    %c0_0 = arith.constant 0 : index
    %c0_1 = arith.constant 0 : index
    %c0_2 = arith.constant 0 : index
    %0 = vector.load %arg2[%c0, %c0_0, %c0_1, %c0_2] : memref<1x10x10x8xf32, #tpu.memory_space<vmem>>, vector<1x8x8x8xf32>
    %1 = vector.shape_cast %0 : vector<1x8x8x8xf32> to vector<8x8x8xf32>
    %2 = vector.shape_cast %1 : vector<8x8x8xf32> to vector<64x8xf32>
    %3 = arith.truncf %2 : vector<64x8xf32> to vector<64x8xbf16>
    %c0_3 = arith.constant 0 : index
    %c0_4 = arith.constant 0 : index
    %c1 = arith.constant 1 : index
    %c0_5 = arith.constant 0 : index
    %4 = vector.load %arg2[%c0_3, %c0_4, %c1, %c0_5] : memref<1x10x10x8xf32, #tpu.memory_space<vmem>>, vector<1x8x8x8xf32>
    %5 = vector.shape_cast %4 : vector<1x8x8x8xf32> to vector<8x8x8xf32>
    %6 = vector.shape_cast %5 : vector<8x8x8xf32> to vector<64x8xf32>
    %7 = arith.truncf %6 : vector<64x8xf32> to vector<64x8xbf16>
    %c0_6 = arith.constant 0 : index
    %c0_7 = arith.constant 0 : index
    %c2 = arith.constant 2 : index
    %c0_8 = arith.constant 0 : index
    %8 = vector.load %arg2[%c0_6, %c0_7, %c2, %c0_8] : memref<1x10x10x8xf32, #tpu.memory_space<vmem>>, vector<1x8x8x8xf32>
    %9 = vector.shape_cast %8 : vector<1x8x8x8xf32> to vector<8x8x8xf32>
    %10 = vector.shape_cast %9 : vector<8x8x8xf32> to vector<64x8xf32>
    %11 = arith.truncf %10 : vector<64x8xf32> to vector<64x8xbf16>
    %c0_9 = arith.constant 0 : index
    %c1_10 = arith.constant 1 : index
    %c0_11 = arith.constant 0 : index
    %c0_12 = arith.constant 0 : index
    %12 = vector.load %arg2[%c0_9, %c1_10, %c0_11, %c0_12] : memref<1x10x10x8xf32, #tpu.memory_space<vmem>>, vector<1x8x8x8xf32>
    %13 = vector.shape_cast %12 : vector<1x8x8x8xf32> to vector<8x8x8xf32>
    %14 = vector.shape_cast %13 : vector<8x8x8xf32> to vector<64x8xf32>
    %15 = arith.truncf %14 : vector<64x8xf32> to vector<64x8xbf16>
    %c0_13 = arith.constant 0 : index
    %c1_14 = arith.constant 1 : index
    %c1_15 = arith.constant 1 : index
    %c0_16 = arith.constant 0 : index
    %16 = vector.load %arg2[%c0_13, %c1_14, %c1_15, %c0_16] : memref<1x10x10x8xf32, #tpu.memory_space<vmem>>, vector<1x8x8x8xf32>
    %17 = vector.shape_cast %16 : vector<1x8x8x8xf32> to vector<8x8x8xf32>
    %18 = vector.shape_cast %17 : vector<8x8x8xf32> to vector<64x8xf32>
    %19 = arith.truncf %18 : vector<64x8xf32> to vector<64x8xbf16>
    %c0_17 = arith.constant 0 : index
    %c1_18 = arith.constant 1 : index
    %c2_19 = arith.constant 2 : index
    %c0_20 = arith.constant 0 : index
    %20 = vector.load %arg2[%c0_17, %c1_18, %c2_19, %c0_20] : memref<1x10x10x8xf32, #tpu.memory_space<vmem>>, vector<1x8x8x8xf32>
    %21 = vector.shape_cast %20 : vector<1x8x8x8xf32> to vector<8x8x8xf32>
    %22 = vector.shape_cast %21 : vector<8x8x8xf32> to vector<64x8xf32>
    %23 = arith.truncf %22 : vector<64x8xf32> to vector<64x8xbf16>
    %c0_21 = arith.constant 0 : index
    %c2_22 = arith.constant 2 : index
    %c0_23 = arith.constant 0 : index
    %c0_24 = arith.constant 0 : index
    %24 = vector.load %arg2[%c0_21, %c2_22, %c0_23, %c0_24] : memref<1x10x10x8xf32, #tpu.memory_space<vmem>>, vector<1x8x8x8xf32>
    %25 = vector.shape_cast %24 : vector<1x8x8x8xf32> to vector<8x8x8xf32>
    %26 = vector.shape_cast %25 : vector<8x8x8xf32> to vector<64x8xf32>
    %27 = arith.truncf %26 : vector<64x8xf32> to vector<64x8xbf16>
    %c0_25 = arith.constant 0 : index
    %c2_26 = arith.constant 2 : index
    %c1_27 = arith.constant 1 : index
    %c0_28 = arith.constant 0 : index
    %28 = vector.load %arg2[%c0_25, %c2_26, %c1_27, %c0_28] : memref<1x10x10x8xf32, #tpu.memory_space<vmem>>, vector<1x8x8x8xf32>
    %29 = vector.shape_cast %28 : vector<1x8x8x8xf32> to vector<8x8x8xf32>
    %30 = vector.shape_cast %29 : vector<8x8x8xf32> to vector<64x8xf32>
    %31 = arith.truncf %30 : vector<64x8xf32> to vector<64x8xbf16>
    %c0_29 = arith.constant 0 : index
    %c2_30 = arith.constant 2 : index
    %c2_31 = arith.constant 2 : index
    %c0_32 = arith.constant 0 : index
    %32 = vector.load %arg2[%c0_29, %c2_30, %c2_31, %c0_32] : memref<1x10x10x8xf32, #tpu.memory_space<vmem>>, vector<1x8x8x8xf32>
    %33 = vector.shape_cast %32 : vector<1x8x8x8xf32> to vector<8x8x8xf32>
    %34 = vector.shape_cast %33 : vector<8x8x8xf32> to vector<64x8xf32>
    %35 = arith.truncf %34 : vector<64x8xf32> to vector<64x8xbf16>
    %cst = arith.constant 0.000000e+00 : f32
    %36 = vector.broadcast %cst : f32 to vector<64x16xf32>
    %c0_33 = arith.constant 0 : index
    %c0_34 = arith.constant 0 : index
    %37 = vector.load %arg3[%c0_33, %c0_34] : memref<72x16xbf16, #tpu.memory_space<vmem>>, vector<8x16xbf16>
    %cst_35 = arith.constant dense<0.000000e+00> : vector<64x16xf32>
    %38 = tpu.matmul %3, %37, %cst_35 {dimension_numbers = #tpu.dot_dimension_numbers<[1], [0], [0], [1], [0, 0, 1, 1], [], []>} : vector<64x8xbf16>, vector<8x16xbf16>, vector<64x16xf32> -> vector<64x16xf32>
    %39 = arith.addf %36, %38 : vector<64x16xf32>
    %c8 = arith.constant 8 : index
    %c0_36 = arith.constant 0 : index
    %40 = vector.load %arg3[%c8, %c0_36] : memref<72x16xbf16, #tpu.memory_space<vmem>>, vector<8x16xbf16>
    %cst_37 = arith.constant dense<0.000000e+00> : vector<64x16xf32>
    %41 = tpu.matmul %7, %40, %cst_37 {dimension_numbers = #tpu.dot_dimension_numbers<[1], [0], [0], [1], [0, 0, 1, 1], [], []>} : vector<64x8xbf16>, vector<8x16xbf16>, vector<64x16xf32> -> vector<64x16xf32>
    %42 = arith.addf %39, %41 : vector<64x16xf32>
    %c16 = arith.constant 16 : index
    %c0_38 = arith.constant 0 : index
    %43 = vector.load %arg3[%c16, %c0_38] : memref<72x16xbf16, #tpu.memory_space<vmem>>, vector<8x16xbf16>
    %cst_39 = arith.constant dense<0.000000e+00> : vector<64x16xf32>
    %44 = tpu.matmul %11, %43, %cst_39 {dimension_numbers = #tpu.dot_dimension_numbers<[1], [0], [0], [1], [0, 0, 1, 1], [], []>} : vector<64x8xbf16>, vector<8x16xbf16>, vector<64x16xf32> -> vector<64x16xf32>
    %45 = arith.addf %42, %44 : vector<64x16xf32>
    %c24 = arith.constant 24 : index
    %c0_40 = arith.constant 0 : index
    %46 = vector.load %arg3[%c24, %c0_40] : memref<72x16xbf16, #tpu.memory_space<vmem>>, vector<8x16xbf16>
    %cst_41 = arith.constant dense<0.000000e+00> : vector<64x16xf32>
    %47 = tpu.matmul %15, %46, %cst_41 {dimension_numbers = #tpu.dot_dimension_numbers<[1], [0], [0], [1], [0, 0, 1, 1], [], []>} : vector<64x8xbf16>, vector<8x16xbf16>, vector<64x16xf32> -> vector<64x16xf32>
    %48 = arith.addf %45, %47 : vector<64x16xf32>
    %c32 = arith.constant 32 : index
    %c0_42 = arith.constant 0 : index
    %49 = vector.load %arg3[%c32, %c0_42] : memref<72x16xbf16, #tpu.memory_space<vmem>>, vector<8x16xbf16>
    %cst_43 = arith.constant dense<0.000000e+00> : vector<64x16xf32>
    %50 = tpu.matmul %19, %49, %cst_43 {dimension_numbers = #tpu.dot_dimension_numbers<[1], [0], [0], [1], [0, 0, 1, 1], [], []>} : vector<64x8xbf16>, vector<8x16xbf16>, vector<64x16xf32> -> vector<64x16xf32>
    %51 = arith.addf %48, %50 : vector<64x16xf32>
    %c40 = arith.constant 40 : index
    %c0_44 = arith.constant 0 : index
    %52 = vector.load %arg3[%c40, %c0_44] : memref<72x16xbf16, #tpu.memory_space<vmem>>, vector<8x16xbf16>
    %cst_45 = arith.constant dense<0.000000e+00> : vector<64x16xf32>
    %53 = tpu.matmul %23, %52, %cst_45 {dimension_numbers = #tpu.dot_dimension_numbers<[1], [0], [0], [1], [0, 0, 1, 1], [], []>} : vector<64x8xbf16>, vector<8x16xbf16>, vector<64x16xf32> -> vector<64x16xf32>
    %54 = arith.addf %51, %53 : vector<64x16xf32>
    %c48 = arith.constant 48 : index
    %c0_46 = arith.constant 0 : index
    %55 = vector.load %arg3[%c48, %c0_46] : memref<72x16xbf16, #tpu.memory_space<vmem>>, vector<8x16xbf16>
    %cst_47 = arith.constant dense<0.000000e+00> : vector<64x16xf32>
    %56 = tpu.matmul %27, %55, %cst_47 {dimension_numbers = #tpu.dot_dimension_numbers<[1], [0], [0], [1], [0, 0, 1, 1], [], []>} : vector<64x8xbf16>, vector<8x16xbf16>, vector<64x16xf32> -> vector<64x16xf32>
    %57 = arith.addf %54, %56 : vector<64x16xf32>
    %c56 = arith.constant 56 : index
    %c0_48 = arith.constant 0 : index
    %58 = vector.load %arg3[%c56, %c0_48] : memref<72x16xbf16, #tpu.memory_space<vmem>>, vector<8x16xbf16>
    %cst_49 = arith.constant dense<0.000000e+00> : vector<64x16xf32>
    %59 = tpu.matmul %31, %58, %cst_49 {dimension_numbers = #tpu.dot_dimension_numbers<[1], [0], [0], [1], [0, 0, 1, 1], [], []>} : vector<64x8xbf16>, vector<8x16xbf16>, vector<64x16xf32> -> vector<64x16xf32>
    %60 = arith.addf %57, %59 : vector<64x16xf32>
    %c64 = arith.constant 64 : index
    %c0_50 = arith.constant 0 : index
    %61 = vector.load %arg3[%c64, %c0_50] : memref<72x16xbf16, #tpu.memory_space<vmem>>, vector<8x16xbf16>
    %cst_51 = arith.constant dense<0.000000e+00> : vector<64x16xf32>
    %62 = tpu.matmul %35, %61, %cst_51 {dimension_numbers = #tpu.dot_dimension_numbers<[1], [0], [0], [1], [0, 0, 1, 1], [], []>} : vector<64x8xbf16>, vector<8x16xbf16>, vector<64x16xf32> -> vector<64x16xf32>
    %63 = arith.addf %60, %62 : vector<64x16xf32>
    %c0_52 = arith.constant 0 : index
    %c0_53 = arith.constant 0 : index
    %64 = vector.load %arg4[%c0_52, %c0_53] : memref<1x16xf32, #tpu.memory_space<vmem>>, vector<1x16xf32>
    %65 = vector.broadcast %64 : vector<1x16xf32> to vector<64x16xf32>
    %66 = arith.addf %63, %65 : vector<64x16xf32>
    %67 = vector.shape_cast %66 : vector<64x16xf32> to vector<8x8x16xf32>
    %c0_54 = arith.constant 0 : index
    %c0_55 = arith.constant 0 : index
    %c0_56 = arith.constant 0 : index
    %c0_57 = arith.constant 0 : index
    %68 = vector.load %arg5[%c0_54, %c0_55, %c0_56, %c0_57] : memref<1x8x8x16xf32, #tpu.memory_space<vmem>>, vector<1x8x8x16xf32>
    %69 = vector.shape_cast %68 : vector<1x8x8x16xf32> to vector<8x8x16xf32>
    %70 = vector.shape_cast %67 : vector<8x8x16xf32> to vector<1x8x8x16xf32>
    tpu.vector_store %arg5[%c0_54, %c0_55, %c0_56, %c0_57], %70 {strides = array<i32>} : memref<1x8x8x16xf32, #tpu.memory_space<vmem>>, vector<1x8x8x16xf32>,
    %cst_58 = arith.constant 0.000000e+00 : f32
    %71 = vector.broadcast %cst_58 : f32 to vector<64x16xf32>
    %72 = arith.maximumf %66, %71 : vector<64x16xf32>
    %73 = vector.shape_cast %72 : vector<64x16xf32> to vector<8x8x16xf32>
    %cst_59 = arith.constant 0.000000e+00 : f32
    %74 = vector.broadcast %cst_59 : f32 to vector<1x10x10x16xf32>
    %c0_60 = arith.constant 0 : index
    %c0_61 = arith.constant 0 : index
    %c0_62 = arith.constant 0 : index
    %c0_63 = arith.constant 0 : index
    %75 = vector.load %arg6[%c0_60, %c0_61, %c0_62, %c0_63] : memref<1x10x10x16xf32, #tpu.memory_space<vmem>>, vector<1x10x10x16xf32>
    tpu.vector_store %arg6[%c0_60, %c0_61, %c0_62, %c0_63], %74 {strides = array<i32>} : memref<1x10x10x16xf32, #tpu.memory_space<vmem>>, vector<1x10x10x16xf32>,
    %c0_64 = arith.constant 0 : index
    %c1_65 = arith.constant 1 : index
    %c1_66 = arith.constant 1 : index
    %c0_67 = arith.constant 0 : index
    %76 = vector.load %arg6[%c0_64, %c1_65, %c1_66, %c0_67] : memref<1x10x10x16xf32, #tpu.memory_space<vmem>>, vector<1x8x8x16xf32>
    %77 = vector.shape_cast %76 : vector<1x8x8x16xf32> to vector<8x8x16xf32>
    %78 = vector.shape_cast %73 : vector<8x8x16xf32> to vector<1x8x8x16xf32>
    tpu.vector_store %arg6[%c0_64, %c1_65, %c1_66, %c0_67], %78 {strides = array<i32>} : memref<1x10x10x16xf32, #tpu.memory_space<vmem>>, vector<1x8x8x16xf32>,
    return
  }
  func.func @transform_0(%arg0: i32, %arg1: i32) -> (i32, i32, i32, i32) {
    %c0_i32 = arith.constant 0 : i32
    %c0_i32_0 = arith.constant 0 : i32
    %c0_i32_1 = arith.constant 0 : i32
    %c0_i32_2 = arith.constant 0 : i32
    return %arg0, %c0_i32, %c0_i32_0, %c0_i32_1 : i32, i32, i32, i32
  }
  func.func @transform_1(%arg0: i32, %arg1: i32) -> (i32, i32) {
    %c0_i32 = arith.constant 0 : i32
    %c0_i32_0 = arith.constant 0 : i32
    return %c0_i32, %arg1 : i32, i32
  }
  func.func @transform_2(%arg0: i32, %arg1: i32) -> (i32, i32) {
    %c0_i32 = arith.constant 0 : i32
    %c0_i32_0 = arith.constant 0 : i32
    return %c0_i32, %arg1 : i32, i32
  }
  func.func @transform_3(%arg0: i32, %arg1: i32) -> (i32, i32, i32, i32) {
    %c0_i32 = arith.constant 0 : i32
    %c0_i32_0 = arith.constant 0 : i32
    %c0_i32_1 = arith.constant 0 : i32
    return %arg0, %c0_i32, %c0_i32_0, %arg1 : i32, i32, i32, i32
  }
  func.func @transform_4(%arg0: i32, %arg1: i32) -> (i32, i32, i32, i32) {
    %c0_i32 = arith.constant 0 : i32
    %c0_i32_0 = arith.constant 0 : i32
    %c0_i32_1 = arith.constant 0 : i32
    return %arg0, %c0_i32, %c0_i32_0, %arg1 : i32, i32, i32, i32
  }
}

module attributes {stable_mosaic.version = 11 : i64} {
  func.func @kernel(%arg0: i32, %arg1: i32, %arg2: memref<1x10x10x16xf32, #tpu.memory_space<vmem>>, %arg3: memref<144x16xbf16, #tpu.memory_space<vmem>>, %arg4: memref<1x16xf32, #tpu.memory_space<vmem>>, %arg5: memref<1x8x8x16xf32, #tpu.memory_space<vmem>>, %arg6: memref<1x10x10x16xf32, #tpu.memory_space<vmem>>) attributes {dimension_semantics = [#tpu.dimension_semantics<parallel>, #tpu.dimension_semantics<parallel>], iteration_bounds = array<i64: 2, 1>, scalar_prefetch = 0 : i64, scratch_operands = 0 : i64, tpu.core_type = #tpu.core_type<tc>, window_params = [{transform_indices = @transform_0, window_bounds = array<i64: 1, 10, 10, 16>}, {transform_indices = @transform_1, window_bounds = array<i64: 144, 16>}, {transform_indices = @transform_2, window_bounds = array<i64: 1, 16>}, {transform_indices = @transform_3, window_bounds = array<i64: 1, 8, 8, 16>}, {transform_indices = @transform_4, window_bounds = array<i64: 1, 10, 10, 16>}]} {
    %c0 = arith.constant 0 : index
    %c0_0 = arith.constant 0 : index
    %c0_1 = arith.constant 0 : index
    %c0_2 = arith.constant 0 : index
    %0 = vector.load %arg2[%c0, %c0_0, %c0_1, %c0_2] : memref<1x10x10x16xf32, #tpu.memory_space<vmem>>, vector<1x8x8x16xf32>
    %1 = vector.shape_cast %0 : vector<1x8x8x16xf32> to vector<8x8x16xf32>
    %2 = vector.shape_cast %1 : vector<8x8x16xf32> to vector<64x16xf32>
    %3 = arith.truncf %2 : vector<64x16xf32> to vector<64x16xbf16>
    %c0_3 = arith.constant 0 : index
    %c0_4 = arith.constant 0 : index
    %c1 = arith.constant 1 : index
    %c0_5 = arith.constant 0 : index
    %4 = vector.load %arg2[%c0_3, %c0_4, %c1, %c0_5] : memref<1x10x10x16xf32, #tpu.memory_space<vmem>>, vector<1x8x8x16xf32>
    %5 = vector.shape_cast %4 : vector<1x8x8x16xf32> to vector<8x8x16xf32>
    %6 = vector.shape_cast %5 : vector<8x8x16xf32> to vector<64x16xf32>
    %7 = arith.truncf %6 : vector<64x16xf32> to vector<64x16xbf16>
    %c0_6 = arith.constant 0 : index
    %c0_7 = arith.constant 0 : index
    %c2 = arith.constant 2 : index
    %c0_8 = arith.constant 0 : index
    %8 = vector.load %arg2[%c0_6, %c0_7, %c2, %c0_8] : memref<1x10x10x16xf32, #tpu.memory_space<vmem>>, vector<1x8x8x16xf32>
    %9 = vector.shape_cast %8 : vector<1x8x8x16xf32> to vector<8x8x16xf32>
    %10 = vector.shape_cast %9 : vector<8x8x16xf32> to vector<64x16xf32>
    %11 = arith.truncf %10 : vector<64x16xf32> to vector<64x16xbf16>
    %c0_9 = arith.constant 0 : index
    %c1_10 = arith.constant 1 : index
    %c0_11 = arith.constant 0 : index
    %c0_12 = arith.constant 0 : index
    %12 = vector.load %arg2[%c0_9, %c1_10, %c0_11, %c0_12] : memref<1x10x10x16xf32, #tpu.memory_space<vmem>>, vector<1x8x8x16xf32>
    %13 = vector.shape_cast %12 : vector<1x8x8x16xf32> to vector<8x8x16xf32>
    %14 = vector.shape_cast %13 : vector<8x8x16xf32> to vector<64x16xf32>
    %15 = arith.truncf %14 : vector<64x16xf32> to vector<64x16xbf16>
    %c0_13 = arith.constant 0 : index
    %c1_14 = arith.constant 1 : index
    %c1_15 = arith.constant 1 : index
    %c0_16 = arith.constant 0 : index
    %16 = vector.load %arg2[%c0_13, %c1_14, %c1_15, %c0_16] : memref<1x10x10x16xf32, #tpu.memory_space<vmem>>, vector<1x8x8x16xf32>
    %17 = vector.shape_cast %16 : vector<1x8x8x16xf32> to vector<8x8x16xf32>
    %18 = vector.shape_cast %17 : vector<8x8x16xf32> to vector<64x16xf32>
    %19 = arith.truncf %18 : vector<64x16xf32> to vector<64x16xbf16>
    %c0_17 = arith.constant 0 : index
    %c1_18 = arith.constant 1 : index
    %c2_19 = arith.constant 2 : index
    %c0_20 = arith.constant 0 : index
    %20 = vector.load %arg2[%c0_17, %c1_18, %c2_19, %c0_20] : memref<1x10x10x16xf32, #tpu.memory_space<vmem>>, vector<1x8x8x16xf32>
    %21 = vector.shape_cast %20 : vector<1x8x8x16xf32> to vector<8x8x16xf32>
    %22 = vector.shape_cast %21 : vector<8x8x16xf32> to vector<64x16xf32>
    %23 = arith.truncf %22 : vector<64x16xf32> to vector<64x16xbf16>
    %c0_21 = arith.constant 0 : index
    %c2_22 = arith.constant 2 : index
    %c0_23 = arith.constant 0 : index
    %c0_24 = arith.constant 0 : index
    %24 = vector.load %arg2[%c0_21, %c2_22, %c0_23, %c0_24] : memref<1x10x10x16xf32, #tpu.memory_space<vmem>>, vector<1x8x8x16xf32>
    %25 = vector.shape_cast %24 : vector<1x8x8x16xf32> to vector<8x8x16xf32>
    %26 = vector.shape_cast %25 : vector<8x8x16xf32> to vector<64x16xf32>
    %27 = arith.truncf %26 : vector<64x16xf32> to vector<64x16xbf16>
    %c0_25 = arith.constant 0 : index
    %c2_26 = arith.constant 2 : index
    %c1_27 = arith.constant 1 : index
    %c0_28 = arith.constant 0 : index
    %28 = vector.load %arg2[%c0_25, %c2_26, %c1_27, %c0_28] : memref<1x10x10x16xf32, #tpu.memory_space<vmem>>, vector<1x8x8x16xf32>
    %29 = vector.shape_cast %28 : vector<1x8x8x16xf32> to vector<8x8x16xf32>
    %30 = vector.shape_cast %29 : vector<8x8x16xf32> to vector<64x16xf32>
    %31 = arith.truncf %30 : vector<64x16xf32> to vector<64x16xbf16>
    %c0_29 = arith.constant 0 : index
    %c2_30 = arith.constant 2 : index
    %c2_31 = arith.constant 2 : index
    %c0_32 = arith.constant 0 : index
    %32 = vector.load %arg2[%c0_29, %c2_30, %c2_31, %c0_32] : memref<1x10x10x16xf32, #tpu.memory_space<vmem>>, vector<1x8x8x16xf32>
    %33 = vector.shape_cast %32 : vector<1x8x8x16xf32> to vector<8x8x16xf32>
    %34 = vector.shape_cast %33 : vector<8x8x16xf32> to vector<64x16xf32>
    %35 = arith.truncf %34 : vector<64x16xf32> to vector<64x16xbf16>
    %cst = arith.constant 0.000000e+00 : f32
    %36 = vector.broadcast %cst : f32 to vector<64x16xf32>
    %c0_33 = arith.constant 0 : index
    %c0_34 = arith.constant 0 : index
    %37 = vector.load %arg3[%c0_33, %c0_34] : memref<144x16xbf16, #tpu.memory_space<vmem>>, vector<16x16xbf16>
    %cst_35 = arith.constant dense<0.000000e+00> : vector<64x16xf32>
    %38 = tpu.matmul %3, %37, %cst_35 {dimension_numbers = #tpu.dot_dimension_numbers<[1], [0], [0], [1], [0, 0, 1, 1], [], []>} : vector<64x16xbf16>, vector<16x16xbf16>, vector<64x16xf32> -> vector<64x16xf32>
    %39 = arith.addf %36, %38 : vector<64x16xf32>
    %c16 = arith.constant 16 : index
    %c0_36 = arith.constant 0 : index
    %40 = vector.load %arg3[%c16, %c0_36] : memref<144x16xbf16, #tpu.memory_space<vmem>>, vector<16x16xbf16>
    %cst_37 = arith.constant dense<0.000000e+00> : vector<64x16xf32>
    %41 = tpu.matmul %7, %40, %cst_37 {dimension_numbers = #tpu.dot_dimension_numbers<[1], [0], [0], [1], [0, 0, 1, 1], [], []>} : vector<64x16xbf16>, vector<16x16xbf16>, vector<64x16xf32> -> vector<64x16xf32>
    %42 = arith.addf %39, %41 : vector<64x16xf32>
    %c32 = arith.constant 32 : index
    %c0_38 = arith.constant 0 : index
    %43 = vector.load %arg3[%c32, %c0_38] : memref<144x16xbf16, #tpu.memory_space<vmem>>, vector<16x16xbf16>
    %cst_39 = arith.constant dense<0.000000e+00> : vector<64x16xf32>
    %44 = tpu.matmul %11, %43, %cst_39 {dimension_numbers = #tpu.dot_dimension_numbers<[1], [0], [0], [1], [0, 0, 1, 1], [], []>} : vector<64x16xbf16>, vector<16x16xbf16>, vector<64x16xf32> -> vector<64x16xf32>
    %45 = arith.addf %42, %44 : vector<64x16xf32>
    %c48 = arith.constant 48 : index
    %c0_40 = arith.constant 0 : index
    %46 = vector.load %arg3[%c48, %c0_40] : memref<144x16xbf16, #tpu.memory_space<vmem>>, vector<16x16xbf16>
    %cst_41 = arith.constant dense<0.000000e+00> : vector<64x16xf32>
    %47 = tpu.matmul %15, %46, %cst_41 {dimension_numbers = #tpu.dot_dimension_numbers<[1], [0], [0], [1], [0, 0, 1, 1], [], []>} : vector<64x16xbf16>, vector<16x16xbf16>, vector<64x16xf32> -> vector<64x16xf32>
    %48 = arith.addf %45, %47 : vector<64x16xf32>
    %c64 = arith.constant 64 : index
    %c0_42 = arith.constant 0 : index
    %49 = vector.load %arg3[%c64, %c0_42] : memref<144x16xbf16, #tpu.memory_space<vmem>>, vector<16x16xbf16>
    %cst_43 = arith.constant dense<0.000000e+00> : vector<64x16xf32>
    %50 = tpu.matmul %19, %49, %cst_43 {dimension_numbers = #tpu.dot_dimension_numbers<[1], [0], [0], [1], [0, 0, 1, 1], [], []>} : vector<64x16xbf16>, vector<16x16xbf16>, vector<64x16xf32> -> vector<64x16xf32>
    %51 = arith.addf %48, %50 : vector<64x16xf32>
    %c80 = arith.constant 80 : index
    %c0_44 = arith.constant 0 : index
    %52 = vector.load %arg3[%c80, %c0_44] : memref<144x16xbf16, #tpu.memory_space<vmem>>, vector<16x16xbf16>
    %cst_45 = arith.constant dense<0.000000e+00> : vector<64x16xf32>
    %53 = tpu.matmul %23, %52, %cst_45 {dimension_numbers = #tpu.dot_dimension_numbers<[1], [0], [0], [1], [0, 0, 1, 1], [], []>} : vector<64x16xbf16>, vector<16x16xbf16>, vector<64x16xf32> -> vector<64x16xf32>
    %54 = arith.addf %51, %53 : vector<64x16xf32>
    %c96 = arith.constant 96 : index
    %c0_46 = arith.constant 0 : index
    %55 = vector.load %arg3[%c96, %c0_46] : memref<144x16xbf16, #tpu.memory_space<vmem>>, vector<16x16xbf16>
    %cst_47 = arith.constant dense<0.000000e+00> : vector<64x16xf32>
    %56 = tpu.matmul %27, %55, %cst_47 {dimension_numbers = #tpu.dot_dimension_numbers<[1], [0], [0], [1], [0, 0, 1, 1], [], []>} : vector<64x16xbf16>, vector<16x16xbf16>, vector<64x16xf32> -> vector<64x16xf32>
    %57 = arith.addf %54, %56 : vector<64x16xf32>
    %c112 = arith.constant 112 : index
    %c0_48 = arith.constant 0 : index
    %58 = vector.load %arg3[%c112, %c0_48] : memref<144x16xbf16, #tpu.memory_space<vmem>>, vector<16x16xbf16>
    %cst_49 = arith.constant dense<0.000000e+00> : vector<64x16xf32>
    %59 = tpu.matmul %31, %58, %cst_49 {dimension_numbers = #tpu.dot_dimension_numbers<[1], [0], [0], [1], [0, 0, 1, 1], [], []>} : vector<64x16xbf16>, vector<16x16xbf16>, vector<64x16xf32> -> vector<64x16xf32>
    %60 = arith.addf %57, %59 : vector<64x16xf32>
    %c128 = arith.constant 128 : index
    %c0_50 = arith.constant 0 : index
    %61 = vector.load %arg3[%c128, %c0_50] : memref<144x16xbf16, #tpu.memory_space<vmem>>, vector<16x16xbf16>
    %cst_51 = arith.constant dense<0.000000e+00> : vector<64x16xf32>
    %62 = tpu.matmul %35, %61, %cst_51 {dimension_numbers = #tpu.dot_dimension_numbers<[1], [0], [0], [1], [0, 0, 1, 1], [], []>} : vector<64x16xbf16>, vector<16x16xbf16>, vector<64x16xf32> -> vector<64x16xf32>
    %63 = arith.addf %60, %62 : vector<64x16xf32>
    %c0_52 = arith.constant 0 : index
    %c0_53 = arith.constant 0 : index
    %64 = vector.load %arg4[%c0_52, %c0_53] : memref<1x16xf32, #tpu.memory_space<vmem>>, vector<1x16xf32>
    %65 = vector.broadcast %64 : vector<1x16xf32> to vector<64x16xf32>
    %66 = arith.addf %63, %65 : vector<64x16xf32>
    %67 = vector.shape_cast %66 : vector<64x16xf32> to vector<8x8x16xf32>
    %c0_54 = arith.constant 0 : index
    %c0_55 = arith.constant 0 : index
    %c0_56 = arith.constant 0 : index
    %c0_57 = arith.constant 0 : index
    %68 = vector.load %arg5[%c0_54, %c0_55, %c0_56, %c0_57] : memref<1x8x8x16xf32, #tpu.memory_space<vmem>>, vector<1x8x8x16xf32>
    %69 = vector.shape_cast %68 : vector<1x8x8x16xf32> to vector<8x8x16xf32>
    %70 = vector.shape_cast %67 : vector<8x8x16xf32> to vector<1x8x8x16xf32>
    tpu.vector_store %arg5[%c0_54, %c0_55, %c0_56, %c0_57], %70 {strides = array<i32>} : memref<1x8x8x16xf32, #tpu.memory_space<vmem>>, vector<1x8x8x16xf32>,
    %cst_58 = arith.constant 0.000000e+00 : f32
    %71 = vector.broadcast %cst_58 : f32 to vector<64x16xf32>
    %72 = arith.maximumf %66, %71 : vector<64x16xf32>
    %73 = vector.shape_cast %72 : vector<64x16xf32> to vector<8x8x16xf32>
    %cst_59 = arith.constant 0.000000e+00 : f32
    %74 = vector.broadcast %cst_59 : f32 to vector<1x10x10x16xf32>
    %c0_60 = arith.constant 0 : index
    %c0_61 = arith.constant 0 : index
    %c0_62 = arith.constant 0 : index
    %c0_63 = arith.constant 0 : index
    %75 = vector.load %arg6[%c0_60, %c0_61, %c0_62, %c0_63] : memref<1x10x10x16xf32, #tpu.memory_space<vmem>>, vector<1x10x10x16xf32>
    tpu.vector_store %arg6[%c0_60, %c0_61, %c0_62, %c0_63], %74 {strides = array<i32>} : memref<1x10x10x16xf32, #tpu.memory_space<vmem>>, vector<1x10x10x16xf32>,
    %c0_64 = arith.constant 0 : index
    %c1_65 = arith.constant 1 : index
    %c1_66 = arith.constant 1 : index
    %c0_67 = arith.constant 0 : index
    %76 = vector.load %arg6[%c0_64, %c1_65, %c1_66, %c0_67] : memref<1x10x10x16xf32, #tpu.memory_space<vmem>>, vector<1x8x8x16xf32>
    %77 = vector.shape_cast %76 : vector<1x8x8x16xf32> to vector<8x8x16xf32>
    %78 = vector.shape_cast %73 : vector<8x8x16xf32> to vector<1x8x8x16xf32>
    tpu.vector_store %arg6[%c0_64, %c1_65, %c1_66, %c0_67], %78 {strides = array<i32>} : memref<1x10x10x16xf32, #tpu.memory_space<vmem>>, vector<1x8x8x16xf32>,
    return
  }
  func.func @transform_0(%arg0: i32, %arg1: i32) -> (i32, i32, i32, i32) {
    %c0_i32 = arith.constant 0 : i32
    %c0_i32_0 = arith.constant 0 : i32
    %c0_i32_1 = arith.constant 0 : i32
    %c0_i32_2 = arith.constant 0 : i32
    return %arg0, %c0_i32, %c0_i32_0, %c0_i32_1 : i32, i32, i32, i32
  }
  func.func @transform_1(%arg0: i32, %arg1: i32) -> (i32, i32) {
    %c0_i32 = arith.constant 0 : i32
    %c0_i32_0 = arith.constant 0 : i32
    return %c0_i32, %arg1 : i32, i32
  }
  func.func @transform_2(%arg0: i32, %arg1: i32) -> (i32, i32) {
    %c0_i32 = arith.constant 0 : i32
    %c0_i32_0 = arith.constant 0 : i32
    return %c0_i32, %arg1 : i32, i32
  }
  func.func @transform_3(%arg0: i32, %arg1: i32) -> (i32, i32, i32, i32) {
    %c0_i32 = arith.constant 0 : i32
    %c0_i32_0 = arith.constant 0 : i32
    %c0_i32_1 = arith.constant 0 : i32
    return %arg0, %c0_i32, %c0_i32_0, %arg1 : i32, i32, i32, i32
  }
  func.func @transform_4(%arg0: i32, %arg1: i32) -> (i32, i32, i32, i32) {
    %c0_i32 = arith.constant 0 : i32
    %c0_i32_0 = arith.constant 0 : i32
    %c0_i32_1 = arith.constant 0 : i32
    return %arg0, %c0_i32, %c0_i32_0, %arg1 : i32, i32, i32, i32
  }
}

</mosaic_0001>

<bundles_post_ra>
// kernel: _forward_impl.6
= control target key start
LH: loop header
LB: loop body
LE: loop exit
PB: predicated region body
PF: predicated region fallthrough
CT: control target
= control target key end

     0   :  { %10 = vsyncpa [#allocation3], 0  ;;  %s2235_s0 = inlined_call_operand.vmem [shape: f32[2,10,10,8], index: 0, kind: input, shape index: {}]   ;;  %s2236_s1 = inlined_call_operand.vmem [shape: bf16[72,16], index: 1, kind: input, shape index: {}]   ;;  %s2237_s2 = inlined_call_operand.vmem [shape: f32[1,16], index: 2, kind: input, shape index: {}]   ;;  %s2238_s3 = inlined_call_operand.hbm [shape: f32[2,8,8,16], index: 3, kind: output, shape index: {0}]   ;;  %s2239_s4 = inlined_call_operand.vmem [shape: f32[2,10,10,16], index: 4, kind: output, shape index: {1}]  }
   0x1   :  { %12 = vsyncpa [#allocation3 + $0x1], 0  ;;  %s1871_s15 = smov 0   ;;  %s1873_s16 = smov 0  }
   0x2   :  { %s1875_s17 = smov 0   ;;  %s1877_s18 = smov 0  }
   0x3   :  { %s1879_s19 = smov 0   ;;  %s1881_s20 = smov 0  }
   0x4 LB: > { %s1383_s21 = sadd.s32 4294967295, %s1840_s20   ;;  %s1384_s22 = sadd.s32 4294967294, %s1840_s20   ;;  %s1840_s20 = sphi %s1881_s20, %s18_s20   ;;  %s1836_s19 = sphi %s1879_s19, %s2246_s19   ;;  %s1832_s18 = sphi %s1877_s18, %s2245_s18   ;;  %s1828_s17 = sphi %s1875_s17, %s2244_s17   ;;  %s1824_s16 = sphi %s1873_s16, %s2243_s16   ;;  %s1820_s15 = sphi %s1871_s15, %s2242_s15  }
   0x5   : > { %s30_s23 = sadd.s32 1, %s1836_s19  ;;  %s117_s24 = sadd.s32 1, %s1828_s17 }
   0x6   : > { %p32_p0 = scmp.ge.s32.totalorder %s30_s23, 2  ;;  %p127_p1 = scmp.ne.s32.totalorder %s1828_s17, %s1824_s16 }
   0x7   : > { %p128_p2 = scmp.eq.s32.totalorder %s1383_s21, 1  ;;  %p133_p3 = scmp.ne.s32.totalorder %s1824_s16, %s1820_s15 }
   0x8   : > { %s2248_s23 = smov (%p32_p0, %s30_s23), 0  ;;  %p134_p5 = scmp.eq.s32.totalorder %s1384_s22, 1 }
   0x9   : > { %p1911_p4 = por %p128_p2, %p127_p1  ;;  %s112_s26 = ssub.s32 %s1836_s19, %s2248_s23 }
   0xa   : > { %p1389_p6 = scmp.ge.s32.totalorder %s1840_s20, 1  ;;  %p115_p7 = scmp.eq.s32.totalorder %s112_s26, 0 }
   0xb   : > { %p1918_p8 = por %p134_p5, %p133_p3  ;;  %p201_p9 = scmp.lt.s32.totalorder %s1840_s20, 3 }
   0xc   : > { %s1924_s28 = scalar_select %p115_p7, %s1828_s17, %s117_s24  }
   0xd   : > { %p202_p10 = pnand %p1389_p6, %p201_p9 }
   0xe   : > { %v374_v0 = vld [vmem:[%s2236_s1 + $0x4] sm:$0xf] (!%p202_p10)  ;;  %vm388_vm0 = vcmask (!%p202_p10), 1043456   ;;  %v1932_v1 = vld [vmem:[%s2236_s1 + $0x10] sm:$0xf] (!%p202_p10)  ;;  %p242_p11 = scmp.lt.s32.totalorder (!%p202_p10), %s1832_s18, 1 }
   0xf   : > { %205 = sbr.rel (%p202_p10) target bundleno = 335 (0x14f), region = 32  ;;  %1693 = vmatprep.subr.msk.bf16.mxu1 (!%p202_p10), %vm388_vm0, %v374_v0  ;;  %1697 = vmatprep.subr.msk.bf16.mxu0 (!%p202_p10), %vm388_vm0, %v1932_v1  ;;  %v390_v2 = vsel (!%p202_p10), %vm388_vm0, %v374_v0, 0  ;;  %v1941_v3 = vsel (!%p202_p10), %vm388_vm0, %v1932_v1, 0  ;;  %v373_v4 = vld [vmem:[%s2236_s1] sm:$0xf] (!%p202_p10)  ;;  %vm375_vm1 = vcmask (!%p202_p10), 64512  }
  0x10   : > { %1538 = vmatpush3.bf16.msra.mxu1 (!%p202_p10), %v390_v2  ;;  %1578 = vmatpush3.bf16.msra.mxu0 (!%p202_p10), %v1941_v3  ;;  %v804_v5 = vld [vmem:[%s2236_s1 + $0x14] sm:$0xf] (!%p202_p10)  ;;  %v470_v12 = vsel (!%p202_p10), %vm388_vm0, %v373_v4, 0  ;;  %v893_v22 = vld [vmem:[%s2236_s1 + $0x18] sm:$0xf] (!%p202_p10)  ;;  %vm1175_vm2 = vcmask (!%p202_p10), 130048  }
  0x11   : > { %1694 = vmatprep.subr.msk.bf16.mxu1 (!%p202_p10), %vm388_vm0, %v373_v4  ;;  %1699 = vmatprep.subr.msk.bf16.mxu0 (!%p202_p10), %vm388_vm0, %v804_v5  ;;  %v818_v17 = vsel (!%p202_p10), %vm388_vm0, %v804_v5, 0  ;;  %v537_v23 = vld [vmem:[%s2236_s1 + $0x8] sm:$0xf] (!%p202_p10)  ;;  %v907_v38 = vsel (!%p202_p10), %vm388_vm0, %v893_v22, 0  ;;  %v982_v41 = vld [vmem:[%s2236_s1 + $0x1c] sm:$0xf] (!%p202_p10) }
  0x12   : > { %v551_v46 = vsel (!%p202_p10), %vm388_vm0, %v537_v23, 0  ;;  %v626_v47 = vld [vmem:[%s2236_s1 + $0xc] sm:$0xf] (!%p202_p10)  ;;  %v996_v54 = vsel (!%p202_p10), %vm388_vm0, %v982_v41, 0  ;;  %v1071_v55 = vld [vmem:[%s2236_s1 + $0x20] sm:$0xf] (!%p202_p10) }
  0x13   : > { %v640_v60 = vsel (!%p202_p10), %vm388_vm0, %v626_v47, 0  ;;  %v1085_v0 = vsel (!%p202_p10), %vm388_vm0, %v1071_v55, 0  ;;  %vm1193_vm3 = vcmask (!%p202_p10), 123904   ;;  %s1491_s26 = sshll.u32 (!%p202_p10), %s1832_s18, 10  ;;  %s1843_s8 = smov (!%p202_p10), [#allocation2]  }
  0x14   : > { %s1766_s10 = sshll.u32 (!%p202_p10), %s1843_s8, 4  ;;  %s1767_s10 = int_to_ptr.vmem [resolvable:$false] %s1766_s10 }
  0x15   : > { %s1768_s11 = scalar_lea.vmem (!%p202_p10), %s1767_s10, 2048 }
  0x16   : > { %s1948_s9 = scalar_select %p242_p11, %s1832_s18, 1 }
  0x17   : > { %s2169_s18 = scalar_lea.hbm %s2238_s3, %s1491_s26 }
  0x18   : > { %s1703_s12 = smul.u32 160, %s1948_s9  ;;  %s229_s9 = sand.u32 1, %s1824_s16  }
  0x19   : > { %s2187_s6 = scalar_lea.sflag [#allocation3], %s229_s9 }
  0x1a   : > { %s1961_s21 = scalar_lea.vmem %s2235_s0, %s1703_s12  ;;  %s2096_s14 = scalar_lea.vmem %s2239_s4, %s1703_s12 }
  0x1b   : > { %v275_v6 = vld [vmem:[%s1961_s21 + $0x1] sm:$0xff]  ;;  %v276_v7 = vld [vmem:[%s1961_s21 + $0x11] sm:$0xff]  ;;  %s1390_s12 = sshll.u32 %s229_s9, 6 }
  0x1c   : > { %v1402_v8 = vld [vmem:[%s1961_s21 + $0x21] sm:$0xff]  ;;  %v283_v9 = vpack.c.bf16 %v276_v7, %v275_v6  ;;  %v278_v11 = vld [vmem:[%s1961_s21 + $0x31] sm:$0xff]  ;;  %s2144_s24 = scalar_lea.vmem [#allocation2], %s1390_s12 }
  0x1d   : > { %v320_v10 = vpack.c.bf16 %v1402_v8, %v276_v7  ;;  %v1404_v13 = vld [vmem:[%s1961_s21 + $0x41] sm:$0xff]  ;;  %v1970_v14 = vld [vmem:[%s1961_s21 + $0x51] sm:$0xff]  ;;  %v1972_v15 = vpack.c.bf16 %v278_v11, %v1402_v8  ;;  %s1245_s29 = sshll.u32 %s2144_s24, 4  ;;  %s2171_s29 = int_to_ptr.vmem [resolvable:$true] %s1245_s29 }
  0x1e   : > { %v321_v16 = vpack.c.bf16 %v1404_v13, %v278_v11  ;;  %v1976_v18 = vpack.c.bf16 %v1970_v14, %v1404_v13  ;;  %v1409_v19 = vld [vmem:[%s1961_s21 + $0x12] sm:$0xff]  ;;  %1539 = vmatprep.mubr.msk.bf16.mxu1 %vm375_vm1, %v283_v9  ;;  %v1410_v20 = vld [vmem:[%s1961_s21 + $0x22] sm:$0xff]  ;;  %v1842_v11 = vmov 0.0   ;;  %s1762_s7 = scalar_lea.vmem %s2171_s29, 1024  ;;  %p1769_p1 = scmp.lt.s32.totalorder %s2171_s29, %s1767_s10 }
  0x1f   : > { %1579 = vmatprep.mubr.msk.bf16.mxu0 %vm375_vm1, %v320_v10  ;;  %1540 = vmatmul.mubr.msk.bf16.vlgmr.msra.gmra.mrb[0].mxu1 %vm375_vm1, %v1972_v15  ;;  %v332_v21 = vpack.c.bf16 %v1410_v20, %v1409_v19  ;;  %v1992_v24 = vld [vmem:[%s1961_s21 + $0x61] sm:$0xff]  ;;  %v1995_v25 = vld [vmem:[%s1961_s21 + $0x71] sm:$0xff]  ;;  %1192 = vst.msk [vmem:[%s2096_s14] sm:$0xff] %vm1175_vm2, %v1842_v11  ;;  %1199 = vst.msk [vmem:[%s2096_s14 + $0x30] sm:$0xff] %vm1175_vm2, %v1842_v11  ;;  %p1763_p12 = scmp.ne.s32.totalorder %s2171_s29, %s1762_s7  ;;  %p1770_p2 = scmp.lt.s32.totalorder %s1768_s11, %s1762_s7 }
  0x20   : > { %1580 = vmatmul.mubr.msk.bf16.vlgmr.msra.gmra.mrb[0].mxu0 %vm375_vm1, %v321_v16  ;;  %1548 = vmatpush3.bf16.msra.mxu1 %v470_v12  ;;  %v263_v26 = vld [vmem:[%s1961_s21] sm:$0xff]  ;;  %v2002_v27 = vld [vmem:[%s1961_s21 + $0x10] sm:$0xff]  ;;  %v2008_v28 = vpack.c.bf16 %v1995_v25, %v1992_v24  ;;  %v322_v8 = vpack.c.bf16 %v1992_v24, %v1970_v14  ;;  %1194 = vst.msk [vmem:[%s2096_s14 + $0x8] sm:$0x3] %vm1193_vm3, %v1842_v11  ;;  %1200 = vst.msk [vmem:[%s2096_s14 + $0x38] sm:$0x3] %vm1193_vm3, %v1842_v11 }
  0x21   : > { %1588 = vmatpush3.bf16.msra.mxu0 %v818_v17  ;;  %1543 = vmatprep.mubr.msk.bf16.mxu1 %vm375_vm1, %v1976_v18  ;;  %v1411_v29 = vld [vmem:[%s1961_s21 + $0x32] sm:$0xff]  ;;  %v1412_v30 = vld [vmem:[%s1961_s21 + $0x42] sm:$0xff]  ;;  %v271_v31 = vpack.c.bf16 %v2002_v27, %v263_v26  ;;  %1211 = vst.msk [vmem:[%s2096_s14 + $0x90] sm:$0xff] %vm1175_vm2, %v1842_v11  ;;  %1195 = vst.msk [vmem:[%s2096_s14 + $0x10] sm:$0xff] %vm1175_vm2, %v1842_v11  ;;  %p1764_p13 = pnand %p1763_p12, %p1911_p4  ;;  %p1771_p3 = por %p1770_p2, %p1769_p1 }
  0x22   : > { %1589 = vmatprep.mubr.msk.bf16.mxu0 %vm375_vm1, %v332_v21  ;;  %1700 = vmatprep.subr.msk.bf16.mxu0 %vm388_vm0, %v893_v22  ;;  %v1413_v32 = vld [vmem:[%s1961_s21 + $0x52] sm:$0xff]  ;;  %v1414_v33 = vld [vmem:[%s1961_s21 + $0x62] sm:$0xff]  ;;  %v333_v34 = vpack.c.bf16 %v1412_v30, %v1411_v29  ;;  %v296_v56 = vpack.c.bf16 %v1411_v29, %v1410_v20  ;;  %1212 = vst.msk [vmem:[%s2096_s14 + $0x98] sm:$0x3] %vm1193_vm3, %v1842_v11  ;;  %1196 = vst.msk [vmem:[%s2096_s14 + $0x18] sm:$0x3] %vm1193_vm3, %v1842_v11 }
  0x23   : > { %1695 = vmatprep.subr.msk.bf16.mxu1 %vm388_vm0, %v537_v23  ;;  %v265_v35 = vld [vmem:[%s1961_s21 + $0x20] sm:$0xff]  ;;  %v266_v36 = vld [vmem:[%s1961_s21 + $0x30] sm:$0xff]  ;;  %v334_v37 = vpack.c.bf16 %v1414_v33, %v1413_v32  ;;  %v297_v59 = vpack.c.bf16 %v1413_v32, %v1412_v30  ;;  %1197 = vst.msk [vmem:[%s2096_s14 + $0x20] sm:$0xff] %vm1175_vm2, %v1842_v11  ;;  %1201 = vst.msk [vmem:[%s2096_s14 + $0x40] sm:$0xff] %vm1175_vm2, %v1842_v11  ;;  %p1765_p0 = pneg %p1764_p13 }
  0x24   : > { %v267_v39 = vld [vmem:[%s1961_s21 + $0x40] sm:$0xff]  ;;  %v268_v40 = vld [vmem:[%s1961_s21 + $0x50] sm:$0xff]  ;;  %v272_v42 = vpack.c.bf16 %v266_v36, %v265_v35  ;;  %v308_v63 = vpack.c.bf16 %v265_v35, %v2002_v27  ;;  %1198 = vst.msk [vmem:[%s2096_s14 + $0x28] sm:$0x3] %vm1193_vm3, %v1842_v11  ;;  %1202 = vst.msk [vmem:[%s2096_s14 + $0x48] sm:$0x3] %vm1193_vm3, %v1842_v11 }
  0x25   : > { %v1415_v43 = vld [vmem:[%s1961_s21 + $0x72] sm:$0xff]  ;;  %v2030_v44 = vld [vmem:[%s1961_s21 + $0x82] sm:$0xff]  ;;  %v273_v45 = vpack.c.bf16 %v268_v40, %v267_v39  ;;  %v309_v2 = vpack.c.bf16 %v267_v39, %v266_v36  ;;  %1203 = vst.msk [vmem:[%s2096_s14 + $0x50] sm:$0xff] %vm1175_vm2, %v1842_v11  ;;  %1205 = vst.msk [vmem:[%s2096_s14 + $0x60] sm:$0xff] %vm1175_vm2, %v1842_v11  ;;  %p1772_p5 = pnand %p1771_p3, %p1765_p0 }
  0x26   : > { %v335_v48 = vpack.c.bf16 %v2030_v44, %v1415_v43  ;;  %v269_v49 = vld [vmem:[%s1961_s21 + $0x60] sm:$0xff]  ;;  %v270_v50 = vld [vmem:[%s1961_s21 + $0x70] sm:$0xff]  ;;  %v298_v62 = vpack.c.bf16 %v1415_v43, %v1414_v33  ;;  %1204 = vst.msk [vmem:[%s2096_s14 + $0x58] sm:$0x3] %vm1193_vm3, %v1842_v11  ;;  %1206 = vst.msk [vmem:[%s2096_s14 + $0x68] sm:$0x3] %vm1193_vm3, %v1842_v11 }
  0x27   : > { %1544 = vmatmul.mubr.msk.bf16.gmra.mrb[4].mxu1 %vm375_vm1, %v2008_v28  ;;  %v287_v51 = vld [vmem:[%s1961_s21 + $0x2] sm:$0xff]  ;;  %v274_v52 = vpack.c.bf16 %v270_v50, %v269_v49  ;;  %v1424_v58 = vld [vmem:[%s1961_s21 + $0x90] sm:$0xff]  ;;  %v310_v5 = vpack.c.bf16 %v269_v49, %v268_v40  ;;  %1207 = vst.msk [vmem:[%s2096_s14 + $0x70] sm:$0xff] %vm1175_vm2, %v1842_v11  ;;  %1209 = vst.msk [vmem:[%s2096_s14 + $0x80] sm:$0xff] %vm1175_vm2, %v1842_v11 }
  0x28   : > { %1549 = vmatprep.mubr.msk.bf16.mxu1 %vm375_vm1, %v271_v31  ;;  %v295_v53 = vpack.c.bf16 %v1409_v19, %v287_v51  ;;  %v1423_v57 = vld [vmem:[%s1961_s21 + $0x80] sm:$0xff]  ;;  %v1432_v4 = vld [vmem:[%s1961_s21 + $0x91] sm:$0xff]  ;;  %1208 = vst.msk [vmem:[%s2096_s14 + $0x78] sm:$0x3] %vm1193_vm3, %v1842_v11  ;;  %1210 = vst.msk [vmem:[%s2096_s14 + $0x88] sm:$0x3] %vm1193_vm3, %v1842_v11 }
  0x29   : > { %v348_v61 = vpack.c.bf16 %v1424_v58, %v1423_v57  ;;  %v311_v7 = vpack.c.bf16 %v1423_v57, %v270_v50  ;;  %v1440_v9 = vld [vmem:[%s1961_s21 + $0x92] sm:$0xff]  ;;  %v1477_v17 = vld [vmem:[%s2237_s2] ss:$0 sm:$0xff] }
  0x2a   : > { %v372_v10 = vpack.c.bf16 %v1440_v9, %v2030_v44 }
  0x2c   : > { %1590 = vmatmul.mubr.msk.bf16.vlgmr.msra.gmra.mrb[0].mxu0 %vm375_vm1, %v333_v34 }
  0x2d   : > { %1598 = vmatpush3.bf16.msra.mxu0 %v907_v38  ;;  %1593 = vmatprep.mubr.msk.bf16.mxu0 %vm375_vm1, %v334_v37 }
  0x2e   : > { %1701 = vmatprep.subr.msk.bf16.mxu0 %vm388_vm0, %v982_v41 }
  0x2f   : > { %1550 = vmatmul.mubr.msk.bf16.vlgmr.msra.gmra.mrb[0].mxu1 %vm375_vm1, %v272_v42 }
  0x30   : > { %1558 = vmatpush3.bf16.msra.mxu1 %v551_v46  ;;  %1553 = vmatprep.mubr.msk.bf16.mxu1 %vm375_vm1, %v273_v45 }
  0x31   : > { %1696 = vmatprep.subr.msk.bf16.mxu1 %vm388_vm0, %v626_v47 }
  0x34   : > { %1594 = vmatmul.mubr.msk.bf16.gmra.mrb[4].mxu0 %vm375_vm1, %v335_v48 }
  0x35   : > { %1599 = vmatprep.mubr.msk.bf16.mxu0 %vm375_vm1, %v272_v42 }
  0x37   : > { %1554 = vmatmul.mubr.msk.bf16.gmra.mrb[4].mxu1 %vm375_vm1, %v274_v52 }
  0x38   : > { %1559 = vmatprep.mubr.msk.bf16.mxu1 %vm375_vm1, %v295_v53 }
  0x3c   : > { %1600 = vmatmul.mubr.msk.bf16.vlgmr.msra.gmra.mrb[0].mxu0 %vm375_vm1, %v273_v45 }
  0x3d   : > { %1608 = vmatpush3.bf16.msra.mxu0 %v996_v54  ;;  %1603 = vmatprep.mubr.msk.bf16.mxu0 %vm375_vm1, %v274_v52 }
  0x3e   : > { %1702 = vmatprep.subr.msk.bf16.mxu0 %vm388_vm0, %v1071_v55 }
  0x3f   : > { %1560 = vmatmul.mubr.msk.bf16.vlgmr.msra.gmra.mrb[0].mxu1 %vm375_vm1, %v296_v56 }
  0x40   : > { %1568 = vmatpush3.bf16.msra.mxu1 %v640_v60  ;;  %1563 = vmatprep.mubr.msk.bf16.mxu1 %vm375_vm1, %v297_v59 }
  0x41   : > { %1698 = vmatprep.subr.msk.bf16.mxu1 %vm388_vm0, %v1932_v1  ;;  %v1431_v1 = vld [vmem:[%s1961_s21 + $0x81] sm:$0xff] }
  0x42   : > { %v360_v6 = vpack.c.bf16 %v1432_v4, %v1431_v1 }
  0x44   : > { %1604 = vmatmul.mubr.msk.bf16.gmra.mrb[4].mxu0 %vm375_vm1, %v348_v61 }
  0x45   : > { %1609 = vmatprep.mubr.msk.bf16.mxu0 %vm375_vm1, %v1972_v15 }
  0x47   : > { %1564 = vmatmul.mubr.msk.bf16.gmra.mrb[4].mxu1 %vm375_vm1, %v298_v62 }
  0x48   : > { %1569 = vmatprep.mubr.msk.bf16.mxu1 %vm375_vm1, %v308_v63 }
  0x4c   : > { %1610 = vmatmul.mubr.msk.bf16.vlgmr.msra.gmra.mrb[0].mxu0 %vm375_vm1, %v1976_v18 }
  0x4d   : > { %1618 = vmatpush3.bf16.msra.mxu0 %v1085_v0  ;;  %1613 = vmatprep.mubr.msk.bf16.mxu0 %vm375_vm1, %v2008_v28 }
  0x4f   : > { %1570 = vmatmul.mubr.msk.bf16.vlgmr.msra.gmra.mrb[0].mxu1 %vm375_vm1, %v309_v2 }
  0x50   : > { %1628 = vmatpush3.bf16.msra.mxu1 %v1941_v3  ;;  %1573 = vmatprep.mubr.msk.bf16.mxu1 %vm375_vm1, %v310_v5  ;;  %v323_v3 = vpack.c.bf16 %v1431_v1, %v1995_v25 }
  0x54   : > { %1614 = vmatmul.mubr.msk.bf16.gmra.mrb[4].mxu0 %vm375_vm1, %v360_v6 }
  0x55   : > { %1619 = vmatprep.mubr.msk.bf16.mxu0 %vm375_vm1, %v296_v56 }
  0x57   : > { %1574 = vmatmul.mubr.msk.bf16.gmra.mrb[4].mxu1 %vm375_vm1, %v311_v7 }
  0x58   : > { %1583 = vmatprep.mubr.msk.bf16.mxu1 %vm375_vm1, %v322_v8 }
  0x5c   : > { %1620 = vmatmul.mubr.msk.bf16.vlgmr.msra.gmra.mrb[0].mxu0 %vm375_vm1, %v297_v59 }
  0x5d   : > { %1623 = vmatprep.mubr.msk.bf16.mxu0 %vm375_vm1, %v298_v62 }
  0x63   : > { %1584 = vmatmul.mubr.msk.bf16.vlgmr.msra.gmra.mrb[4].mxu1 %vm375_vm1, %v323_v3 }
  0x64   : > { %1624 = vmatmul.mubr.msk.bf16.gmra.mrb[4].mxu0 %vm375_vm1, %v372_v10 }
 0x122   : > { %v1571_v12 = vpop.f32.mrb[0].mxu1 }
 0x123   : > { %v676_v13 = vpop.f32.mrb[1].mxu1 }
 0x124   : > { %v1572_v14 = vpop.f32.mrb[2].mxu1 }
 0x125   : > { %v679_v15 = vpop.f32.mrb[3].mxu1 }
 0x12f   : > { %v1621_v16 = vpop.f32.mrb[0].mxu0 }
 0x130   : > { %v1629_v18 = vadd.f32 %v1621_v16, %v1571_v12  ;;  %v1121_v19 = vpop.f32.mrb[1].mxu0 }
 0x131   : > { %v1630_v20 = vadd.f32 %v1121_v19, %v676_v13  ;;  %v1622_v21 = vpop.f32.mrb[2].mxu0 }
 0x132   : > { %v1169_v22 = vadd.f32 %v1629_v18, %v1477_v17  ;;  %v1631_v23 = vadd.f32 %v1622_v21, %v1572_v14  ;;  %v1124_v24 = vpop.f32.mrb[3].mxu0 }
 0x133   : > { %v1167_v25 = vadd.f32 %v1630_v20, %v1477_v17  ;;  %v1632_v26 = vadd.f32 %v1124_v24, %v679_v15 }
 0x134   : > { %1178 = vst.msk [vmem:[%s2144_s24 + $0x10] sm:$0xff] %vm1175_vm2, %v1169_v22  ;;  %v1186_v27 = vmax.f32 %v1169_v22, 0.0  ;;  %v1170_v28 = vadd.f32 %v1631_v23, %v1477_v17 }
 0x135   : > { %1176 = vst.msk [vmem:[%s2144_s24] sm:$0xff] %vm1175_vm2, %v1167_v25  ;;  %v1184_v29 = vmax.f32 %v1167_v25, 0.0  ;;  %v1168_v30 = vadd.f32 %v1632_v26, %v1477_v17 }
 0x136   : > { %1480 = vst.msk [vmem:[%s2096_s14 + $0x31] sm:$0xff] %vm1175_vm2, %v1186_v27  ;;  %1179 = vst.msk [vmem:[%s2144_s24 + $0x18] sm:$0xff] %vm1175_vm2, %v1170_v28  ;;  %v1187_v31 = vmax.f32 %v1170_v28, 0.0  ;;  %v1585_v33 = vpop.f32.mrb[4].mxu1 }
 0x137   : > { %1478 = vst.msk [vmem:[%s2096_s14 + $0x11] sm:$0xff] %vm1175_vm2, %v1184_v29  ;;  %1177 = vst.msk [vmem:[%s2144_s24 + $0x8] sm:$0xff] %vm1175_vm2, %v1168_v30  ;;  %v1185_v32 = vmax.f32 %v1168_v30, 0.0  ;;  %v1625_v34 = vpop.f32.mrb[4].mxu0  ;;  %v781_v36 = vpop.f32.mrb[5].mxu1 }
 0x138   : > { %1481 = vst.msk [vmem:[%s2096_s14 + $0x41] sm:$0xff] %vm1175_vm2, %v1187_v31  ;;  %v1633_v35 = vadd.f32 %v1625_v34, %v1585_v33  ;;  %v1137_v37 = vpop.f32.mrb[5].mxu0  ;;  %v1586_v39 = vpop.f32.mrb[6].mxu1 }
 0x139   : > { %1479 = vst.msk [vmem:[%s2096_s14 + $0x21] sm:$0xff] %vm1175_vm2, %v1185_v32  ;;  %v1634_v38 = vadd.f32 %v1137_v37, %v781_v36  ;;  %v1626_v40 = vpop.f32.mrb[6].mxu0  ;;  %v784_v43 = vpop.f32.mrb[7].mxu1 }
 0x13a   : > { %v1173_v41 = vadd.f32 %v1633_v35, %v1477_v17  ;;  %v1635_v42 = vadd.f32 %v1626_v40, %v1586_v39  ;;  %v1140_v44 = vpop.f32.mrb[7].mxu0 }
 0x13b   : > { %v1171_v45 = vadd.f32 %v1634_v38, %v1477_v17  ;;  %v1636_v46 = vadd.f32 %v1140_v44, %v784_v43 }
 0x13c   : > { %1182 = vst.msk [vmem:[%s2144_s24 + $0x30] sm:$0xff] %vm1175_vm2, %v1173_v41  ;;  %v1190_v47 = vmax.f32 %v1173_v41, 0.0  ;;  %v1174_v48 = vadd.f32 %v1635_v42, %v1477_v17 }
 0x13d   : > { %1180 = vst.msk [vmem:[%s2144_s24 + $0x20] sm:$0xff] %vm1175_vm2, %v1171_v45  ;;  %v1188_v49 = vmax.f32 %v1171_v45, 0.0  ;;  %v1172_v50 = vadd.f32 %v1636_v46, %v1477_v17 }
 0x13e   : > { %1484 = vst.msk [vmem:[%s2096_s14 + $0x71] sm:$0xff] %vm1175_vm2, %v1190_v47  ;;  %1183 = vst.msk [vmem:[%s2144_s24 + $0x38] sm:$0xff] %vm1175_vm2, %v1174_v48  ;;  %v1191_v51 = vmax.f32 %v1174_v48, 0.0 }
 0x13f   : > { %1482 = vst.msk [vmem:[%s2096_s14 + $0x51] sm:$0xff] %vm1175_vm2, %v1188_v49  ;;  %1181 = vst.msk [vmem:[%s2144_s24 + $0x28] sm:$0xff] %vm1175_vm2, %v1172_v50  ;;  %v1189_v52 = vmax.f32 %v1172_v50, 0.0 }
 0x140   : > { %1485 = vst.msk [vmem:[%s2096_s14 + $0x81] sm:$0xff] %vm1175_vm2, %v1191_v51 }
 0x141   : > { %1775 = shalt.err (!%p1772_p5)
}
 0x142   : > { %s1776_s13 = scalar_lea.hbm %s2169_s18, 1024  ;;  %s1780_s21 = scalar_lea.hbm %s2238_s3, 2048 }
 0x143   : > { %p1777_p6 = scmp.ne.s32.totalorder %s2169_s18, %s1776_s13  ;;  %p1781_p10 = scmp.lt.u32.totalorder %s2169_s18, %s2238_s3 }
 0x144   : > { %p1782_p11 = scmp.lt.u32.totalorder %s1780_s21, %s1776_s13  ;;  %p1784_p13 = scmp.lt.u32.totalorder %s1776_s13, %s2169_s18 }
 0x145   : > { %p1778_p7 = pnand %p1777_p6, %p1911_p4 }
 0x146   : > { %p1783_p12 = por %p1782_p11, %p1781_p10 }
 0x147   : > { %p1779_p9 = pneg %p1778_p7 }
 0x148   : > { %p1785_p0 = por %p1784_p13, %p1783_p12 }
 0x14a   : > { %p1786_p1 = pnand %p1785_p0, %p1779_p9 }
 0x14c   : > { %1789 = shalt.err (!%p1786_p1)
}
 0x14d   : > { %s1844_s26 = smov 128   ;;  %s1845_s30 = smov 8   ;;  %1483 = vst.msk [vmem:[%s2096_s14 + $0x61] sm:$0xff] %vm1175_vm2, %v1189_v52 }
 0x14e   : > { %1704 = dma.vmem_to_hbm [thread:$0]  (%p1911_p4), %s2171_s29, 1024, %s2169_s18, %s2187_s6, %s1844_s26, %s1844_s26, %s1845_s30  }
 0x14f PF: > { %p1710_p2 = scmp.ge.s32.totalorder %s1840_s20, 2  ;;  %s1263_s5 = sand.u32 1, %s1820_s15  }
 0x150   : > { %s1264_s7 = scalar_lea.sflag [#allocation3], %s1263_s5 }
 0x151   : > { %p1707_p3 = pnand %p1710_p2, %p1918_p8 }
 0x153   : > { %1815 = dma.done.wait (!%p1707_p3), %s1264_s7, 1024  }
 0x154   : > { %1817 = vsyncadd (!%p1707_p3), %s1264_s7, 4294966272  ;;  %s18_s20 = sadd.s32 1, %s1840_s20   ;;  %s2242_s15 = smov %s1824_s16 }
 0x155   : > { %p15_p5 = scmp.ge.s32.totalorder %s18_s20, 4   ;;  %s2243_s16 = smov %s1828_s17 }
 0x156   : > { %s2244_s17 = smov %s1924_s28  ;;  %s2245_s18 = smov %s1836_s19 }
 0x157   : > { %s2246_s19 = smov %s2248_s23  ;;  %17 = sbr.rel (!%p15_p5) target bundleno = 4 (0x4), region = 88 }
 0x15e   :  { %1280 = vsyncpa [#allocation3], 1 }
 0x15f   :  { %1282 = vsyncpa [#allocation3 + $0x1], 1 }

// kernel: _forward_impl.7
= control target key start
LH: loop header
LB: loop body
LE: loop exit
PB: predicated region body
PF: predicated region fallthrough
CT: control target
= control target key end

     0   :  { %10 = vsyncpa [#allocation3], 0  ;;  %s2313_s0 = inlined_call_operand.vmem [shape: f32[2,10,10,16], index: 0, kind: input, shape index: {}]   ;;  %s2314_s1 = inlined_call_operand.vmem [shape: bf16[144,16], index: 1, kind: input, shape index: {}]   ;;  %s2315_s2 = inlined_call_operand.vmem [shape: f32[1,16], index: 2, kind: input, shape index: {}]   ;;  %s2316_s3 = inlined_call_operand.hbm [shape: f32[2,8,8,16], index: 3, kind: output, shape index: {0}]   ;;  %s2317_s4 = inlined_call_operand.hbm [shape: f32[2,10,10,16], index: 4, kind: output, shape index: {1}]  }
   0x1   :  { %12 = vsyncpa [#allocation3 + $0x1], 0 }
   0x2   :  { %13 = vsyncpa [#allocation5], 0 }
   0x3   :  { %15 = vsyncpa [#allocation5 + $0x1], 0  ;;  %s1954_s15 = smov 0   ;;  %s1956_s16 = smov 0  }
   0x4   :  { %s1958_s17 = smov 0   ;;  %s1960_s18 = smov 0  }
   0x5   :  { %s1962_s19 = smov 0   ;;  %s1964_s20 = smov 0  }
   0x6 LB: > { %s1418_s21 = sadd.s32 4294967295, %s1922_s20   ;;  %s1419_s22 = sadd.s32 4294967294, %s1922_s20   ;;  %s1922_s20 = sphi %s1964_s20, %s21_s20   ;;  %s1918_s19 = sphi %s1962_s19, %s2324_s19   ;;  %s1914_s18 = sphi %s1960_s18, %s2323_s18   ;;  %s1910_s17 = sphi %s1958_s17, %s2322_s17   ;;  %s1906_s16 = sphi %s1956_s16, %s2321_s16   ;;  %s1902_s15 = sphi %s1954_s15, %s2320_s15  }
   0x7   : > { %s33_s23 = sadd.s32 1, %s1918_s19  ;;  %s120_s24 = sadd.s32 1, %s1910_s17 }
   0x8   : > { %p35_p0 = scmp.ge.s32.totalorder %s33_s23, 2  ;;  %p130_p1 = scmp.ne.s32.totalorder %s1910_s17, %s1906_s16 }
   0x9   : > { %p131_p2 = scmp.eq.s32.totalorder %s1418_s21, 1  ;;  %p136_p3 = scmp.ne.s32.totalorder %s1906_s16, %s1902_s15 }
   0xa   : > { %s2326_s23 = smov (%p35_p0, %s33_s23), 0  ;;  %p137_p5 = scmp.eq.s32.totalorder %s1419_s22, 1 }
   0xb   : > { %p1994_p4 = por %p131_p2, %p130_p1  ;;  %s115_s26 = ssub.s32 %s1918_s19, %s2326_s23 }
   0xc   : > { %p1424_p6 = scmp.ge.s32.totalorder %s1922_s20, 1  ;;  %p118_p7 = scmp.eq.s32.totalorder %s115_s26, 0 }
   0xd   : > { %p2001_p8 = por %p137_p5, %p136_p3  ;;  %p204_p9 = scmp.lt.s32.totalorder %s1922_s20, 3 }
   0xe   : > { %s2007_s28 = scalar_select %p118_p7, %s1910_s17, %s120_s24  }
   0xf   : > { %p205_p10 = pnand %p1424_p6, %p204_p9 }
  0x10   : > { %v1803_v0 = vld [vmem:[%s2314_s1 + $0x8] sm:$0xff] (!%p205_p10)   ;;  %p242_p11 = scmp.lt.s32.totalorder (!%p205_p10), %s1914_s18, 1  ;;  %v2016_v1 = vld [vmem:[%s2314_s1 + $0x20] sm:$0xff] (!%p205_p10)   ;;  %vm375_vm0 = vcmask (!%p205_p10), 130048   ;;  %v1807_v17 = vld [vmem:[%s2314_s1 + $0x30] sm:$0xff] (!%p205_p10)   ;;  %s2136_s10 = sand.u32 (!%p205_p10), 1, %s1906_s16  }
  0x11   : > { %208 = sbr.rel (%p205_p10) target bundleno = 365 (0x16d), region = 32  ;;  %1581 = vmatprep.subr.bf16.mxu1 (!%p205_p10), %v1803_v0  ;;  %v1805_v2 = vld [vmem:[%s2314_s1] sm:$0xff] (!%p205_p10)   ;;  %1621 = vmatprep.subr.bf16.mxu0 (!%p205_p10), %v2016_v1  ;;  %v1806_v3 = vld [vmem:[%s2314_s1 + $0x28] sm:$0xff] (!%p205_p10)   ;;  %v1808_v18 = vld [vmem:[%s2314_s1 + $0x10] sm:$0xff] (!%p205_p10)   ;;  %vm1219_vm1 = vcmask (!%p205_p10), 123904   ;;  %s1425_s13 = sshll.u32 (!%p205_p10), %s2136_s10, 6 }
  0x12   : > { %1582 = vmatpush3.bf16.msra.mxu1 (!%p205_p10), %v1803_v0  ;;  %1622 = vmatpush3.bf16.msra.mxu0 (!%p205_p10), %v2016_v1  ;;  %v1809_v36 = vld [vmem:[%s2314_s1 + $0x38] sm:$0xff] (!%p205_p10)   ;;  %v1811_v48 = vld [vmem:[%s2314_s1 + $0x40] sm:$0xff] (!%p205_p10)   ;;  %s1737_s11 = smul.u32 (!%p205_p10), 160, %s2136_s10  ;;  %s2185_s22 = scalar_lea.vmem (!%p205_p10), [#allocation2], %s1425_s13 }
  0x13   : > { %1591 = vmatprep.subr.bf16.mxu1 (!%p205_p10), %v1805_v2  ;;  %1631 = vmatprep.subr.bf16.mxu0 (!%p205_p10), %v1806_v3  ;;  %v1810_v41 = vld [vmem:[%s2314_s1 + $0x18] sm:$0xff] (!%p205_p10)   ;;  %s1535_s24 = sshll.u32 (!%p205_p10), %s1914_s18, 10  ;;  %s1268_s26 = sshll.u32 (!%p205_p10), %s2185_s22, 4  ;;  %s2213_s26 = int_to_ptr.vmem [resolvable:$true] %s1268_s26 }
  0x14   : > { %s2208_s5 = scalar_lea.hbm (!%p205_p10), %s2316_s3, %s1535_s24  ;;  %s1739_s6 = smul.u32 (!%p205_p10), 2560, %s1914_s18 }
  0x15   : > { %s1812_s13 = scalar_lea.vmem (!%p205_p10), %s2213_s26, 1024  ;;  %s1925_s14 = smov (!%p205_p10), [#allocation2]  }
  0x16   : > { %s2229_s9 = scalar_lea.hbm (!%p205_p10), %s2317_s4, %s1739_s6  ;;  %p1813_p12 = scmp.ne.s32.totalorder (!%p205_p10), %s2213_s26, %s1812_s13 }
  0x18   : > { %s243_s7 = scalar_select %p242_p11, %s1914_s18, 1 }
  0x19   : > { %p1814_p13 = pnand %p1813_p12, %p1994_p4 }
  0x1a   : > { %s1738_s12 = smul.u32 160, %s243_s7 }
  0x1b   : > { %p1815_p0 = pneg %p1814_p13 }
  0x1c   : > { %s2030_s21 = scalar_lea.vmem %s2313_s0, %s1738_s12  ;;  %s2139_s12 = scalar_lea.vmem [#allocation4], %s1737_s11 }
  0x1d   : > { %v267_v4 = vld [vmem:[%s2030_s21 + $0x1] sm:$0xff]  ;;  %v268_v5 = vld [vmem:[%s2030_s21 + $0x11] sm:$0xff]  ;;  %s1285_s7 = sshll.u32 %s2139_s12, 4  ;;  %s1249_s11 = scalar_lea.sflag [#allocation3], %s2136_s10  ;;  %s2231_s7 = int_to_ptr.vmem [resolvable:$true] %s1285_s7 }
  0x1e   : > { %v1436_v6 = vld [vmem:[%s2030_s21 + $0x21] sm:$0xff]  ;;  %v275_v7 = vpack.c.bf16 %v268_v5, %v267_v4  ;;  %v270_v9 = vld [vmem:[%s2030_s21 + $0x31] sm:$0xff] }
  0x1f   : > { %v312_v8 = vpack.c.bf16 %v1436_v6, %v268_v5  ;;  %v1438_v10 = vld [vmem:[%s2030_s21 + $0x41] sm:$0xff]  ;;  %v2038_v11 = vld [vmem:[%s2030_s21 + $0x51] sm:$0xff]  ;;  %v2040_v12 = vpack.c.bf16 %v270_v9, %v1436_v6 }
  0x20   : > { %v313_v13 = vpack.c.bf16 %v1438_v10, %v270_v9  ;;  %v2043_v14 = vpack.c.bf16 %v2038_v11, %v1438_v10  ;;  %v1443_v15 = vld [vmem:[%s2030_s21 + $0x12] sm:$0xff]  ;;  %1583 = vmatprep.mubr.msk.bf16.mxu1 %vm375_vm0, %v275_v7  ;;  %v1444_v16 = vld [vmem:[%s2030_s21 + $0x22] sm:$0xff] }
  0x21   : > { %1623 = vmatprep.mubr.msk.bf16.mxu0 %vm375_vm0, %v312_v8  ;;  %1584 = vmatmul.mubr.msk.bf16.vlgmr.msra.gmra.mrb[0].mxu1 %vm375_vm0, %v2040_v12  ;;  %v324_v19 = vpack.c.bf16 %v1444_v16, %v1443_v15  ;;  %v2059_v20 = vld [vmem:[%s2030_s21 + $0x61] sm:$0xff]  ;;  %v2062_v21 = vld [vmem:[%s2030_s21 + $0x71] sm:$0xff]  ;;  %v1520_v8 = vld [vmem:[%s2315_s2] ss:$0 sm:$0xff] }
  0x22   : > { %1624 = vmatmul.mubr.msk.bf16.vlgmr.msra.gmra.mrb[0].mxu0 %vm375_vm0, %v313_v13  ;;  %1592 = vmatpush3.bf16.msra.mxu1 %v1805_v2  ;;  %v255_v22 = vld [vmem:[%s2030_s21] sm:$0xff]  ;;  %v256_v23 = vld [vmem:[%s2030_s21 + $0x10] sm:$0xff]  ;;  %v278_v24 = vpack.c.bf16 %v2062_v21, %v2059_v20  ;;  %v314_v62 = vpack.c.bf16 %v2059_v20, %v2038_v11  ;;  %v1924_v2 = vmov 0.0  }
  0x23   : > { %1632 = vmatpush3.bf16.msra.mxu0 %v1806_v3  ;;  %1587 = vmatprep.mubr.msk.bf16.mxu1 %vm375_vm0, %v2043_v14  ;;  %v1445_v25 = vld [vmem:[%s2030_s21 + $0x32] sm:$0xff]  ;;  %v1446_v26 = vld [vmem:[%s2030_s21 + $0x42] sm:$0xff]  ;;  %v263_v27 = vpack.c.bf16 %v256_v23, %v255_v22  ;;  %1220 = vst.msk [vmem:[%s2139_s12 + $0x8] sm:$0x3] %vm1219_vm1, %v1924_v2  ;;  %1226 = vst.msk [vmem:[%s2139_s12 + $0x38] sm:$0x3] %vm1219_vm1, %v1924_v2 }
  0x24   : > { %1633 = vmatprep.mubr.msk.bf16.mxu0 %vm375_vm0, %v324_v19  ;;  %1641 = vmatprep.subr.bf16.mxu0 %v1807_v17  ;;  %v1447_v28 = vld [vmem:[%s2030_s21 + $0x52] sm:$0xff]  ;;  %v1448_v29 = vld [vmem:[%s2030_s21 + $0x62] sm:$0xff]  ;;  %v325_v30 = vpack.c.bf16 %v1446_v26, %v1445_v25  ;;  %v288_v49 = vpack.c.bf16 %v1445_v25, %v1444_v16  ;;  %1225 = vst.msk [vmem:[%s2139_s12 + $0x30] sm:$0xff] %vm375_vm0, %v1924_v2  ;;  %1218 = vst.msk [vmem:[%s2139_s12] sm:$0xff] %vm375_vm0, %v1924_v2 }
  0x25   : > { %1601 = vmatprep.subr.bf16.mxu1 %v1808_v18  ;;  %v257_v31 = vld [vmem:[%s2030_s21 + $0x20] sm:$0xff]  ;;  %v258_v32 = vld [vmem:[%s2030_s21 + $0x30] sm:$0xff]  ;;  %v326_v33 = vpack.c.bf16 %v1448_v29, %v1447_v28  ;;  %v289_v52 = vpack.c.bf16 %v1447_v28, %v1446_v26  ;;  %1238 = vst.msk [vmem:[%s2139_s12 + $0x98] sm:$0x3] %vm1219_vm1, %v1924_v2  ;;  %1222 = vst.msk [vmem:[%s2139_s12 + $0x18] sm:$0x3] %vm1219_vm1, %v1924_v2 }
  0x26   : > { %v259_v34 = vld [vmem:[%s2030_s21 + $0x40] sm:$0xff]  ;;  %v260_v35 = vld [vmem:[%s2030_s21 + $0x50] sm:$0xff]  ;;  %v264_v37 = vpack.c.bf16 %v258_v32, %v257_v31  ;;  %v300_v55 = vpack.c.bf16 %v257_v31, %v256_v23  ;;  %1221 = vst.msk [vmem:[%s2139_s12 + $0x10] sm:$0xff] %vm375_vm0, %v1924_v2  ;;  %1223 = vst.msk [vmem:[%s2139_s12 + $0x20] sm:$0xff] %vm375_vm0, %v1924_v2 }
  0x27   : > { %v1449_v38 = vld [vmem:[%s2030_s21 + $0x72] sm:$0xff]  ;;  %v1450_v39 = vld [vmem:[%s2030_s21 + $0x82] sm:$0xff]  ;;  %v265_v40 = vpack.c.bf16 %v260_v35, %v259_v34  ;;  %v301_v56 = vpack.c.bf16 %v259_v34, %v258_v32  ;;  %1224 = vst.msk [vmem:[%s2139_s12 + $0x28] sm:$0x3] %vm1219_vm1, %v1924_v2  ;;  %1228 = vst.msk [vmem:[%s2139_s12 + $0x48] sm:$0x3] %vm1219_vm1, %v1924_v2 }
  0x28   : > { %v327_v42 = vpack.c.bf16 %v1450_v39, %v1449_v38  ;;  %v261_v43 = vld [vmem:[%s2030_s21 + $0x60] sm:$0xff]  ;;  %v262_v44 = vld [vmem:[%s2030_s21 + $0x70] sm:$0xff]  ;;  %v290_v54 = vpack.c.bf16 %v1449_v38, %v1448_v29  ;;  %1227 = vst.msk [vmem:[%s2139_s12 + $0x40] sm:$0xff] %vm375_vm0, %v1924_v2  ;;  %1229 = vst.msk [vmem:[%s2139_s12 + $0x50] sm:$0xff] %vm375_vm0, %v1924_v2 }
  0x29   : > { %1588 = vmatmul.mubr.msk.bf16.gmra.mrb[4].mxu1 %vm375_vm0, %v278_v24  ;;  %v279_v45 = vld [vmem:[%s2030_s21 + $0x2] sm:$0xff]  ;;  %v266_v46 = vpack.c.bf16 %v262_v44, %v261_v43  ;;  %v1458_v51 = vld [vmem:[%s2030_s21 + $0x90] sm:$0xff]  ;;  %v302_v59 = vpack.c.bf16 %v261_v43, %v260_v35  ;;  %1230 = vst.msk [vmem:[%s2139_s12 + $0x58] sm:$0x3] %vm1219_vm1, %v1924_v2  ;;  %1232 = vst.msk [vmem:[%s2139_s12 + $0x68] sm:$0x3] %vm1219_vm1, %v1924_v2 }
  0x2a   : > { %1593 = vmatprep.mubr.msk.bf16.mxu1 %vm375_vm0, %v263_v27  ;;  %v287_v47 = vpack.c.bf16 %v1443_v15, %v279_v45  ;;  %v1457_v50 = vld [vmem:[%s2030_s21 + $0x80] sm:$0xff]  ;;  %v1466_v58 = vld [vmem:[%s2030_s21 + $0x91] sm:$0xff]  ;;  %1231 = vst.msk [vmem:[%s2139_s12 + $0x60] sm:$0xff] %vm375_vm0, %v1924_v2  ;;  %1233 = vst.msk [vmem:[%s2139_s12 + $0x70] sm:$0xff] %vm375_vm0, %v1924_v2 }
  0x2b   : > { %v340_v53 = vpack.c.bf16 %v1458_v51, %v1457_v50  ;;  %v1465_v57 = vld [vmem:[%s2030_s21 + $0x81] sm:$0xff]  ;;  %v303_v61 = vpack.c.bf16 %v1457_v50, %v262_v44  ;;  %v1474_v63 = vld [vmem:[%s2030_s21 + $0x92] sm:$0xff]  ;;  %1234 = vst.msk [vmem:[%s2139_s12 + $0x78] sm:$0x3] %vm1219_vm1, %v1924_v2  ;;  %1236 = vst.msk [vmem:[%s2139_s12 + $0x88] sm:$0x3] %vm1219_vm1, %v1924_v2 }
  0x2c   : > { %v352_v60 = vpack.c.bf16 %v1466_v58, %v1465_v57  ;;  %v315_v0 = vpack.c.bf16 %v1465_v57, %v2062_v21  ;;  %1235 = vst.msk [vmem:[%s2139_s12 + $0x80] sm:$0xff] %vm375_vm0, %v1924_v2  ;;  %1237 = vst.msk [vmem:[%s2139_s12 + $0x90] sm:$0xff] %vm375_vm0, %v1924_v2  ;;  %s1816_s21 = sshll.u32 %s1925_s14, 4  ;;  %s1817_s21 = int_to_ptr.vmem [resolvable:$false] %s1816_s21 }
  0x2d   : > { %p1819_p1 = scmp.lt.s32.totalorder %s2213_s26, %s1817_s21 }
  0x2e   : > { %1634 = vmatmul.mubr.msk.bf16.vlgmr.msra.gmra.mrb[0].mxu0 %vm375_vm0, %v325_v30 }
  0x2f   : > { %1642 = vmatpush3.bf16.msra.mxu0 %v1807_v17  ;;  %1637 = vmatprep.mubr.msk.bf16.mxu0 %vm375_vm0, %v326_v33 }
  0x30   : > { %1651 = vmatprep.subr.bf16.mxu0 %v1809_v36 }
  0x31   : > { %1594 = vmatmul.mubr.msk.bf16.vlgmr.msra.gmra.mrb[0].mxu1 %vm375_vm0, %v264_v37 }
  0x32   : > { %1602 = vmatpush3.bf16.msra.mxu1 %v1808_v18  ;;  %1597 = vmatprep.mubr.msk.bf16.mxu1 %vm375_vm0, %v265_v40 }
  0x33   : > { %1611 = vmatprep.subr.bf16.mxu1 %v1810_v41 }
  0x36   : > { %1638 = vmatmul.mubr.msk.bf16.gmra.mrb[4].mxu0 %vm375_vm0, %v327_v42 }
  0x37   : > { %1643 = vmatprep.mubr.msk.bf16.mxu0 %vm375_vm0, %v264_v37 }
  0x39   : > { %1598 = vmatmul.mubr.msk.bf16.gmra.mrb[4].mxu1 %vm375_vm0, %v266_v46 }
  0x3a   : > { %1603 = vmatprep.mubr.msk.bf16.mxu1 %vm375_vm0, %v287_v47 }
  0x3e   : > { %1644 = vmatmul.mubr.msk.bf16.vlgmr.msra.gmra.mrb[0].mxu0 %vm375_vm0, %v265_v40 }
  0x3f   : > { %1652 = vmatpush3.bf16.msra.mxu0 %v1809_v36  ;;  %1647 = vmatprep.mubr.msk.bf16.mxu0 %vm375_vm0, %v266_v46 }
  0x40   : > { %1661 = vmatprep.subr.bf16.mxu0 %v1811_v48 }
  0x41   : > { %1604 = vmatmul.mubr.msk.bf16.vlgmr.msra.gmra.mrb[0].mxu1 %vm375_vm0, %v288_v49 }
  0x42   : > { %1612 = vmatpush3.bf16.msra.mxu1 %v1810_v41  ;;  %1607 = vmatprep.mubr.msk.bf16.mxu1 %vm375_vm0, %v289_v52 }
  0x43   : > { %1671 = vmatprep.subr.bf16.mxu1 %v2016_v1 }
  0x46   : > { %1648 = vmatmul.mubr.msk.bf16.gmra.mrb[4].mxu0 %vm375_vm0, %v340_v53 }
  0x47   : > { %1653 = vmatprep.mubr.msk.bf16.mxu0 %vm375_vm0, %v2040_v12 }
  0x49   : > { %1608 = vmatmul.mubr.msk.bf16.gmra.mrb[4].mxu1 %vm375_vm0, %v290_v54 }
  0x4a   : > { %1613 = vmatprep.mubr.msk.bf16.mxu1 %vm375_vm0, %v300_v55 }
  0x4e   : > { %1654 = vmatmul.mubr.msk.bf16.vlgmr.msra.gmra.mrb[0].mxu0 %vm375_vm0, %v2043_v14 }
  0x4f   : > { %1662 = vmatpush3.bf16.msra.mxu0 %v1811_v48  ;;  %1657 = vmatprep.mubr.msk.bf16.mxu0 %vm375_vm0, %v278_v24 }
  0x51   : > { %1614 = vmatmul.mubr.msk.bf16.vlgmr.msra.gmra.mrb[0].mxu1 %vm375_vm0, %v301_v56 }
  0x52   : > { %1672 = vmatpush3.bf16.msra.mxu1 %v2016_v1  ;;  %1617 = vmatprep.mubr.msk.bf16.mxu1 %vm375_vm0, %v302_v59  ;;  %v364_v1 = vpack.c.bf16 %v1474_v63, %v1450_v39 }
  0x56   : > { %1658 = vmatmul.mubr.msk.bf16.gmra.mrb[4].mxu0 %vm375_vm0, %v352_v60 }
  0x57   : > { %1663 = vmatprep.mubr.msk.bf16.mxu0 %vm375_vm0, %v288_v49 }
  0x59   : > { %1618 = vmatmul.mubr.msk.bf16.gmra.mrb[4].mxu1 %vm375_vm0, %v303_v61 }
  0x5a   : > { %1627 = vmatprep.mubr.msk.bf16.mxu1 %vm375_vm0, %v314_v62 }
  0x5e   : > { %1664 = vmatmul.mubr.msk.bf16.vlgmr.msra.gmra.mrb[0].mxu0 %vm375_vm0, %v289_v52 }
  0x5f   : > { %1667 = vmatprep.mubr.msk.bf16.mxu0 %vm375_vm0, %v290_v54 }
  0x65   : > { %1628 = vmatmul.mubr.msk.bf16.vlgmr.msra.gmra.mrb[4].mxu1 %vm375_vm0, %v315_v0 }
  0x66   : > { %1668 = vmatmul.mubr.msk.bf16.gmra.mrb[4].mxu0 %vm375_vm0, %v364_v1 }
 0x124   : > { %v1615_v3 = vpop.f32.mrb[0].mxu1 }
 0x125   : > { %v683_v4 = vpop.f32.mrb[1].mxu1 }
 0x126   : > { %v1616_v5 = vpop.f32.mrb[2].mxu1 }
 0x127   : > { %v686_v6 = vpop.f32.mrb[3].mxu1 }
 0x131   : > { %v1665_v7 = vpop.f32.mrb[0].mxu0 }
 0x132   : > { %v1673_v9 = vadd.f32 %v1665_v7, %v1615_v3  ;;  %v1148_v10 = vpop.f32.mrb[1].mxu0 }
 0x133   : > { %v1674_v11 = vadd.f32 %v1148_v10, %v683_v4  ;;  %v1666_v12 = vpop.f32.mrb[2].mxu0 }
 0x134   : > { %v1196_v13 = vadd.f32 %v1673_v9, %v1520_v8  ;;  %v1675_v14 = vadd.f32 %v1666_v12, %v1616_v5  ;;  %v1151_v15 = vpop.f32.mrb[3].mxu0 }
 0x135   : > { %v1194_v16 = vadd.f32 %v1674_v11, %v1520_v8  ;;  %v1676_v17 = vadd.f32 %v1151_v15, %v686_v6 }
 0x136   : > { %1204 = vst.msk [vmem:[%s2185_s22 + $0x10] sm:$0xff] %vm375_vm0, %v1196_v13  ;;  %v1212_v18 = vmax.f32 %v1196_v13, 0.0  ;;  %v1197_v19 = vadd.f32 %v1675_v14, %v1520_v8 }
 0x137   : > { %1202 = vst.msk [vmem:[%s2185_s22] sm:$0xff] %vm375_vm0, %v1194_v16  ;;  %v1210_v20 = vmax.f32 %v1194_v16, 0.0  ;;  %v1195_v21 = vadd.f32 %v1676_v17, %v1520_v8 }
 0x138   : > { %1523 = vst.msk [vmem:[%s2139_s12 + $0x31] sm:$0xff] %vm375_vm0, %v1212_v18  ;;  %1205 = vst.msk [vmem:[%s2185_s22 + $0x18] sm:$0xff] %vm375_vm0, %v1197_v19  ;;  %v1213_v22 = vmax.f32 %v1197_v19, 0.0  ;;  %v1629_v24 = vpop.f32.mrb[4].mxu1 }
 0x139   : > { %1521 = vst.msk [vmem:[%s2139_s12 + $0x11] sm:$0xff] %vm375_vm0, %v1210_v20  ;;  %1203 = vst.msk [vmem:[%s2185_s22 + $0x8] sm:$0xff] %vm375_vm0, %v1195_v21  ;;  %v1211_v23 = vmax.f32 %v1195_v21, 0.0  ;;  %v1669_v25 = vpop.f32.mrb[4].mxu0  ;;  %v792_v27 = vpop.f32.mrb[5].mxu1 }
 0x13a   : > { %1524 = vst.msk [vmem:[%s2139_s12 + $0x41] sm:$0xff] %vm375_vm0, %v1213_v22  ;;  %v1677_v26 = vadd.f32 %v1669_v25, %v1629_v24  ;;  %v1164_v28 = vpop.f32.mrb[5].mxu0  ;;  %v1630_v30 = vpop.f32.mrb[6].mxu1 }
 0x13b   : > { %1522 = vst.msk [vmem:[%s2139_s12 + $0x21] sm:$0xff] %vm375_vm0, %v1211_v23  ;;  %v1678_v29 = vadd.f32 %v1164_v28, %v792_v27  ;;  %v1670_v31 = vpop.f32.mrb[6].mxu0  ;;  %v795_v34 = vpop.f32.mrb[7].mxu1 }
 0x13c   : > { %v1200_v32 = vadd.f32 %v1677_v26, %v1520_v8  ;;  %v1679_v33 = vadd.f32 %v1670_v31, %v1630_v30  ;;  %v1167_v35 = vpop.f32.mrb[7].mxu0 }
 0x13d   : > { %v1198_v36 = vadd.f32 %v1678_v29, %v1520_v8  ;;  %v1680_v37 = vadd.f32 %v1167_v35, %v795_v34 }
 0x13e   : > { %1208 = vst.msk [vmem:[%s2185_s22 + $0x30] sm:$0xff] %vm375_vm0, %v1200_v32  ;;  %v1216_v38 = vmax.f32 %v1200_v32, 0.0  ;;  %v1201_v39 = vadd.f32 %v1679_v33, %v1520_v8 }
 0x13f   : > { %1206 = vst.msk [vmem:[%s2185_s22 + $0x20] sm:$0xff] %vm375_vm0, %v1198_v36  ;;  %v1214_v40 = vmax.f32 %v1198_v36, 0.0  ;;  %v1199_v41 = vadd.f32 %v1680_v37, %v1520_v8 }
 0x140   : > { %1527 = vst.msk [vmem:[%s2139_s12 + $0x71] sm:$0xff] %vm375_vm0, %v1216_v38  ;;  %1209 = vst.msk [vmem:[%s2185_s22 + $0x38] sm:$0xff] %vm375_vm0, %v1201_v39  ;;  %v1217_v42 = vmax.f32 %v1201_v39, 0.0 }
 0x141   : > { %1525 = vst.msk [vmem:[%s2139_s12 + $0x51] sm:$0xff] %vm375_vm0, %v1214_v40  ;;  %1207 = vst.msk [vmem:[%s2185_s22 + $0x28] sm:$0xff] %vm375_vm0, %v1199_v41  ;;  %v1215_v43 = vmax.f32 %v1199_v41, 0.0  ;;  %s1818_s22 = scalar_lea.vmem %s1817_s21, 2048 }
 0x142   : > { %1528 = vst.msk [vmem:[%s2139_s12 + $0x81] sm:$0xff] %vm375_vm0, %v1217_v42  ;;  %p1820_p2 = scmp.lt.s32.totalorder %s1818_s22, %s1812_s13 }
 0x144   : > { %p1821_p3 = por %p1820_p2, %p1819_p1 }
 0x146   : > { %p1822_p5 = pnand %p1821_p3, %p1815_p0 }
 0x148   : > { %1825 = shalt.err (!%p1822_p5)
}
 0x149   : > { %s1826_s24 = scalar_lea.hbm %s2208_s5, 1024  ;;  %s1830_s6 = scalar_lea.hbm %s2316_s3, 2048 }
 0x14a   : > { %p1827_p6 = scmp.ne.s32.totalorder %s2208_s5, %s1826_s24  ;;  %p1831_p10 = scmp.lt.u32.totalorder %s2208_s5, %s2316_s3 }
 0x14b   : > { %p1832_p11 = scmp.lt.u32.totalorder %s1830_s6, %s1826_s24  ;;  %p1834_p13 = scmp.lt.u32.totalorder %s1826_s24, %s2208_s5 }
 0x14c   : > { %p1828_p7 = pnand %p1827_p6, %p1994_p4 }
 0x14d   : > { %p1833_p12 = por %p1832_p11, %p1831_p10 }
 0x14e   : > { %p1829_p9 = pneg %p1828_p7 }
 0x14f   : > { %p1835_p0 = por %p1834_p13, %p1833_p12 }
 0x151   : > { %p1836_p1 = pnand %p1835_p0, %p1829_p9 }
 0x153   : > { %1839 = shalt.err (!%p1836_p1)
}
 0x154   : > { %s1926_s13 = smov 128   ;;  %s1927_s14 = smov 8   ;;  %1526 = vst.msk [vmem:[%s2139_s12 + $0x61] sm:$0xff] %vm375_vm0, %v1215_v43 }
 0x155   : > { %1740 = dma.vmem_to_hbm [thread:$0]  (%p1994_p4), %s2213_s26, 1024, %s2208_s5, %s1249_s11, %s1926_s13, %s1926_s13, %s1927_s14  }
 0x156   : > { %s1254_s21 = scalar_lea.sflag [#allocation5], %s2136_s10  ;;  %s1840_s22 = scalar_lea.vmem %s2231_s7, 2560 }
 0x157   : > { %p1841_p2 = scmp.ne.s32.totalorder %s2231_s7, %s1840_s22  ;;  %s1928_s24 = smov [#allocation4]  }
 0x158   : > { %s1844_s29 = sshll.u32 %s1928_s24, 4  ;;  %s1845_s29 = int_to_ptr.vmem [resolvable:$false] %s1844_s29 }
 0x159   : > { %p1842_p3 = pnand %p1841_p2, %p1994_p4  ;;  %s1846_s30 = scalar_lea.vmem %s1845_s29, 5120 }
 0x15a   : > { %p1847_p6 = scmp.lt.s32.totalorder %s2231_s7, %s1845_s29  ;;  %p1848_p7 = scmp.lt.s32.totalorder %s1846_s30, %s1840_s22 }
 0x15b   : > { %p1843_p5 = pneg %p1842_p3 }
 0x15c   : > { %p1849_p9 = por %p1848_p7, %p1847_p6 }
 0x15e   : > { %p1850_p10 = pnand %p1849_p9, %p1843_p5 }
 0x160   : > { %1853 = shalt.err (!%p1850_p10)
}
 0x161   : > { %s1854_s12 = scalar_lea.hbm %s2229_s9, 2560  ;;  %s1858_s11 = scalar_lea.hbm %s2317_s4, 5120 }
 0x162   : > { %p1855_p11 = scmp.ne.s32.totalorder %s2229_s9, %s1854_s12  ;;  %p1859_p0 = scmp.lt.u32.totalorder %s2229_s9, %s2317_s4 }
 0x163   : > { %p1860_p1 = scmp.lt.u32.totalorder %s1858_s11, %s1854_s12  ;;  %p1862_p3 = scmp.lt.u32.totalorder %s1854_s12, %s2229_s9 }
 0x164   : > { %p1856_p12 = pnand %p1855_p11, %p1994_p4 }
 0x165   : > { %p1861_p2 = por %p1860_p1, %p1859_p0 }
 0x166   : > { %p1857_p13 = pneg %p1856_p12 }
 0x167   : > { %p1863_p5 = por %p1862_p3, %p1861_p2 }
 0x169   : > { %p1864_p6 = pnand %p1863_p5, %p1857_p13 }
 0x16b   : > { %1867 = shalt.err (!%p1864_p6)
}
 0x16c   : > { %1741 = dma.vmem_to_hbm [thread:$0]  (%p1994_p4), %s2231_s7, 2560, %s2229_s9, %s1254_s21, %s1926_s13, %s1926_s13, %s1927_s14  }
 0x16d PF: > { %p1751_p7 = scmp.ge.s32.totalorder %s1922_s20, 2  ;;  %s1300_s8 = sand.u32 1, %s1902_s15  }
 0x16e   : > { %s1301_s22 = scalar_lea.sflag [#allocation3], %s1300_s8 }
 0x16f   : > { %p1745_p9 = pnand %p1751_p7, %p2001_p8 }
 0x171   : > { %1893 = dma.done.wait (!%p1745_p9), %s1301_s22, 1024  }
 0x172   : > { %1895 = vsyncadd (!%p1745_p9), %s1301_s22, 4294966272  ;;  %s1310_s25 = scalar_lea.sflag [#allocation5], %s1300_s8 }
 0x173   : > { %1897 = dma.done.wait (!%p1745_p9), %s1310_s25, 2560  }
 0x174   : > { %1899 = vsyncadd (!%p1745_p9), %s1310_s25, 4294964736  ;;  %s21_s20 = sadd.s32 1, %s1922_s20   ;;  %s2320_s15 = smov %s1906_s16 }
 0x175   : > { %p18_p10 = scmp.ge.s32.totalorder %s21_s20, 4   ;;  %s2321_s16 = smov %s1910_s17 }
 0x176   : > { %s2322_s17 = smov %s2007_s28  ;;  %s2323_s18 = smov %s1918_s19 }
 0x177   : > { %s2324_s19 = smov %s2326_s23  ;;  %20 = sbr.rel (!%p18_p10) target bundleno = 6 (0x6), region = 93 }
 0x17e   :  { %1315 = vsyncpa [#allocation3], 1 }
 0x17f   :  { %1317 = vsyncpa [#allocation3 + $0x1], 1 }
 0x180   :  { %1318 = vsyncpa [#allocation5], 1 }
 0x181   :  { %1320 = vsyncpa [#allocation5 + $0x1], 1 }

// kernel: _forward_impl.4
= control target key start
LH: loop header
LB: loop body
LE: loop exit
PB: predicated region body
PF: predicated region fallthrough
CT: control target
= control target key end

     0   :  { %s4377_s15 = smov 0   ;;  %s4379_s16 = smov 0   ;;  %s5263_s0 = inlined_call_operand.vmem [shape: f32[2,18,18,8], index: 0, kind: input, shape index: {}]   ;;  %s5264_s1 = inlined_call_operand.vmem [shape: bf16[72,8], index: 1, kind: input, shape index: {}]   ;;  %s5265_s2 = inlined_call_operand.vmem [shape: f32[1,8], index: 2, kind: input, shape index: {}]   ;;  %s5266_s3 = inlined_call_operand.vmem [shape: f32[2,16,16,8], index: 3, kind: output, shape index: {0}]   ;;  %s5267_s4 = inlined_call_operand.vmem [shape: f32[2,18,18,8], index: 4, kind: output, shape index: {1}]  }
   0x1   :  { %s4381_s17 = smov 0  }
   0x2 LB: > { %s27_s18 = sadd.s32 1, %s4345_s16  ;;  %p3197_p0 = scmp.ge.s32.totalorder %s4349_s17, 1  ;;  %s4349_s17 = sphi %s4381_s17, %s15_s17   ;;  %s4345_s16 = sphi %s4379_s16, %s5269_s16   ;;  %s4341_s15 = sphi %s4377_s15, %s5268_s15  }
   0x3   : > { %p29_p1 = scmp.ge.s32.totalorder %s27_s18, 2  ;;  %p198_p2 = scmp.lt.s32.totalorder %s4349_s17, 3 }
   0x5   : > { %s5271_s18 = smov (%p29_p1, %s27_s18), 0  ;;  %p199_p3 = pnand %p3197_p0, %p198_p2 }
   0x6   : > { %v706_v0 = vld [vmem:[%s5264_s1 + $0x4] sm:$0xf] (!%p199_p3)  ;;  %vm756_vm0 = vcmask (!%p199_p3), 1043456   ;;  %v4401_v1 = vld [vmem:[%s5264_s1 + $0x10] sm:$0xf] (!%p199_p3)  ;;  %p242_p4 = scmp.lt.s32.totalorder (!%p199_p3), %s4341_s15, 1 }
   0x7   : > { %202 = sbr.rel (%p199_p3) target bundleno = 525 (0x20d), region = 32  ;;  %4291 = vmatprep.subr.msk.bf16.mxu1 (!%p199_p3), %vm756_vm0, %v706_v0  ;;  %4295 = vmatprep.subr.msk.bf16.mxu0 (!%p199_p3), %vm756_vm0, %v4401_v1  ;;  %v758_v2 = vsel (!%p199_p3), %vm756_vm0, %v706_v0, 0  ;;  %v4409_v3 = vsel (!%p199_p3), %vm756_vm0, %v4401_v1, 0  ;;  %v705_v4 = vld [vmem:[%s5264_s1] sm:$0xf] (!%p199_p3)  ;;  %vm707_vm1 = vcmask (!%p199_p3), 64512  }
   0x8   : > { %3728 = vmatpush3.bf16.msra.mxu1 (!%p199_p3), %v758_v2  ;;  %3864 = vmatpush3.bf16.msra.mxu0 (!%p199_p3), %v4409_v3  ;;  %v1868_v5 = vld [vmem:[%s5264_s1 + $0x14] sm:$0xf] (!%p199_p3)  ;;  %v970_v14 = vsel (!%p199_p3), %vm756_vm0, %v705_v4, 0  ;;  %v2113_v20 = vld [vmem:[%s5264_s1 + $0x18] sm:$0xf] (!%p199_p3)  ;;  %vm2953_vm2 = vcmask (!%p199_p3), 58368  }
   0x9   : > { %4292 = vmatprep.subr.msk.bf16.mxu1 (!%p199_p3), %vm756_vm0, %v705_v4  ;;  %4297 = vmatprep.subr.msk.bf16.mxu0 (!%p199_p3), %vm756_vm0, %v1868_v5  ;;  %v1918_v18 = vsel (!%p199_p3), %vm756_vm0, %v1868_v5, 0  ;;  %v4455_v21 = vld [vmem:[%s5264_s1 + $0x8] sm:$0xf] (!%p199_p3)  ;;  %v2163_v52 = vsel (!%p199_p3), %vm756_vm0, %v2113_v20, 0  ;;  %v4534_v53 = vld [vmem:[%s5264_s1 + $0x1c] sm:$0xf] (!%p199_p3) }
   0xe   : > { %s5273_s15 = smov (!%p242_p4, %s4341_s15), 1 }
   0xf   : > { %s4301_s27 = smul.u32 432, %s5273_s15  ;;  %s3573_s22 = sshll.u32 %s5273_s15, 8 }
  0x11   : > { %s4428_s30 = scalar_lea.vmem %s5263_s0, %s4301_s27  ;;  %s4955_s21 = scalar_lea.vmem %s5267_s4, %s4301_s27 }
  0x12   : > { %v319_v6 = vld [vmem:[%s4428_s30 + $0x1] sm:$0xff]  ;;  %v320_v7 = vld [vmem:[%s4428_s30 + $0x9] sm:$0xff]  ;;  %v3234_v8 = vld [vmem:[%s4428_s30 + $0x19] sm:$0xff]  ;;  %s5086_s27 = scalar_lea.vmem %s5266_s3, %s3573_s22 }
  0x13   : > { %v351_v9 = vpack.c.bf16 %v320_v7, %v319_v6  ;;  %v3235_v10 = vld [vmem:[%s4428_s30 + $0x21] sm:$0xff]  ;;  %v3236_v11 = vld [vmem:[%s4428_s30 + $0x31] sm:$0xff]  ;;  %v3237_v12 = vld [vmem:[%s4428_s30 + $0x39] sm:$0xff] }
  0x14   : > { %v496_v13 = vpack.c.bf16 %v3235_v10, %v3234_v8  ;;  %v4437_v15 = vpack.c.bf16 %v3237_v12, %v3236_v11  ;;  %v3238_v16 = vld [vmem:[%s4428_s30 + $0x49] sm:$0xff]  ;;  %v3239_v17 = vld [vmem:[%s4428_s30 + $0x51] sm:$0xff]  ;;  %v3240_v22 = vld [vmem:[%s4428_s30 + $0x61] sm:$0xff] }
  0x15   : > { %3729 = vmatprep.mubr.msk.bf16.mxu1 %vm707_vm1, %v351_v9  ;;  %v4443_v19 = vpack.c.bf16 %v3239_v17, %v3238_v16  ;;  %v3241_v23 = vld [vmem:[%s4428_s30 + $0x69] sm:$0xff]  ;;  %v3242_v24 = vld [vmem:[%s4428_s30 + $0x79] sm:$0xff]  ;;  %v3243_v25 = vld [vmem:[%s4428_s30 + $0x81] sm:$0xff] }
  0x16   : > { %3865 = vmatprep.mubr.msk.bf16.mxu0 %vm707_vm1, %v496_v13  ;;  %3730 = vmatmul.mubr.msk.bf16.vlgmr.msra.gmra.mrb[0].mxu1 %vm707_vm1, %v496_v13  ;;  %v4468_v26 = vpack.c.bf16 %v3241_v23, %v3240_v22  ;;  %v4470_v27 = vpack.c.bf16 %v3243_v25, %v3242_v24  ;;  %v3244_v28 = vld [vmem:[%s4428_s30 + $0x91] sm:$0xff]  ;;  %v3245_v29 = vld [vmem:[%s4428_s30 + $0x99] sm:$0xff]  ;;  %v3246_v30 = vld [vmem:[%s4428_s30 + $0xa9] sm:$0xff] }
  0x17   : > { %3762 = vmatpush3.bf16.msra.mxu1 %v970_v14  ;;  %3866 = vmatmul.mubr.msk.bf16.vlgmr.msra.gmra.mrb[0].mxu0 %vm707_vm1, %v4437_v15  ;;  %v3247_v31 = vld [vmem:[%s4428_s30 + $0xb1] sm:$0xff]  ;;  %v4484_v32 = vpack.c.bf16 %v3245_v29, %v3244_v28  ;;  %v3248_v34 = vld [vmem:[%s4428_s30 + $0xc1] sm:$0xff]  ;;  %v3249_v35 = vld [vmem:[%s4428_s30 + $0xc9] sm:$0xff] }
  0x18   : > { %3898 = vmatpush3.bf16.msra.mxu0 %v1918_v18  ;;  %3733 = vmatprep.mubr.msk.bf16.mxu1 %vm707_vm1, %v4437_v15  ;;  %v4486_v33 = vpack.c.bf16 %v3247_v31, %v3246_v30  ;;  %v3266_v36 = vld [vmem:[%s4428_s30 + $0x1a] sm:$0xff]  ;;  %v3267_v37 = vld [vmem:[%s4428_s30 + $0x22] sm:$0xff]  ;;  %v4500_v38 = vpack.c.bf16 %v3249_v35, %v3248_v34  ;;  %v3268_v42 = vld [vmem:[%s4428_s30 + $0x32] sm:$0xff] }
  0x19   : > { %3869 = vmatprep.mubr.msk.bf16.mxu0 %vm707_vm1, %v4443_v19  ;;  %4298 = vmatprep.subr.msk.bf16.mxu0 %vm756_vm0, %v2113_v20  ;;  %v4502_v39 = vpack.c.bf16 %v3267_v37, %v3266_v36  ;;  %v337_v40 = vld [vmem:[%s4428_s30 + $0xd9] sm:$0xff]  ;;  %v338_v41 = vld [vmem:[%s4428_s30 + $0xe1] sm:$0xff]  ;;  %v339_v44 = vld [vmem:[%s4428_s30 + $0xf1] sm:$0xff] }
  0x1a   : > { %4293 = vmatprep.subr.msk.bf16.mxu1 %vm756_vm0, %v4455_v21  ;;  %v3269_v43 = vld [vmem:[%s4428_s30 + $0x3a] sm:$0xff]  ;;  %v3270_v46 = vld [vmem:[%s4428_s30 + $0x4a] sm:$0xff]  ;;  %v3271_v47 = vld [vmem:[%s4428_s30 + $0x52] sm:$0xff]  ;;  %v4520_v48 = vpack.c.bf16 %v338_v41, %v337_v40 }
  0x1b   : > { %v340_v45 = vld [vmem:[%s4428_s30 + $0xf9] sm:$0xff]  ;;  %v4522_v49 = vpack.c.bf16 %v3269_v43, %v3268_v42  ;;  %v4526_v51 = vpack.c.bf16 %v3271_v47, %v3270_v46  ;;  %v341_v54 = vld [vmem:[%s4428_s30 + $0x109] sm:$0xff]  ;;  %v342_v55 = vld [vmem:[%s4428_s30 + $0x111] sm:$0xff]  ;;  %v1183_v47 = vsel %vm756_vm0, %v4455_v21, 0 }
  0x1c   : > { %v4524_v50 = vpack.c.bf16 %v340_v45, %v339_v44  ;;  %v3272_v56 = vld [vmem:[%s4428_s30 + $0x62] sm:$0xff]  ;;  %v3273_v57 = vld [vmem:[%s4428_s30 + $0x6a] sm:$0xff]  ;;  %v3274_v60 = vld [vmem:[%s4428_s30 + $0x7a] sm:$0xff]  ;;  %v4552_v62 = vpack.c.bf16 %v342_v55, %v341_v54 }
  0x1d   : > { %v343_v58 = vld [vmem:[%s4428_s30 + $0x121] sm:$0xff]  ;;  %v344_v59 = vld [vmem:[%s4428_s30 + $0x129] sm:$0xff]  ;;  %v4554_v63 = vpack.c.bf16 %v3273_v57, %v3272_v56  ;;  %v345_v4 = vld [vmem:[%s4428_s30 + $0x139] sm:$0xff] }
  0x1e   : > { %3734 = vmatmul.mubr.msk.bf16.gmra.mrb[4].mxu1 %vm707_vm1, %v4443_v19  ;;  %v3275_v61 = vld [vmem:[%s4428_s30 + $0x82] sm:$0xff]  ;;  %v4556_v0 = vpack.c.bf16 %v344_v59, %v343_v58  ;;  %v3276_v6 = vld [vmem:[%s4428_s30 + $0x92] sm:$0xff]  ;;  %v3277_v7 = vld [vmem:[%s4428_s30 + $0x9a] sm:$0xff] }
  0x1f   : > { %3870 = vmatmul.mubr.msk.bf16.gmra.mrb[4].mxu0 %vm707_vm1, %v4468_v26  ;;  %3737 = vmatprep.mubr.msk.bf16.mxu1 %vm707_vm1, %v4468_v26  ;;  %v4558_v2 = vpack.c.bf16 %v3275_v61, %v3274_v60  ;;  %v346_v5 = vld [vmem:[%s4428_s30 + $0x141] sm:$0xff]  ;;  %v347_v8 = vld [vmem:[%s4428_s30 + $0x151] sm:$0xff]  ;;  %v348_v9 = vld [vmem:[%s4428_s30 + $0x159] sm:$0xff]  ;;  %v4578_v13 = vpack.c.bf16 %v3277_v7, %v3276_v6 }
  0x20   : > { %3873 = vmatprep.mubr.msk.bf16.mxu0 %vm707_vm1, %v4470_v27  ;;  %v3278_v10 = vld [vmem:[%s4428_s30 + $0xaa] sm:$0xff]  ;;  %v3279_v11 = vld [vmem:[%s4428_s30 + $0xb2] sm:$0xff]  ;;  %v4576_v12 = vpack.c.bf16 %v346_v5, %v345_v4  ;;  %v4580_v14 = vpack.c.bf16 %v348_v9, %v347_v8  ;;  %v3280_v20 = vld [vmem:[%s4428_s30 + $0xc2] sm:$0xff] }
  0x21   : > { %v4582_v16 = vpack.c.bf16 %v3279_v11, %v3278_v10  ;;  %v349_v17 = vld [vmem:[%s4428_s30 + $0x169] sm:$0xff]  ;;  %v350_v18 = vld [vmem:[%s4428_s30 + $0x171] sm:$0xff]  ;;  %v271_v23 = vld [vmem:[%s4428_s30] sm:$0xff] }
  0x22   : > { %v3281_v22 = vld [vmem:[%s4428_s30 + $0xca] sm:$0xff]  ;;  %v3282_v25 = vld [vmem:[%s4428_s30 + $0xda] sm:$0xff]  ;;  %v3283_v28 = vld [vmem:[%s4428_s30 + $0xe2] sm:$0xff]  ;;  %v4600_v29 = vpack.c.bf16 %v350_v18, %v349_v17 }
  0x23   : > { %v272_v24 = vld [vmem:[%s4428_s30 + $0x8] sm:$0xff]  ;;  %v4602_v30 = vpack.c.bf16 %v3281_v22, %v3280_v20  ;;  %v4604_v34 = vpack.c.bf16 %v3283_v28, %v3282_v25  ;;  %v273_v35 = vld [vmem:[%s4428_s30 + $0x18] sm:$0xff]  ;;  %v274_v36 = vld [vmem:[%s4428_s30 + $0x20] sm:$0xff] }
  0x24   : > { %v303_v31 = vpack.c.bf16 %v272_v24, %v271_v23  ;;  %v3284_v37 = vld [vmem:[%s4428_s30 + $0xf2] sm:$0xff]  ;;  %v3285_v40 = vld [vmem:[%s4428_s30 + $0xfa] sm:$0xff]  ;;  %v3286_v43 = vld [vmem:[%s4428_s30 + $0x10a] sm:$0xff]  ;;  %v4621_v45 = vpack.c.bf16 %v274_v36, %v273_v35 }
  0x25   : > { %v275_v41 = vld [vmem:[%s4428_s30 + $0x30] sm:$0xff]  ;;  %v276_v42 = vld [vmem:[%s4428_s30 + $0x38] sm:$0xff]  ;;  %v4623_v46 = vpack.c.bf16 %v3285_v40, %v3284_v37  ;;  %v4636_v55 = vld [vmem:[%s5264_s1 + $0xc] sm:$0xf] }
  0x26   : > { %3738 = vmatmul.mubr.msk.bf16.gmra.mrb[8].mxu1 %vm707_vm1, %v4470_v27  ;;  %v3287_v44 = vld [vmem:[%s4428_s30 + $0x112] sm:$0xff]  ;;  %v277_v56 = vld [vmem:[%s4428_s30 + $0x48] sm:$0xff]  ;;  %v279_v59 = vld [vmem:[%s4428_s30 + $0x60] sm:$0xff] }
  0x27   : > { %3874 = vmatmul.mubr.msk.bf16.gmra.mrb[8].mxu0 %vm707_vm1, %v4484_v32  ;;  %3741 = vmatprep.mubr.msk.bf16.mxu1 %vm707_vm1, %v4484_v32  ;;  %v4629_v54 = vpack.c.bf16 %v3287_v44, %v3286_v43  ;;  %v278_v57 = vld [vmem:[%s4428_s30 + $0x50] sm:$0xff]  ;;  %v3288_v21 = vld [vmem:[%s4428_s30 + $0x122] sm:$0xff]  ;;  %v3290_v61 = vld [vmem:[%s4428_s30 + $0x13a] sm:$0xff] }
  0x28   : > { %3877 = vmatprep.mubr.msk.bf16.mxu0 %vm707_vm1, %v4486_v33  ;;  %v3289_v58 = vld [vmem:[%s4428_s30 + $0x12a] sm:$0xff]  ;;  %v3291_v4 = vld [vmem:[%s4428_s30 + $0x142] sm:$0xff]  ;;  %v4654_v5 = vpack.c.bf16 %v278_v57, %v277_v56  ;;  %v281_v9 = vld [vmem:[%s4428_s30 + $0x78] sm:$0xff] }
  0x29   : > { %v280_v60 = vld [vmem:[%s4428_s30 + $0x68] sm:$0xff]  ;;  %v4656_v6 = vpack.c.bf16 %v3289_v58, %v3288_v21  ;;  %v4660_v8 = vpack.c.bf16 %v3291_v4, %v3290_v61  ;;  %v282_v10 = vld [vmem:[%s4428_s30 + $0x80] sm:$0xff]  ;;  %v3292_v11 = vld [vmem:[%s4428_s30 + $0x152] sm:$0xff]  ;;  %v2408_v61 = vsel %vm756_vm0, %v4534_v53, 0 }
  0x2a   : > { %v4658_v7 = vpack.c.bf16 %v280_v60, %v279_v59  ;;  %v3293_v17 = vld [vmem:[%s4428_s30 + $0x15a] sm:$0xff]  ;;  %v283_v18 = vld [vmem:[%s4428_s30 + $0x90] sm:$0xff]  ;;  %v4678_v24 = vpack.c.bf16 %v282_v10, %v281_v9  ;;  %v285_v35 = vld [vmem:[%s4428_s30 + $0xa8] sm:$0xff] }
  0x2b   : > { %v284_v20 = vld [vmem:[%s4428_s30 + $0x98] sm:$0xff]  ;;  %v3294_v22 = vld [vmem:[%s4428_s30 + $0x16a] sm:$0xff]  ;;  %v4680_v25 = vpack.c.bf16 %v3293_v17, %v3292_v11  ;;  %v3296_v37 = vld [vmem:[%s4428_s30 + $0x182] sm:$0xff] }
  0x2c   : > { %v3295_v23 = vld [vmem:[%s4428_s30 + $0x172] sm:$0xff]  ;;  %v4682_v28 = vpack.c.bf16 %v284_v20, %v283_v18  ;;  %v3297_v40 = vld [vmem:[%s4428_s30 + $0x18a] sm:$0xff]  ;;  %v290_v57 = vld [vmem:[%s4428_s30 + $0xe0] sm:$0xff] }
  0x2d   : > { %v286_v36 = vld [vmem:[%s4428_s30 + $0xb0] sm:$0xff]  ;;  %v4702_v44 = vpack.c.bf16 %v3297_v40, %v3296_v37  ;;  %v289_v56 = vld [vmem:[%s4428_s30 + $0xd8] sm:$0xff]  ;;  %v2603_v4 = vld [vmem:[%s5264_s1 + $0x20] sm:$0xf] }
  0x2e   : > { %3742 = vmatmul.mubr.msk.bf16.gmra.mrb[12].mxu1 %vm707_vm1, %v4486_v33  ;;  %v4700_v43 = vpack.c.bf16 %v286_v36, %v285_v35  ;;  %v291_v21 = vld [vmem:[%s4428_s30 + $0xf0] sm:$0xff]  ;;  %v292_v58 = vld [vmem:[%s4428_s30 + $0xf8] sm:$0xff]  ;;  %v4718_v59 = vpack.c.bf16 %v290_v57, %v289_v56  ;;  %v293_v9 = vld [vmem:[%s4428_s30 + $0x108] sm:$0xff] }
  0x2f   : > { %3878 = vmatmul.mubr.msk.bf16.gmra.mrb[12].mxu0 %vm707_vm1, %v4500_v38  ;;  %3745 = vmatprep.mubr.msk.bf16.mxu1 %vm707_vm1, %v4500_v38  ;;  %v4720_v60 = vpack.c.bf16 %v292_v58, %v291_v21  ;;  %v294_v10 = vld [vmem:[%s4428_s30 + $0x110] sm:$0xff]  ;;  %v296_v11 = vld [vmem:[%s4428_s30 + $0x128] sm:$0xff]  ;;  %v297_v20 = vld [vmem:[%s4428_s30 + $0x138] sm:$0xff]  ;;  %v1428_v58 = vsel %vm756_vm0, %v4636_v55, 0 }
  0x30   : > { %3899 = vmatprep.mubr.msk.bf16.mxu0 %vm707_vm1, %v4502_v39  ;;  %v4740_v17 = vpack.c.bf16 %v294_v10, %v293_v9  ;;  %v300_v35 = vld [vmem:[%s4428_s30 + $0x158] sm:$0xff]  ;;  %v301_v40 = vld [vmem:[%s4428_s30 + $0x168] sm:$0xff]  ;;  %v3329_v9 = vld [vmem:[%s4428_s30 + $0x1a0] sm:$0xff] }
  0x31   : > { %v368_v56 = vld [vmem:[%s4428_s30 + $0xa] sm:$0xff] }
  0x36   : > { %3746 = vmatmul.mubr.msk.bf16.gmra.mrb[16].mxu1 %vm707_vm1, %v4520_v48 }
  0x37   : > { %3900 = vmatmul.mubr.msk.bf16.vlgmr.msra.gmra.mrb[0].mxu0 %vm707_vm1, %v4522_v49  ;;  %3749 = vmatprep.mubr.msk.bf16.mxu1 %vm707_vm1, %v4524_v50 }
  0x38   : > { %3932 = vmatpush3.bf16.msra.mxu0 %v2163_v52  ;;  %3903 = vmatprep.mubr.msk.bf16.mxu0 %vm707_vm1, %v4526_v51  ;;  %v4627_v52 = vpack.c.bf16 %v276_v42, %v275_v41  ;;  %v287_v41 = vld [vmem:[%s4428_s30 + $0xc0] sm:$0xff]  ;;  %v288_v42 = vld [vmem:[%s4428_s30 + $0xc8] sm:$0xff] }
  0x39   : > { %4299 = vmatprep.subr.msk.bf16.mxu0 %vm756_vm0, %v4534_v53  ;;  %v295_v53 = vld [vmem:[%s4428_s30 + $0x120] sm:$0xff] }
  0x3a   : > { %v4742_v18 = vpack.c.bf16 %v296_v11, %v295_v53  ;;  %v2653_v53 = vsel %vm756_vm0, %v2603_v4, 0 }
  0x3e   : > { %3750 = vmatmul.mubr.msk.bf16.gmra.mrb[20].mxu1 %vm707_vm1, %v4552_v62 }
  0x3f   : > { %3904 = vmatmul.mubr.msk.bf16.gmra.mrb[4].mxu0 %vm707_vm1, %v4554_v63  ;;  %3753 = vmatprep.mubr.msk.bf16.mxu1 %vm707_vm1, %v4556_v0 }
  0x40   : > { %3907 = vmatprep.mubr.msk.bf16.mxu0 %vm707_vm1, %v4558_v2 }
  0x46   : > { %3754 = vmatmul.mubr.msk.bf16.gmra.mrb[24].mxu1 %vm707_vm1, %v4576_v12 }
  0x47   : > { %3908 = vmatmul.mubr.msk.bf16.gmra.mrb[8].mxu0 %vm707_vm1, %v4578_v13  ;;  %3757 = vmatprep.mubr.msk.bf16.mxu1 %vm707_vm1, %v4580_v14 }
  0x48   : > { %3911 = vmatprep.mubr.msk.bf16.mxu0 %vm707_vm1, %v4582_v16 }
  0x4e   : > { %3758 = vmatmul.mubr.msk.bf16.gmra.mrb[28].mxu1 %vm707_vm1, %v4600_v29 }
  0x4f   : > { %3912 = vmatmul.mubr.msk.bf16.gmra.mrb[12].mxu0 %vm707_vm1, %v4602_v30  ;;  %3763 = vmatprep.mubr.msk.bf16.mxu1 %vm707_vm1, %v303_v31  ;;  %v4684_v31 = vpack.c.bf16 %v3295_v23, %v3294_v22  ;;  %v298_v22 = vld [vmem:[%s4428_s30 + $0x140] sm:$0xff]  ;;  %v299_v23 = vld [vmem:[%s4428_s30 + $0x150] sm:$0xff] }
  0x50   : > { %3915 = vmatprep.mubr.msk.bf16.mxu0 %vm707_vm1, %v4604_v34  ;;  %v4756_v36 = vpack.c.bf16 %v298_v22, %v297_v20  ;;  %v4758_v37 = vpack.c.bf16 %v300_v35, %v299_v23 }
  0x56   : > { %3764 = vmatmul.mubr.msk.bf16.vlgmr.msra.gmra.mrb[0].mxu1 %vm707_vm1, %v4621_v45 }
  0x57   : > { %3796 = vmatpush3.bf16.msra.mxu1 %v1183_v47  ;;  %3916 = vmatmul.mubr.msk.bf16.gmra.mrb[16].mxu0 %vm707_vm1, %v4623_v46  ;;  %v4704_v47 = vpack.c.bf16 %v288_v42, %v287_v41  ;;  %v302_v41 = vld [vmem:[%s4428_s30 + $0x170] sm:$0xff]  ;;  %v367_v42 = vld [vmem:[%s4428_s30 + $0x2] sm:$0xff] }
  0x58   : > { %3767 = vmatprep.mubr.msk.bf16.mxu1 %vm707_vm1, %v4627_v52  ;;  %3919 = vmatprep.mubr.msk.bf16.mxu0 %vm707_vm1, %v4629_v54  ;;  %v4772_v57 = vpack.c.bf16 %v302_v41, %v301_v40  ;;  %v399_v21 = vpack.c.bf16 %v368_v56, %v367_v42 }
  0x59   : > { %4294 = vmatprep.subr.msk.bf16.mxu1 %vm756_vm0, %v4636_v55  ;;  %v3327_v55 = vld [vmem:[%s4428_s30 + $0x188] sm:$0xff] }
  0x5e   : > { %3768 = vmatmul.mubr.msk.bf16.gmra.mrb[4].mxu1 %vm707_vm1, %v4654_v5 }
  0x5f   : > { %3920 = vmatmul.mubr.msk.bf16.gmra.mrb[20].mxu0 %vm707_vm1, %v4656_v6  ;;  %3771 = vmatprep.mubr.msk.bf16.mxu1 %vm707_vm1, %v4658_v7 }
  0x60   : > { %3923 = vmatprep.mubr.msk.bf16.mxu0 %vm707_vm1, %v4660_v8 }
  0x66   : > { %3772 = vmatmul.mubr.msk.bf16.gmra.mrb[8].mxu1 %vm707_vm1, %v4678_v24 }
  0x67   : > { %3924 = vmatmul.mubr.msk.bf16.gmra.mrb[24].mxu0 %vm707_vm1, %v4680_v25  ;;  %3775 = vmatprep.mubr.msk.bf16.mxu1 %vm707_vm1, %v4682_v28 }
  0x68   : > { %3927 = vmatprep.mubr.msk.bf16.mxu0 %vm707_vm1, %v4684_v31 }
  0x6e   : > { %3776 = vmatmul.mubr.msk.bf16.gmra.mrb[12].mxu1 %vm707_vm1, %v4700_v43 }
  0x6f   : > { %3928 = vmatmul.mubr.msk.bf16.gmra.mrb[28].mxu0 %vm707_vm1, %v4702_v44  ;;  %3779 = vmatprep.mubr.msk.bf16.mxu1 %vm707_vm1, %v4704_v47 }
  0x70   : > { %3933 = vmatprep.mubr.msk.bf16.mxu0 %vm707_vm1, %v4627_v52 }
  0x76   : > { %3780 = vmatmul.mubr.msk.bf16.gmra.mrb[16].mxu1 %vm707_vm1, %v4718_v59 }
  0x77   : > { %3934 = vmatmul.mubr.msk.bf16.vlgmr.msra.gmra.mrb[0].mxu0 %vm707_vm1, %v4654_v5  ;;  %3783 = vmatprep.mubr.msk.bf16.mxu1 %vm707_vm1, %v4720_v60 }
  0x78   : > { %3966 = vmatpush3.bf16.msra.mxu0 %v2408_v61  ;;  %3937 = vmatprep.mubr.msk.bf16.mxu0 %vm707_vm1, %v4658_v7 }
  0x79   : > { %4300 = vmatprep.subr.msk.bf16.mxu0 %vm756_vm0, %v2603_v4 }
  0x7e   : > { %3784 = vmatmul.mubr.msk.bf16.gmra.mrb[20].mxu1 %vm707_vm1, %v4740_v17 }
  0x7f   : > { %3938 = vmatmul.mubr.msk.bf16.gmra.mrb[4].mxu0 %vm707_vm1, %v4678_v24  ;;  %3787 = vmatprep.mubr.msk.bf16.mxu1 %vm707_vm1, %v4742_v18 }
  0x80   : > { %3941 = vmatprep.mubr.msk.bf16.mxu0 %vm707_vm1, %v4682_v28 }
  0x86   : > { %3788 = vmatmul.mubr.msk.bf16.gmra.mrb[24].mxu1 %vm707_vm1, %v4756_v36 }
  0x87   : > { %3942 = vmatmul.mubr.msk.bf16.gmra.mrb[8].mxu0 %vm707_vm1, %v4700_v43  ;;  %3791 = vmatprep.mubr.msk.bf16.mxu1 %vm707_vm1, %v4758_v37 }
  0x88   : > { %3945 = vmatprep.mubr.msk.bf16.mxu0 %vm707_vm1, %v4704_v47 }
  0x8e   : > { %3792 = vmatmul.mubr.msk.bf16.gmra.mrb[28].mxu1 %vm707_vm1, %v4772_v57 }
  0x8f   : > { %3946 = vmatmul.mubr.msk.bf16.gmra.mrb[12].mxu0 %vm707_vm1, %v4718_v59  ;;  %3797 = vmatprep.mubr.msk.bf16.mxu1 %vm707_vm1, %v399_v21 }
  0x90   : > { %3949 = vmatprep.mubr.msk.bf16.mxu0 %vm707_vm1, %v4720_v60 }
  0x96   : > { %3798 = vmatmul.mubr.msk.bf16.vlgmr.msra.gmra.mrb[0].mxu1 %vm707_vm1, %v4502_v39  ;;  %v3326_v39 = vld [vmem:[%s4428_s30 + $0x180] sm:$0xff] }
  0x97   : > { %3830 = vmatpush3.bf16.msra.mxu1 %v1428_v58  ;;  %3950 = vmatmul.mubr.msk.bf16.gmra.mrb[16].mxu0 %vm707_vm1, %v4740_v17  ;;  %v4803_v61 = vpack.c.bf16 %v3327_v55, %v3326_v39 }
  0x98   : > { %3801 = vmatprep.mubr.msk.bf16.mxu1 %vm707_vm1, %v4522_v49  ;;  %3953 = vmatprep.mubr.msk.bf16.mxu0 %vm707_vm1, %v4742_v18 }
  0x99   : > { %4296 = vmatprep.subr.msk.bf16.mxu1 %vm756_vm0, %v4401_v1  ;;  %v3328_v1 = vld [vmem:[%s4428_s30 + $0x198] sm:$0xff] }
  0x9a   : > { %v608_v10 = vpack.c.bf16 %v3329_v9, %v3328_v1 }
  0x9e   : > { %3802 = vmatmul.mubr.msk.bf16.gmra.mrb[4].mxu1 %vm707_vm1, %v4526_v51 }
  0x9f   : > { %3954 = vmatmul.mubr.msk.bf16.gmra.mrb[20].mxu0 %vm707_vm1, %v4756_v36  ;;  %3805 = vmatprep.mubr.msk.bf16.mxu1 %vm707_vm1, %v4554_v63 }
  0xa0   : > { %3957 = vmatprep.mubr.msk.bf16.mxu0 %vm707_vm1, %v4758_v37 }
  0xa6   : > { %3806 = vmatmul.mubr.msk.bf16.gmra.mrb[8].mxu1 %vm707_vm1, %v4558_v2 }
  0xa7   : > { %3958 = vmatmul.mubr.msk.bf16.gmra.mrb[24].mxu0 %vm707_vm1, %v4772_v57  ;;  %3809 = vmatprep.mubr.msk.bf16.mxu1 %vm707_vm1, %v4578_v13 }
  0xa8   : > { %3961 = vmatprep.mubr.msk.bf16.mxu0 %vm707_vm1, %v4803_v61 }
  0xae   : > { %3810 = vmatmul.mubr.msk.bf16.gmra.mrb[12].mxu1 %vm707_vm1, %v4582_v16 }
  0xaf   : > { %3962 = vmatmul.mubr.msk.bf16.gmra.mrb[28].mxu0 %vm707_vm1, %v608_v10  ;;  %3813 = vmatprep.mubr.msk.bf16.mxu1 %vm707_vm1, %v4602_v30 }
  0xb0   : > { %3967 = vmatprep.mubr.msk.bf16.mxu0 %vm707_vm1, %v4437_v15  ;;  %v3359_v15 = vld [vmem:[%s4428_s30 + $0x189] sm:$0xff] }
  0xb6   : > { %3814 = vmatmul.mubr.msk.bf16.gmra.mrb[16].mxu1 %vm707_vm1, %v4604_v34 }
  0xb7   : > { %3968 = vmatmul.mubr.msk.bf16.vlgmr.msra.gmra.mrb[0].mxu0 %vm707_vm1, %v4443_v19  ;;  %3817 = vmatprep.mubr.msk.bf16.mxu1 %vm707_vm1, %v4623_v46 }
  0xb8   : > { %4000 = vmatpush3.bf16.msra.mxu0 %v2653_v53  ;;  %3971 = vmatprep.mubr.msk.bf16.mxu0 %vm707_vm1, %v4468_v26  ;;  %v3360_v26 = vld [vmem:[%s4428_s30 + $0x199] sm:$0xff] }
  0xbe   : > { %3818 = vmatmul.mubr.msk.bf16.gmra.mrb[20].mxu1 %vm707_vm1, %v4629_v54 }
  0xbf   : > { %3972 = vmatmul.mubr.msk.bf16.gmra.mrb[4].mxu0 %vm707_vm1, %v4470_v27  ;;  %3821 = vmatprep.mubr.msk.bf16.mxu1 %vm707_vm1, %v4656_v6  ;;  %v3361_v27 = vld [vmem:[%s4428_s30 + $0x1a1] sm:$0xff] }
  0xc0   : > { %3975 = vmatprep.mubr.msk.bf16.mxu0 %vm707_vm1, %v4484_v32  ;;  %v656_v32 = vpack.c.bf16 %v3361_v27, %v3360_v26 }
  0xc6   : > { %3822 = vmatmul.mubr.msk.bf16.gmra.mrb[24].mxu1 %vm707_vm1, %v4660_v8 }
  0xc7   : > { %3976 = vmatmul.mubr.msk.bf16.gmra.mrb[8].mxu0 %vm707_vm1, %v4486_v33  ;;  %3825 = vmatprep.mubr.msk.bf16.mxu1 %vm707_vm1, %v4680_v25  ;;  %v3392_v33 = vld [vmem:[%s4428_s30 + $0x19a] sm:$0xff] }
  0xc8   : > { %3979 = vmatprep.mubr.msk.bf16.mxu0 %vm707_vm1, %v4500_v38  ;;  %v3393_v38 = vld [vmem:[%s4428_s30 + $0x1a2] sm:$0xff] }
  0xce   : > { %3826 = vmatmul.mubr.msk.bf16.gmra.mrb[28].mxu1 %vm707_vm1, %v4684_v31 }
  0xcf   : > { %3980 = vmatmul.mubr.msk.bf16.gmra.mrb[12].mxu0 %vm707_vm1, %v4520_v48  ;;  %3831 = vmatprep.mubr.msk.bf16.mxu1 %vm707_vm1, %v4621_v45 }
  0xd0   : > { %3983 = vmatprep.mubr.msk.bf16.mxu0 %vm707_vm1, %v4524_v50 }
  0xd6   : > { %3832 = vmatmul.mubr.msk.bf16.vlgmr.msra.gmra.mrb[0].mxu1 %vm707_vm1, %v4627_v52 }
  0xd7   : > { %4034 = vmatpush3.bf16.msra.mxu1 %v4409_v3  ;;  %3984 = vmatmul.mubr.msk.bf16.gmra.mrb[16].mxu0 %vm707_vm1, %v4552_v62  ;;  %v3358_v3 = vld [vmem:[%s4428_s30 + $0x181] sm:$0xff] }
  0xd8   : > { %3835 = vmatprep.mubr.msk.bf16.mxu1 %vm707_vm1, %v4654_v5  ;;  %3987 = vmatprep.mubr.msk.bf16.mxu0 %vm707_vm1, %v4556_v0  ;;  %v655_v19 = vpack.c.bf16 %v3359_v15, %v3358_v3  ;;  %v5081_v5 = vld [vmem:[%s5265_s2] ss:$0 sm:$0xff] }
  0xde   : > { %3836 = vmatmul.mubr.msk.bf16.gmra.mrb[4].mxu1 %vm707_vm1, %v4658_v7 }
  0xdf   : > { %3988 = vmatmul.mubr.msk.bf16.gmra.mrb[20].mxu0 %vm707_vm1, %v4576_v12  ;;  %3839 = vmatprep.mubr.msk.bf16.mxu1 %vm707_vm1, %v4678_v24 }
  0xe0   : > { %3991 = vmatprep.mubr.msk.bf16.mxu0 %vm707_vm1, %v4580_v14 }
  0xe6   : > { %3840 = vmatmul.mubr.msk.bf16.gmra.mrb[8].mxu1 %vm707_vm1, %v4682_v28 }
  0xe7   : > { %3992 = vmatmul.mubr.msk.bf16.gmra.mrb[24].mxu0 %vm707_vm1, %v4600_v29  ;;  %3843 = vmatprep.mubr.msk.bf16.mxu1 %vm707_vm1, %v4700_v43 }
  0xe8   : > { %3995 = vmatprep.mubr.msk.bf16.mxu0 %vm707_vm1, %v655_v19 }
  0xee   : > { %3844 = vmatmul.mubr.msk.bf16.gmra.mrb[12].mxu1 %vm707_vm1, %v4704_v47 }
  0xef   : > { %3996 = vmatmul.mubr.msk.bf16.gmra.mrb[28].mxu0 %vm707_vm1, %v656_v32  ;;  %3847 = vmatprep.mubr.msk.bf16.mxu1 %vm707_vm1, %v4718_v59 }
  0xf0   : > { %4001 = vmatprep.mubr.msk.bf16.mxu0 %vm707_vm1, %v4522_v49  ;;  %v4351_v49 = vmov 0.0  }
  0xf1   : > { %2958 = vst.msk [vmem:[%s4955_s21 + $0x30] sm:$0xff] %vm707_vm1, %v4351_v49  ;;  %2959 = vst.msk [vmem:[%s4955_s21 + $0x38] sm:$0xff] %vm707_vm1, %v4351_v49 }
  0xf2   : > { %2951 = vst.msk [vmem:[%s4955_s21] sm:$0xff] %vm707_vm1, %v4351_v49  ;;  %2952 = vst.msk [vmem:[%s4955_s21 + $0x8] sm:$0xff] %vm707_vm1, %v4351_v49 }
  0xf3   : > { %2955 = vst.msk [vmem:[%s4955_s21 + $0x18] sm:$0xff] %vm707_vm1, %v4351_v49  ;;  %2956 = vst.msk [vmem:[%s4955_s21 + $0x20] sm:$0xff] %vm707_vm1, %v4351_v49 }
  0xf4   : > { %2961 = vst.msk [vmem:[%s4955_s21 + $0x48] sm:$0xff] %vm707_vm1, %v4351_v49  ;;  %2962 = vst.msk [vmem:[%s4955_s21 + $0x50] sm:$0xff] %vm707_vm1, %v4351_v49 }
  0xf5   : > { %2964 = vst.msk [vmem:[%s4955_s21 + $0x60] sm:$0xff] %vm707_vm1, %v4351_v49  ;;  %2965 = vst.msk [vmem:[%s4955_s21 + $0x68] sm:$0xff] %vm707_vm1, %v4351_v49 }
  0xf6   : > { %3848 = vmatmul.mubr.msk.bf16.gmra.mrb[16].mxu1 %vm707_vm1, %v4720_v60  ;;  %2967 = vst.msk [vmem:[%s4955_s21 + $0x78] sm:$0xff] %vm707_vm1, %v4351_v49  ;;  %2968 = vst.msk [vmem:[%s4955_s21 + $0x80] sm:$0xff] %vm707_vm1, %v4351_v49 }
  0xf7   : > { %4002 = vmatmul.mubr.msk.bf16.vlgmr.msra.gmra.mrb[0].mxu0 %vm707_vm1, %v4526_v51  ;;  %3851 = vmatprep.mubr.msk.bf16.mxu1 %vm707_vm1, %v4740_v17  ;;  %2970 = vst.msk [vmem:[%s4955_s21 + $0x90] sm:$0xff] %vm707_vm1, %v4351_v49  ;;  %2971 = vst.msk [vmem:[%s4955_s21 + $0x98] sm:$0xff] %vm707_vm1, %v4351_v49 }
  0xf8   : > { %4005 = vmatprep.mubr.msk.bf16.mxu0 %vm707_vm1, %v4554_v63  ;;  %2973 = vst.msk [vmem:[%s4955_s21 + $0xa8] sm:$0xff] %vm707_vm1, %v4351_v49  ;;  %2974 = vst.msk [vmem:[%s4955_s21 + $0xb0] sm:$0xff] %vm707_vm1, %v4351_v49 }
  0xf9   : > { %2976 = vst.msk [vmem:[%s4955_s21 + $0xc0] sm:$0xff] %vm707_vm1, %v4351_v49  ;;  %2977 = vst.msk [vmem:[%s4955_s21 + $0xc8] sm:$0xff] %vm707_vm1, %v4351_v49 }
  0xfa   : > { %2979 = vst.msk [vmem:[%s4955_s21 + $0xd8] sm:$0xff] %vm707_vm1, %v4351_v49  ;;  %2980 = vst.msk [vmem:[%s4955_s21 + $0xe0] sm:$0xff] %vm707_vm1, %v4351_v49 }
  0xfb   : > { %2982 = vst.msk [vmem:[%s4955_s21 + $0xf0] sm:$0xff] %vm707_vm1, %v4351_v49  ;;  %2983 = vst.msk [vmem:[%s4955_s21 + $0xf8] sm:$0xff] %vm707_vm1, %v4351_v49 }
  0xfc   : > { %2985 = vst.msk [vmem:[%s4955_s21 + $0x108] sm:$0xff] %vm707_vm1, %v4351_v49  ;;  %2986 = vst.msk [vmem:[%s4955_s21 + $0x110] sm:$0xff] %vm707_vm1, %v4351_v49 }
  0xfd   : > { %2988 = vst.msk [vmem:[%s4955_s21 + $0x120] sm:$0xff] %vm707_vm1, %v4351_v49  ;;  %2989 = vst.msk [vmem:[%s4955_s21 + $0x128] sm:$0xff] %vm707_vm1, %v4351_v49 }
  0xfe   : > { %3852 = vmatmul.mubr.msk.bf16.gmra.mrb[20].mxu1 %vm707_vm1, %v4742_v18  ;;  %2991 = vst.msk [vmem:[%s4955_s21 + $0x138] sm:$0xff] %vm707_vm1, %v4351_v49  ;;  %2992 = vst.msk [vmem:[%s4955_s21 + $0x140] sm:$0xff] %vm707_vm1, %v4351_v49 }
  0xff   : > { %4006 = vmatmul.mubr.msk.bf16.gmra.mrb[4].mxu0 %vm707_vm1, %v4558_v2  ;;  %3855 = vmatprep.mubr.msk.bf16.mxu1 %vm707_vm1, %v4756_v36  ;;  %2994 = vst.msk [vmem:[%s4955_s21 + $0x150] sm:$0xff] %vm707_vm1, %v4351_v49  ;;  %2995 = vst.msk [vmem:[%s4955_s21 + $0x158] sm:$0xff] %vm707_vm1, %v4351_v49 }
 0x100   : > { %4009 = vmatprep.mubr.msk.bf16.mxu0 %vm707_vm1, %v4578_v13  ;;  %2997 = vst.msk [vmem:[%s4955_s21 + $0x168] sm:$0xff] %vm707_vm1, %v4351_v49  ;;  %2998 = vst.msk [vmem:[%s4955_s21 + $0x170] sm:$0xff] %vm707_vm1, %v4351_v49 }
 0x101   : > { %3000 = vst.msk [vmem:[%s4955_s21 + $0x180] sm:$0xff] %vm707_vm1, %v4351_v49  ;;  %3001 = vst.msk [vmem:[%s4955_s21 + $0x188] sm:$0xff] %vm707_vm1, %v4351_v49 }
 0x102   : > { %3003 = vst.msk [vmem:[%s4955_s21 + $0x198] sm:$0xff] %vm707_vm1, %v4351_v49  ;;  %3004 = vst.msk [vmem:[%s4955_s21 + $0x1a0] sm:$0xff] %vm707_vm1, %v4351_v49 }
 0x103   : > { %2954 = vst.msk [vmem:[%s4955_s21 + $0x10] sm:$0x3] %vm2953_vm2, %v4351_v49  ;;  %2960 = vst.msk [vmem:[%s4955_s21 + $0x40] sm:$0x3] %vm2953_vm2, %v4351_v49 }
 0x104   : > { %3005 = vst.msk [vmem:[%s4955_s21 + $0x1a8] sm:$0x3] %vm2953_vm2, %v4351_v49  ;;  %2957 = vst.msk [vmem:[%s4955_s21 + $0x28] sm:$0x3] %vm2953_vm2, %v4351_v49 }
 0x105   : > { %2963 = vst.msk [vmem:[%s4955_s21 + $0x58] sm:$0x3] %vm2953_vm2, %v4351_v49  ;;  %2966 = vst.msk [vmem:[%s4955_s21 + $0x70] sm:$0x3] %vm2953_vm2, %v4351_v49 }
 0x106   : > { %3856 = vmatmul.mubr.msk.bf16.gmra.mrb[24].mxu1 %vm707_vm1, %v4758_v37  ;;  %2969 = vst.msk [vmem:[%s4955_s21 + $0x88] sm:$0x3] %vm2953_vm2, %v4351_v49  ;;  %2972 = vst.msk [vmem:[%s4955_s21 + $0xa0] sm:$0x3] %vm2953_vm2, %v4351_v49 }
 0x107   : > { %4010 = vmatmul.mubr.msk.bf16.gmra.mrb[8].mxu0 %vm707_vm1, %v4582_v16  ;;  %3859 = vmatprep.mubr.msk.bf16.mxu1 %vm707_vm1, %v4772_v57  ;;  %2975 = vst.msk [vmem:[%s4955_s21 + $0xb8] sm:$0x3] %vm2953_vm2, %v4351_v49  ;;  %2978 = vst.msk [vmem:[%s4955_s21 + $0xd0] sm:$0x3] %vm2953_vm2, %v4351_v49 }
 0x108   : > { %4013 = vmatprep.mubr.msk.bf16.mxu0 %vm707_vm1, %v4602_v30  ;;  %2981 = vst.msk [vmem:[%s4955_s21 + $0xe8] sm:$0x3] %vm2953_vm2, %v4351_v49  ;;  %2984 = vst.msk [vmem:[%s4955_s21 + $0x100] sm:$0x3] %vm2953_vm2, %v4351_v49 }
 0x109   : > { %2987 = vst.msk [vmem:[%s4955_s21 + $0x118] sm:$0x3] %vm2953_vm2, %v4351_v49  ;;  %2990 = vst.msk [vmem:[%s4955_s21 + $0x130] sm:$0x3] %vm2953_vm2, %v4351_v49 }
 0x10a   : > { %2993 = vst.msk [vmem:[%s4955_s21 + $0x148] sm:$0x3] %vm2953_vm2, %v4351_v49  ;;  %2996 = vst.msk [vmem:[%s4955_s21 + $0x160] sm:$0x3] %vm2953_vm2, %v4351_v49 }
 0x10b   : > { %2999 = vst.msk [vmem:[%s4955_s21 + $0x178] sm:$0x3] %vm2953_vm2, %v4351_v49  ;;  %3002 = vst.msk [vmem:[%s4955_s21 + $0x190] sm:$0x3] %vm2953_vm2, %v4351_v49 }
 0x10e   : > { %3860 = vmatmul.mubr.msk.bf16.gmra.mrb[28].mxu1 %vm707_vm1, %v4803_v61 }
 0x10f   : > { %4014 = vmatmul.mubr.msk.bf16.gmra.mrb[12].mxu0 %vm707_vm1, %v4604_v34  ;;  %3881 = vmatprep.mubr.msk.bf16.mxu1 %vm707_vm1, %v4520_v48  ;;  %v704_v48 = vpack.c.bf16 %v3393_v38, %v3392_v33 }
 0x110   : > { %4017 = vmatprep.mubr.msk.bf16.mxu0 %vm707_vm1, %v4623_v46 }
 0x116   : > { %3882 = vmatmul.mubr.msk.bf16.vlgmr.msra.gmra.mrb[16].mxu1 %vm707_vm1, %v4524_v50 }
 0x117   : > { %4018 = vmatmul.mubr.msk.bf16.gmra.mrb[16].mxu0 %vm707_vm1, %v4629_v54  ;;  %3885 = vmatprep.mubr.msk.bf16.mxu1 %vm707_vm1, %v4552_v62 }
 0x118   : > { %4021 = vmatprep.mubr.msk.bf16.mxu0 %vm707_vm1, %v4656_v6 }
 0x11e   : > { %3886 = vmatmul.mubr.msk.bf16.gmra.mrb[20].mxu1 %vm707_vm1, %v4556_v0 }
 0x11f   : > { %4022 = vmatmul.mubr.msk.bf16.gmra.mrb[20].mxu0 %vm707_vm1, %v4660_v8  ;;  %3889 = vmatprep.mubr.msk.bf16.mxu1 %vm707_vm1, %v4576_v12 }
 0x120   : > { %4025 = vmatprep.mubr.msk.bf16.mxu0 %vm707_vm1, %v4680_v25 }
 0x126   : > { %3890 = vmatmul.mubr.msk.bf16.gmra.mrb[24].mxu1 %vm707_vm1, %v4580_v14 }
 0x127   : > { %4026 = vmatmul.mubr.msk.bf16.gmra.mrb[24].mxu0 %vm707_vm1, %v4684_v31  ;;  %3893 = vmatprep.mubr.msk.bf16.mxu1 %vm707_vm1, %v4600_v29 }
 0x128   : > { %4029 = vmatprep.mubr.msk.bf16.mxu0 %vm707_vm1, %v4702_v44 }
 0x12e   : > { %3894 = vmatmul.mubr.msk.bf16.gmra.mrb[28].mxu1 %vm707_vm1, %v655_v19 }
 0x12f   : > { %4030 = vmatmul.mubr.msk.bf16.gmra.mrb[28].mxu0 %vm707_vm1, %v704_v48 }
 0x1a9   : > { %v3833_v50 = vpop.f32.mrb[0].mxu1 }
 0x1aa   : > { %v1464_v51 = vpop.f32.mrb[1].mxu1 }
 0x1ab   : > { %v3834_v62 = vpop.f32.mrb[2].mxu1 }
 0x1ac   : > { %v1467_v63 = vpop.f32.mrb[3].mxu1 }
 0x1b1   : > { %v3837_v0 = vpop.f32.mrb[4].mxu1 }
 0x1b2   : > { %v1480_v2 = vpop.f32.mrb[5].mxu1 }
 0x1b3   : > { %v3838_v12 = vpop.f32.mrb[6].mxu1 }
 0x1b4   : > { %v1483_v13 = vpop.f32.mrb[7].mxu1 }
 0x1b9   : > { %v3841_v14 = vpop.f32.mrb[8].mxu1 }
 0x1ba   : > { %v1496_v16 = vpop.f32.mrb[9].mxu1 }
 0x1bb   : > { %v5065_v29 = vpop.f32.mrb[10].mxu1 }
 0x1bc   : > { %v5067_v30 = vpop.f32.mrb[11].mxu1 }
 0x1c1   : > { %v5069_v34 = vpop.f32.mrb[12].mxu1 }
 0x1c2   : > { %v5071_v45 = vpop.f32.mrb[13].mxu1 }
 0x1c3   : > { %v5073_v46 = vpop.f32.mrb[14].mxu1 }
 0x1c4   : > { %v5075_v52 = vpop.f32.mrb[15].mxu1 }
 0x1ca   : > { %v4003_v54 = vpop.f32.mrb[0].mxu0 }
 0x1cb   : > { %v4035_v6 = vadd.f32 %v4003_v54, %v3833_v50  ;;  %v2689_v7 = vpop.f32.mrb[1].mxu0 }
 0x1cc   : > { %v4036_v8 = vadd.f32 %v2689_v7, %v1464_v51  ;;  %v4004_v24 = vpop.f32.mrb[2].mxu0 }
 0x1cd   : > { %v2857_v25 = vadd.f32 %v4035_v6, %v5081_v5  ;;  %v4037_v28 = vadd.f32 %v4004_v24, %v3834_v62  ;;  %v2692_v31 = vpop.f32.mrb[3].mxu0 }
 0x1ce   : > { %v2855_v43 = vadd.f32 %v4036_v8, %v5081_v5  ;;  %v4038_v44 = vadd.f32 %v2692_v31, %v1467_v63 }
 0x1cf   : > { %2889 = vst.msk [vmem:[%s5086_s27 + $0x10] sm:$0xff] %vm707_vm1, %v2857_v25  ;;  %v2921_v47 = vmax.f32 %v2857_v25, 0.0  ;;  %v2858_v59 = vadd.f32 %v4037_v28, %v5081_v5 }
 0x1d0   : > { %2887 = vst.msk [vmem:[%s5086_s27] sm:$0xff] %vm707_vm1, %v2855_v43  ;;  %v2919_v60 = vmax.f32 %v2855_v43, 0.0  ;;  %v2856_v4 = vadd.f32 %v4038_v44, %v5081_v5 }
 0x1d1   : > { %3541 = vst.msk [vmem:[%s4955_s21 + $0x31] sm:$0xff] %vm707_vm1, %v2921_v47  ;;  %2890 = vst.msk [vmem:[%s5086_s27 + $0x18] sm:$0xff] %vm707_vm1, %v2858_v59  ;;  %v2922_v11 = vmax.f32 %v2858_v59, 0.0 }
 0x1d2   : > { %3539 = vst.msk [vmem:[%s4955_s21 + $0x19] sm:$0xff] %vm707_vm1, %v2919_v60  ;;  %2888 = vst.msk [vmem:[%s5086_s27 + $0x8] sm:$0xff] %vm707_vm1, %v2856_v4  ;;  %v2920_v17 = vmax.f32 %v2856_v4, 0.0  ;;  %v4007_v18 = vpop.f32.mrb[4].mxu0 }
 0x1d3   : > { %3542 = vst.msk [vmem:[%s4955_s21 + $0x39] sm:$0xff] %vm707_vm1, %v2922_v11  ;;  %v4039_v20 = vadd.f32 %v4007_v18, %v3837_v0  ;;  %v2705_v22 = vpop.f32.mrb[5].mxu0 }
 0x1d4   : > { %3540 = vst.msk [vmem:[%s4955_s21 + $0x21] sm:$0xff] %vm707_vm1, %v2920_v17  ;;  %v4040_v23 = vadd.f32 %v2705_v22, %v1480_v2  ;;  %v4008_v35 = vpop.f32.mrb[6].mxu0 }
 0x1d5   : > { %v2861_v36 = vadd.f32 %v4039_v20, %v5081_v5  ;;  %v4041_v37 = vadd.f32 %v4008_v35, %v3838_v12  ;;  %v2708_v40 = vpop.f32.mrb[7].mxu0 }
 0x1d6   : > { %v2859_v41 = vadd.f32 %v4040_v23, %v5081_v5  ;;  %v4042_v42 = vadd.f32 %v2708_v40, %v1483_v13 }
 0x1d7   : > { %2893 = vst.msk [vmem:[%s5086_s27 + $0x30] sm:$0xff] %vm707_vm1, %v2861_v36  ;;  %v2925_v56 = vmax.f32 %v2861_v36, 0.0  ;;  %v2862_v57 = vadd.f32 %v4041_v37, %v5081_v5 }
 0x1d8   : > { %2891 = vst.msk [vmem:[%s5086_s27 + $0x20] sm:$0xff] %vm707_vm1, %v2859_v41  ;;  %v2923_v21 = vmax.f32 %v2859_v41, 0.0  ;;  %v2860_v58 = vadd.f32 %v4042_v42, %v5081_v5 }
 0x1d9   : > { %3545 = vst.msk [vmem:[%s4955_s21 + $0x61] sm:$0xff] %vm707_vm1, %v2925_v56  ;;  %2894 = vst.msk [vmem:[%s5086_s27 + $0x38] sm:$0xff] %vm707_vm1, %v2862_v57  ;;  %v2926_v39 = vmax.f32 %v2862_v57, 0.0 }
 0x1da   : > { %3543 = vst.msk [vmem:[%s4955_s21 + $0x49] sm:$0xff] %vm707_vm1, %v2923_v21  ;;  %2892 = vst.msk [vmem:[%s5086_s27 + $0x28] sm:$0xff] %vm707_vm1, %v2860_v58  ;;  %v2924_v55 = vmax.f32 %v2860_v58, 0.0  ;;  %v4011_v61 = vpop.f32.mrb[8].mxu0 }
 0x1db   : > { %3546 = vst.msk [vmem:[%s4955_s21 + $0x69] sm:$0xff] %vm707_vm1, %v2926_v39  ;;  %v4043_v1 = vadd.f32 %v4011_v61, %v3841_v14  ;;  %v2721_v9 = vpop.f32.mrb[9].mxu0 }
 0x1dc   : > { %3544 = vst.msk [vmem:[%s4955_s21 + $0x51] sm:$0xff] %vm707_vm1, %v2924_v55  ;;  %v4044_v10 = vadd.f32 %v2721_v9, %v1496_v16  ;;  %v4012_v53 = vpop.f32.mrb[10].mxu0 }
 0x1dd   : > { %v2865_v3 = vadd.f32 %v4043_v1, %v5081_v5  ;;  %v4045_v15 = vadd.f32 %v4012_v53, %v5065_v29  ;;  %v2724_v19 = vpop.f32.mrb[11].mxu0 }
 0x1de   : > { %v2863_v26 = vadd.f32 %v4044_v10, %v5081_v5  ;;  %v4046_v27 = vadd.f32 %v2724_v19, %v5067_v30 }
 0x1df   : > { %2897 = vst.msk [vmem:[%s5086_s27 + $0x50] sm:$0xff] %vm707_vm1, %v2865_v3  ;;  %v2929_v32 = vmax.f32 %v2865_v3, 0.0  ;;  %v2866_v33 = vadd.f32 %v4045_v15, %v5081_v5 }
 0x1e0   : > { %2895 = vst.msk [vmem:[%s5086_s27 + $0x40] sm:$0xff] %vm707_vm1, %v2863_v26  ;;  %v2927_v38 = vmax.f32 %v2863_v26, 0.0  ;;  %v2864_v48 = vadd.f32 %v4046_v27, %v5081_v5 }
 0x1e1   : > { %3549 = vst.msk [vmem:[%s4955_s21 + $0x91] sm:$0xff] %vm707_vm1, %v2929_v32  ;;  %2898 = vst.msk [vmem:[%s5086_s27 + $0x58] sm:$0xff] %vm707_vm1, %v2866_v33  ;;  %v2930_v49 = vmax.f32 %v2866_v33, 0.0 }
 0x1e2   : > { %3547 = vst.msk [vmem:[%s4955_s21 + $0x79] sm:$0xff] %vm707_vm1, %v2927_v38  ;;  %2896 = vst.msk [vmem:[%s5086_s27 + $0x48] sm:$0xff] %vm707_vm1, %v2864_v48  ;;  %v2928_v50 = vmax.f32 %v2864_v48, 0.0  ;;  %v4015_v51 = vpop.f32.mrb[12].mxu0 }
 0x1e3   : > { %3550 = vst.msk [vmem:[%s4955_s21 + $0x99] sm:$0xff] %vm707_vm1, %v2930_v49  ;;  %v4047_v62 = vadd.f32 %v4015_v51, %v5069_v34  ;;  %v2737_v63 = vpop.f32.mrb[13].mxu0 }
 0x1e4   : > { %3548 = vst.msk [vmem:[%s4955_s21 + $0x81] sm:$0xff] %vm707_vm1, %v2928_v50  ;;  %v4048_v0 = vadd.f32 %v2737_v63, %v5071_v45  ;;  %v4016_v2 = vpop.f32.mrb[14].mxu0 }
 0x1e5   : > { %v2869_v12 = vadd.f32 %v4047_v62, %v5081_v5  ;;  %v4049_v13 = vadd.f32 %v4016_v2, %v5073_v46  ;;  %v2740_v14 = vpop.f32.mrb[15].mxu0 }
 0x1e6   : > { %v2867_v16 = vadd.f32 %v4048_v0, %v5081_v5  ;;  %v4050_v29 = vadd.f32 %v2740_v14, %v5075_v52 }
 0x1e7   : > { %2901 = vst.msk [vmem:[%s5086_s27 + $0x70] sm:$0xff] %vm707_vm1, %v2869_v12  ;;  %v2933_v30 = vmax.f32 %v2869_v12, 0.0  ;;  %v2870_v34 = vadd.f32 %v4049_v13, %v5081_v5 }
 0x1e8   : > { %2899 = vst.msk [vmem:[%s5086_s27 + $0x60] sm:$0xff] %vm707_vm1, %v2867_v16  ;;  %v2931_v45 = vmax.f32 %v2867_v16, 0.0  ;;  %v2868_v54 = vadd.f32 %v4050_v29, %v5081_v5 }
 0x1e9   : > { %3553 = vst.msk [vmem:[%s4955_s21 + $0xc1] sm:$0xff] %vm707_vm1, %v2933_v30  ;;  %2902 = vst.msk [vmem:[%s5086_s27 + $0x78] sm:$0xff] %vm707_vm1, %v2870_v34  ;;  %v2934_v46 = vmax.f32 %v2870_v34, 0.0  ;;  %v3883_v6 = vpop.f32.mrb[16].mxu1 }
 0x1ea   : > { %3551 = vst.msk [vmem:[%s4955_s21 + $0xa9] sm:$0xff] %vm707_vm1, %v2931_v45  ;;  %2900 = vst.msk [vmem:[%s5086_s27 + $0x68] sm:$0xff] %vm707_vm1, %v2868_v54  ;;  %v2932_v52 = vmax.f32 %v2868_v54, 0.0  ;;  %v4019_v7 = vpop.f32.mrb[16].mxu0  ;;  %v1773_v8 = vpop.f32.mrb[17].mxu1 }
 0x1eb   : > { %3554 = vst.msk [vmem:[%s4955_s21 + $0xc9] sm:$0xff] %vm707_vm1, %v2934_v46  ;;  %v4051_v24 = vadd.f32 %v4019_v7, %v3883_v6  ;;  %v2753_v25 = vpop.f32.mrb[17].mxu0  ;;  %v3884_v28 = vpop.f32.mrb[18].mxu1 }
 0x1ec   : > { %3552 = vst.msk [vmem:[%s4955_s21 + $0xb1] sm:$0xff] %vm707_vm1, %v2932_v52  ;;  %v4052_v31 = vadd.f32 %v2753_v25, %v1773_v8  ;;  %v4020_v43 = vpop.f32.mrb[18].mxu0  ;;  %v1776_v44 = vpop.f32.mrb[19].mxu1 }
 0x1ed   : > { %v2873_v47 = vadd.f32 %v4051_v24, %v5081_v5  ;;  %v4053_v59 = vadd.f32 %v4020_v43, %v3884_v28  ;;  %v2756_v60 = vpop.f32.mrb[19].mxu0 }
 0x1ee   : > { %v2871_v4 = vadd.f32 %v4052_v31, %v5081_v5  ;;  %v4054_v11 = vadd.f32 %v2756_v60, %v1776_v44 }
 0x1ef   : > { %2905 = vst.msk [vmem:[%s5086_s27 + $0x90] sm:$0xff] %vm707_vm1, %v2873_v47  ;;  %v2937_v17 = vmax.f32 %v2873_v47, 0.0  ;;  %v2874_v18 = vadd.f32 %v4053_v59, %v5081_v5 }
 0x1f0   : > { %2903 = vst.msk [vmem:[%s5086_s27 + $0x80] sm:$0xff] %vm707_vm1, %v2871_v4  ;;  %v2935_v20 = vmax.f32 %v2871_v4, 0.0  ;;  %v2872_v22 = vadd.f32 %v4054_v11, %v5081_v5 }
 0x1f1   : > { %3557 = vst.msk [vmem:[%s4955_s21 + $0xf1] sm:$0xff] %vm707_vm1, %v2937_v17  ;;  %2906 = vst.msk [vmem:[%s5086_s27 + $0x98] sm:$0xff] %vm707_vm1, %v2874_v18  ;;  %v2938_v23 = vmax.f32 %v2874_v18, 0.0  ;;  %v3887_v35 = vpop.f32.mrb[20].mxu1 }
 0x1f2   : > { %3555 = vst.msk [vmem:[%s4955_s21 + $0xd9] sm:$0xff] %vm707_vm1, %v2935_v20  ;;  %2904 = vst.msk [vmem:[%s5086_s27 + $0x88] sm:$0xff] %vm707_vm1, %v2872_v22  ;;  %v2936_v36 = vmax.f32 %v2872_v22, 0.0  ;;  %v4023_v37 = vpop.f32.mrb[20].mxu0  ;;  %v1789_v40 = vpop.f32.mrb[21].mxu1 }
 0x1f3   : > { %3558 = vst.msk [vmem:[%s4955_s21 + $0xf9] sm:$0xff] %vm707_vm1, %v2938_v23  ;;  %v4055_v41 = vadd.f32 %v4023_v37, %v3887_v35  ;;  %v2769_v42 = vpop.f32.mrb[21].mxu0  ;;  %v3888_v56 = vpop.f32.mrb[22].mxu1 }
 0x1f4   : > { %3556 = vst.msk [vmem:[%s4955_s21 + $0xe1] sm:$0xff] %vm707_vm1, %v2936_v36  ;;  %v4056_v57 = vadd.f32 %v2769_v42, %v1789_v40  ;;  %v4024_v21 = vpop.f32.mrb[22].mxu0  ;;  %v1792_v58 = vpop.f32.mrb[23].mxu1 }
 0x1f5   : > { %v2877_v39 = vadd.f32 %v4055_v41, %v5081_v5  ;;  %v4057_v55 = vadd.f32 %v4024_v21, %v3888_v56  ;;  %v2772_v61 = vpop.f32.mrb[23].mxu0 }
 0x1f6   : > { %v2875_v1 = vadd.f32 %v4056_v57, %v5081_v5  ;;  %v4058_v9 = vadd.f32 %v2772_v61, %v1792_v58 }
 0x1f7   : > { %2909 = vst.msk [vmem:[%s5086_s27 + $0xb0] sm:$0xff] %vm707_vm1, %v2877_v39  ;;  %v2941_v10 = vmax.f32 %v2877_v39, 0.0  ;;  %v2878_v53 = vadd.f32 %v4057_v55, %v5081_v5 }
 0x1f8   : > { %2907 = vst.msk [vmem:[%s5086_s27 + $0xa0] sm:$0xff] %vm707_vm1, %v2875_v1  ;;  %v2939_v3 = vmax.f32 %v2875_v1, 0.0  ;;  %v2876_v15 = vadd.f32 %v4058_v9, %v5081_v5 }
 0x1f9   : > { %3561 = vst.msk [vmem:[%s4955_s21 + $0x121] sm:$0xff] %vm707_vm1, %v2941_v10  ;;  %2910 = vst.msk [vmem:[%s5086_s27 + $0xb8] sm:$0xff] %vm707_vm1, %v2878_v53  ;;  %v2942_v19 = vmax.f32 %v2878_v53, 0.0  ;;  %v3891_v26 = vpop.f32.mrb[24].mxu1 }
 0x1fa   : > { %3559 = vst.msk [vmem:[%s4955_s21 + $0x109] sm:$0xff] %vm707_vm1, %v2939_v3  ;;  %2908 = vst.msk [vmem:[%s5086_s27 + $0xa8] sm:$0xff] %vm707_vm1, %v2876_v15  ;;  %v2940_v27 = vmax.f32 %v2876_v15, 0.0  ;;  %v4027_v32 = vpop.f32.mrb[24].mxu0  ;;  %v1805_v33 = vpop.f32.mrb[25].mxu1 }
 0x1fb   : > { %3562 = vst.msk [vmem:[%s4955_s21 + $0x129] sm:$0xff] %vm707_vm1, %v2942_v19  ;;  %v4059_v38 = vadd.f32 %v4027_v32, %v3891_v26  ;;  %v2785_v48 = vpop.f32.mrb[25].mxu0  ;;  %v3892_v49 = vpop.f32.mrb[26].mxu1 }
 0x1fc   : > { %3560 = vst.msk [vmem:[%s4955_s21 + $0x111] sm:$0xff] %vm707_vm1, %v2940_v27  ;;  %v4060_v50 = vadd.f32 %v2785_v48, %v1805_v33  ;;  %v4028_v51 = vpop.f32.mrb[26].mxu0  ;;  %v1808_v62 = vpop.f32.mrb[27].mxu1 }
 0x1fd   : > { %v2881_v63 = vadd.f32 %v4059_v38, %v5081_v5  ;;  %v4061_v0 = vadd.f32 %v4028_v51, %v3892_v49  ;;  %v2788_v2 = vpop.f32.mrb[27].mxu0 }
 0x1fe   : > { %v2879_v12 = vadd.f32 %v4060_v50, %v5081_v5  ;;  %v4062_v13 = vadd.f32 %v2788_v2, %v1808_v62 }
 0x1ff   : > { %2913 = vst.msk [vmem:[%s5086_s27 + $0xd0] sm:$0xff] %vm707_vm1, %v2881_v63  ;;  %v2945_v14 = vmax.f32 %v2881_v63, 0.0  ;;  %v2882_v16 = vadd.f32 %v4061_v0, %v5081_v5 }
 0x200   : > { %2911 = vst.msk [vmem:[%s5086_s27 + $0xc0] sm:$0xff] %vm707_vm1, %v2879_v12  ;;  %v2943_v29 = vmax.f32 %v2879_v12, 0.0  ;;  %v2880_v30 = vadd.f32 %v4062_v13, %v5081_v5 }
 0x201   : > { %3565 = vst.msk [vmem:[%s4955_s21 + $0x151] sm:$0xff] %vm707_vm1, %v2945_v14  ;;  %2914 = vst.msk [vmem:[%s5086_s27 + $0xd8] sm:$0xff] %vm707_vm1, %v2882_v16  ;;  %v2946_v34 = vmax.f32 %v2882_v16, 0.0  ;;  %v3895_v45 = vpop.f32.mrb[28].mxu1 }
 0x202   : > { %3563 = vst.msk [vmem:[%s4955_s21 + $0x139] sm:$0xff] %vm707_vm1, %v2943_v29  ;;  %2912 = vst.msk [vmem:[%s5086_s27 + $0xc8] sm:$0xff] %vm707_vm1, %v2880_v30  ;;  %v2944_v54 = vmax.f32 %v2880_v30, 0.0  ;;  %v4031_v46 = vpop.f32.mrb[28].mxu0  ;;  %v1821_v6 = vpop.f32.mrb[29].mxu1 }
 0x203   : > { %3566 = vst.msk [vmem:[%s4955_s21 + $0x159] sm:$0xff] %vm707_vm1, %v2946_v34  ;;  %v4063_v52 = vadd.f32 %v4031_v46, %v3895_v45  ;;  %v2801_v7 = vpop.f32.mrb[29].mxu0  ;;  %v3896_v8 = vpop.f32.mrb[30].mxu1 }
 0x204   : > { %3564 = vst.msk [vmem:[%s4955_s21 + $0x141] sm:$0xff] %vm707_vm1, %v2944_v54  ;;  %v4064_v24 = vadd.f32 %v2801_v7, %v1821_v6  ;;  %v4032_v25 = vpop.f32.mrb[30].mxu0  ;;  %v1824_v28 = vpop.f32.mrb[31].mxu1 }
 0x205   : > { %v2885_v31 = vadd.f32 %v4063_v52, %v5081_v5  ;;  %v4065_v43 = vadd.f32 %v4032_v25, %v3896_v8  ;;  %v2804_v44 = vpop.f32.mrb[31].mxu0 }
 0x206   : > { %v2883_v47 = vadd.f32 %v4064_v24, %v5081_v5  ;;  %v4066_v59 = vadd.f32 %v2804_v44, %v1824_v28 }
 0x207   : > { %2917 = vst.msk [vmem:[%s5086_s27 + $0xf0] sm:$0xff] %vm707_vm1, %v2885_v31  ;;  %v2949_v60 = vmax.f32 %v2885_v31, 0.0  ;;  %v2886_v4 = vadd.f32 %v4065_v43, %v5081_v5 }
 0x208   : > { %2915 = vst.msk [vmem:[%s5086_s27 + $0xe0] sm:$0xff] %vm707_vm1, %v2883_v47  ;;  %v2947_v11 = vmax.f32 %v2883_v47, 0.0  ;;  %v2884_v17 = vadd.f32 %v4066_v59, %v5081_v5 }
 0x209   : > { %3569 = vst.msk [vmem:[%s4955_s21 + $0x181] sm:$0xff] %vm707_vm1, %v2949_v60  ;;  %2918 = vst.msk [vmem:[%s5086_s27 + $0xf8] sm:$0xff] %vm707_vm1, %v2886_v4  ;;  %v2950_v18 = vmax.f32 %v2886_v4, 0.0 }
 0x20a   : > { %3567 = vst.msk [vmem:[%s4955_s21 + $0x169] sm:$0xff] %vm707_vm1, %v2947_v11  ;;  %2916 = vst.msk [vmem:[%s5086_s27 + $0xe8] sm:$0xff] %vm707_vm1, %v2884_v17  ;;  %v2948_v20 = vmax.f32 %v2884_v17, 0.0 }
 0x20b   : > { %3570 = vst.msk [vmem:[%s4955_s21 + $0x189] sm:$0xff] %vm707_vm1, %v2950_v18 }
 0x20c   : > { %3568 = vst.msk [vmem:[%s4955_s21 + $0x171] sm:$0xff] %vm707_vm1, %v2948_v20 }
 0x20d PF: > { %s15_s17 = sadd.s32 1, %s4349_s17   ;;  %s5268_s15 = smov %s4345_s16 }
 0x20e   : > { %p12_p5 = scmp.ge.s32.totalorder %s15_s17, 4   ;;  %s5269_s16 = smov %s5271_s18 }
 0x210   :  { %14 = sbr.rel (!%p12_p5) target bundleno = 2 (0x2), region = 83 }

// kernel: _forward_impl.5
= control target key start
LH: loop header
LB: loop body
LE: loop exit
PB: predicated region body
PF: predicated region fallthrough
CT: control target
= control target key end

     0   :  { %s5377_s15 = smov 0   ;;  %s5379_s16 = smov 0   ;;  %s6430_s0 = inlined_call_operand.vmem [shape: f32[2,18,18,8], index: 0, kind: input, shape index: {}]   ;;  %s6431_s1 = inlined_call_operand.vmem [shape: bf16[72,8], index: 1, kind: input, shape index: {}]   ;;  %s6432_s2 = inlined_call_operand.vmem [shape: f32[1,8], index: 2, kind: input, shape index: {}]   ;;  %s6433_s3 = inlined_call_operand.vmem [shape: f32[2,16,16,8], index: 3, kind: output, shape index: {0}]   ;;  %s6434_s4 = inlined_call_operand.vmem [shape: f32[2,10,10,8], index: 4, kind: output, shape index: {1}]  }
   0x1   :  { %s5381_s17 = smov 0  }
   0x2 LB: > { %s27_s18 = sadd.s32 1, %s5344_s16  ;;  %p4154_p0 = scmp.ge.s32.totalorder %s5348_s17, 1  ;;  %s5348_s17 = sphi %s5381_s17, %s15_s17   ;;  %s5344_s16 = sphi %s5379_s16, %s6436_s16   ;;  %s5340_s15 = sphi %s5377_s15, %s6435_s15  }
   0x3   : > { %p29_p1 = scmp.ge.s32.totalorder %s27_s18, 2  ;;  %p198_p2 = scmp.lt.s32.totalorder %s5348_s17, 3 }
   0x5   : > { %s6438_s18 = smov (%p29_p1, %s27_s18), 0  ;;  %p199_p3 = pnand %p4154_p0, %p198_p2 }
   0x6   : > { %v706_v0 = vld [vmem:[%s6431_s1 + $0x4] sm:$0xf] (!%p199_p3)  ;;  %vm756_vm0 = vcmask (!%p199_p3), 1043456   ;;  %v5401_v1 = vld [vmem:[%s6431_s1 + $0x10] sm:$0xf] (!%p199_p3)  ;;  %p242_p4 = scmp.lt.s32.totalorder (!%p199_p3), %s5340_s15, 1 }
   0x7   : > { %202 = sbr.rel (%p199_p3) target bundleno = 583 (0x247), region = 32  ;;  %5288 = vmatprep.subr.msk.bf16.mxu1 (!%p199_p3), %vm756_vm0, %v706_v0  ;;  %5292 = vmatprep.subr.msk.bf16.mxu0 (!%p199_p3), %vm756_vm0, %v5401_v1  ;;  %v758_v2 = vsel (!%p199_p3), %vm756_vm0, %v706_v0, 0  ;;  %v5409_v3 = vsel (!%p199_p3), %vm756_vm0, %v5401_v1, 0  ;;  %v705_v4 = vld [vmem:[%s6431_s1] sm:$0xf] (!%p199_p3)  ;;  %vm707_vm1 = vcmask (!%p199_p3), 64512  }
   0x8   : > { %4725 = vmatpush3.bf16.msra.mxu1 (!%p199_p3), %v758_v2  ;;  %4861 = vmatpush3.bf16.msra.mxu0 (!%p199_p3), %v5409_v3  ;;  %v1868_v5 = vld [vmem:[%s6431_s1 + $0x14] sm:$0xf] (!%p199_p3)  ;;  %v970_v14 = vsel (!%p199_p3), %vm756_vm0, %v705_v4, 0  ;;  %v2113_v20 = vld [vmem:[%s6431_s1 + $0x18] sm:$0xf] (!%p199_p3)  ;;  %vm3576_vm2 = vcmask (!%p199_p3), 58368  }
   0x9   : > { %5289 = vmatprep.subr.msk.bf16.mxu1 (!%p199_p3), %vm756_vm0, %v705_v4  ;;  %5294 = vmatprep.subr.msk.bf16.mxu0 (!%p199_p3), %vm756_vm0, %v1868_v5  ;;  %v1918_v18 = vsel (!%p199_p3), %vm756_vm0, %v1868_v5, 0  ;;  %v5453_v21 = vld [vmem:[%s6431_s1 + $0x8] sm:$0xf] (!%p199_p3)  ;;  %v2163_v52 = vsel (!%p199_p3), %vm756_vm0, %v2113_v20, 0  ;;  %v5532_v53 = vld [vmem:[%s6431_s1 + $0x1c] sm:$0xf] (!%p199_p3) }
   0xa   : > { %vm3916_vm3 = vcmask (!%p199_p3), 1041409   ;;  %vm3918_vm4 = vcmask (!%p199_p3), 1042434   ;;  %vm3920_vm5 = vcmask (!%p199_p3), 1043459   ;;  %vm3922_vm6 = vcmask (!%p199_p3), 1044484  }
   0xb   : > { %vm3924_vm7 = vcmask (!%p199_p3), 1045509   ;;  %vm3926_vm8 = vcmask (!%p199_p3), 1046534   ;;  %vm3928_vm9 = vcmask (!%p199_p3), 1047559  }
   0xe   : > { %s6440_s15 = smov (!%p242_p4, %s5340_s15), 1 }
   0xf   : > { %s5298_s27 = smul.u32 432, %s6440_s15  ;;  %s4570_s23 = sshll.u32 %s6440_s15, 8 }
  0x10   : > { %s5299_s19 = smul.u32 160, %s6440_s15  ;;  %s6021_s28 = scalar_lea.vmem %s6433_s3, %s4570_s23 }
  0x11   : > { %s5426_s30 = scalar_lea.vmem %s6430_s0, %s5298_s27 }
  0x12   : > { %v319_v6 = vld [vmem:[%s5426_s30 + $0x1] sm:$0xff]  ;;  %v320_v7 = vld [vmem:[%s5426_s30 + $0x9] sm:$0xff]  ;;  %v4191_v8 = vld [vmem:[%s5426_s30 + $0x19] sm:$0xff]  ;;  %s5952_s22 = scalar_lea.vmem %s6434_s4, %s5299_s19 }
  0x13   : > { %v351_v9 = vpack.c.bf16 %v320_v7, %v319_v6  ;;  %v4192_v10 = vld [vmem:[%s5426_s30 + $0x21] sm:$0xff]  ;;  %v4193_v11 = vld [vmem:[%s5426_s30 + $0x31] sm:$0xff]  ;;  %v4194_v12 = vld [vmem:[%s5426_s30 + $0x39] sm:$0xff] }
  0x14   : > { %v496_v13 = vpack.c.bf16 %v4192_v10, %v4191_v8  ;;  %v5435_v15 = vpack.c.bf16 %v4194_v12, %v4193_v11  ;;  %v4195_v16 = vld [vmem:[%s5426_s30 + $0x49] sm:$0xff]  ;;  %v4196_v17 = vld [vmem:[%s5426_s30 + $0x51] sm:$0xff]  ;;  %v4197_v22 = vld [vmem:[%s5426_s30 + $0x61] sm:$0xff] }
  0x15   : > { %4726 = vmatprep.mubr.msk.bf16.mxu1 %vm707_vm1, %v351_v9  ;;  %v5441_v19 = vpack.c.bf16 %v4196_v17, %v4195_v16  ;;  %v4198_v23 = vld [vmem:[%s5426_s30 + $0x69] sm:$0xff]  ;;  %v4199_v24 = vld [vmem:[%s5426_s30 + $0x79] sm:$0xff]  ;;  %v4200_v25 = vld [vmem:[%s5426_s30 + $0x81] sm:$0xff] }
  0x16   : > { %4862 = vmatprep.mubr.msk.bf16.mxu0 %vm707_vm1, %v496_v13  ;;  %4727 = vmatmul.mubr.msk.bf16.vlgmr.msra.gmra.mrb[0].mxu1 %vm707_vm1, %v496_v13  ;;  %v5466_v26 = vpack.c.bf16 %v4198_v23, %v4197_v22  ;;  %v5468_v27 = vpack.c.bf16 %v4200_v25, %v4199_v24  ;;  %v4201_v28 = vld [vmem:[%s5426_s30 + $0x91] sm:$0xff]  ;;  %v4202_v29 = vld [vmem:[%s5426_s30 + $0x99] sm:$0xff]  ;;  %v4203_v30 = vld [vmem:[%s5426_s30 + $0xa9] sm:$0xff] }
  0x17   : > { %4759 = vmatpush3.bf16.msra.mxu1 %v970_v14  ;;  %4863 = vmatmul.mubr.msk.bf16.vlgmr.msra.gmra.mrb[0].mxu0 %vm707_vm1, %v5435_v15  ;;  %v4204_v31 = vld [vmem:[%s5426_s30 + $0xb1] sm:$0xff]  ;;  %v5482_v32 = vpack.c.bf16 %v4202_v29, %v4201_v28  ;;  %v4205_v34 = vld [vmem:[%s5426_s30 + $0xc1] sm:$0xff]  ;;  %v4206_v35 = vld [vmem:[%s5426_s30 + $0xc9] sm:$0xff] }
  0x18   : > { %4895 = vmatpush3.bf16.msra.mxu0 %v1918_v18  ;;  %4730 = vmatprep.mubr.msk.bf16.mxu1 %vm707_vm1, %v5435_v15  ;;  %v5484_v33 = vpack.c.bf16 %v4204_v31, %v4203_v30  ;;  %v4223_v36 = vld [vmem:[%s5426_s30 + $0x1a] sm:$0xff]  ;;  %v4224_v37 = vld [vmem:[%s5426_s30 + $0x22] sm:$0xff]  ;;  %v5498_v38 = vpack.c.bf16 %v4206_v35, %v4205_v34  ;;  %v4225_v42 = vld [vmem:[%s5426_s30 + $0x32] sm:$0xff] }
  0x19   : > { %4866 = vmatprep.mubr.msk.bf16.mxu0 %vm707_vm1, %v5441_v19  ;;  %5295 = vmatprep.subr.msk.bf16.mxu0 %vm756_vm0, %v2113_v20  ;;  %v5500_v39 = vpack.c.bf16 %v4224_v37, %v4223_v36  ;;  %v337_v40 = vld [vmem:[%s5426_s30 + $0xd9] sm:$0xff]  ;;  %v338_v41 = vld [vmem:[%s5426_s30 + $0xe1] sm:$0xff]  ;;  %v339_v44 = vld [vmem:[%s5426_s30 + $0xf1] sm:$0xff] }
  0x1a   : > { %5290 = vmatprep.subr.msk.bf16.mxu1 %vm756_vm0, %v5453_v21  ;;  %v4226_v43 = vld [vmem:[%s5426_s30 + $0x3a] sm:$0xff]  ;;  %v4227_v46 = vld [vmem:[%s5426_s30 + $0x4a] sm:$0xff]  ;;  %v4228_v47 = vld [vmem:[%s5426_s30 + $0x52] sm:$0xff]  ;;  %v5518_v48 = vpack.c.bf16 %v338_v41, %v337_v40 }
  0x1b   : > { %v340_v45 = vld [vmem:[%s5426_s30 + $0xf9] sm:$0xff]  ;;  %v5520_v49 = vpack.c.bf16 %v4226_v43, %v4225_v42  ;;  %v5524_v51 = vpack.c.bf16 %v4228_v47, %v4227_v46  ;;  %v341_v54 = vld [vmem:[%s5426_s30 + $0x109] sm:$0xff]  ;;  %v342_v55 = vld [vmem:[%s5426_s30 + $0x111] sm:$0xff]  ;;  %v1183_v47 = vsel %vm756_vm0, %v5453_v21, 0 }
  0x1c   : > { %v5522_v50 = vpack.c.bf16 %v340_v45, %v339_v44  ;;  %v4229_v56 = vld [vmem:[%s5426_s30 + $0x62] sm:$0xff]  ;;  %v4230_v57 = vld [vmem:[%s5426_s30 + $0x6a] sm:$0xff]  ;;  %v4231_v60 = vld [vmem:[%s5426_s30 + $0x7a] sm:$0xff]  ;;  %v5550_v62 = vpack.c.bf16 %v342_v55, %v341_v54 }
  0x1d   : > { %v343_v58 = vld [vmem:[%s5426_s30 + $0x121] sm:$0xff]  ;;  %v344_v59 = vld [vmem:[%s5426_s30 + $0x129] sm:$0xff]  ;;  %v5552_v63 = vpack.c.bf16 %v4230_v57, %v4229_v56  ;;  %v345_v4 = vld [vmem:[%s5426_s30 + $0x139] sm:$0xff] }
  0x1e   : > { %4731 = vmatmul.mubr.msk.bf16.gmra.mrb[4].mxu1 %vm707_vm1, %v5441_v19  ;;  %v4232_v61 = vld [vmem:[%s5426_s30 + $0x82] sm:$0xff]  ;;  %v5554_v0 = vpack.c.bf16 %v344_v59, %v343_v58  ;;  %v4233_v6 = vld [vmem:[%s5426_s30 + $0x92] sm:$0xff]  ;;  %v4234_v7 = vld [vmem:[%s5426_s30 + $0x9a] sm:$0xff] }
  0x1f   : > { %4867 = vmatmul.mubr.msk.bf16.gmra.mrb[4].mxu0 %vm707_vm1, %v5466_v26  ;;  %4734 = vmatprep.mubr.msk.bf16.mxu1 %vm707_vm1, %v5466_v26  ;;  %v5556_v2 = vpack.c.bf16 %v4232_v61, %v4231_v60  ;;  %v346_v5 = vld [vmem:[%s5426_s30 + $0x141] sm:$0xff]  ;;  %v347_v8 = vld [vmem:[%s5426_s30 + $0x151] sm:$0xff]  ;;  %v348_v9 = vld [vmem:[%s5426_s30 + $0x159] sm:$0xff]  ;;  %v5576_v13 = vpack.c.bf16 %v4234_v7, %v4233_v6 }
  0x20   : > { %4870 = vmatprep.mubr.msk.bf16.mxu0 %vm707_vm1, %v5468_v27  ;;  %v4235_v10 = vld [vmem:[%s5426_s30 + $0xaa] sm:$0xff]  ;;  %v4236_v11 = vld [vmem:[%s5426_s30 + $0xb2] sm:$0xff]  ;;  %v5574_v12 = vpack.c.bf16 %v346_v5, %v345_v4  ;;  %v5578_v14 = vpack.c.bf16 %v348_v9, %v347_v8  ;;  %v4237_v20 = vld [vmem:[%s5426_s30 + $0xc2] sm:$0xff] }
  0x21   : > { %v5580_v16 = vpack.c.bf16 %v4236_v11, %v4235_v10  ;;  %v349_v17 = vld [vmem:[%s5426_s30 + $0x169] sm:$0xff]  ;;  %v350_v18 = vld [vmem:[%s5426_s30 + $0x171] sm:$0xff]  ;;  %v271_v23 = vld [vmem:[%s5426_s30] sm:$0xff] }
  0x22   : > { %v4238_v22 = vld [vmem:[%s5426_s30 + $0xca] sm:$0xff]  ;;  %v4239_v25 = vld [vmem:[%s5426_s30 + $0xda] sm:$0xff]  ;;  %v4240_v28 = vld [vmem:[%s5426_s30 + $0xe2] sm:$0xff]  ;;  %v5598_v29 = vpack.c.bf16 %v350_v18, %v349_v17 }
  0x23   : > { %v272_v24 = vld [vmem:[%s5426_s30 + $0x8] sm:$0xff]  ;;  %v5600_v30 = vpack.c.bf16 %v4238_v22, %v4237_v20  ;;  %v5602_v34 = vpack.c.bf16 %v4240_v28, %v4239_v25  ;;  %v273_v35 = vld [vmem:[%s5426_s30 + $0x18] sm:$0xff]  ;;  %v274_v36 = vld [vmem:[%s5426_s30 + $0x20] sm:$0xff] }
  0x24   : > { %v303_v31 = vpack.c.bf16 %v272_v24, %v271_v23  ;;  %v4241_v37 = vld [vmem:[%s5426_s30 + $0xf2] sm:$0xff]  ;;  %v4242_v40 = vld [vmem:[%s5426_s30 + $0xfa] sm:$0xff]  ;;  %v4243_v43 = vld [vmem:[%s5426_s30 + $0x10a] sm:$0xff]  ;;  %v5619_v45 = vpack.c.bf16 %v274_v36, %v273_v35 }
  0x25   : > { %v275_v41 = vld [vmem:[%s5426_s30 + $0x30] sm:$0xff]  ;;  %v276_v42 = vld [vmem:[%s5426_s30 + $0x38] sm:$0xff]  ;;  %v5621_v46 = vpack.c.bf16 %v4242_v40, %v4241_v37  ;;  %v5634_v55 = vld [vmem:[%s6431_s1 + $0xc] sm:$0xf] }
  0x26   : > { %4735 = vmatmul.mubr.msk.bf16.gmra.mrb[8].mxu1 %vm707_vm1, %v5468_v27  ;;  %v4244_v44 = vld [vmem:[%s5426_s30 + $0x112] sm:$0xff]  ;;  %v277_v56 = vld [vmem:[%s5426_s30 + $0x48] sm:$0xff]  ;;  %v279_v59 = vld [vmem:[%s5426_s30 + $0x60] sm:$0xff] }
  0x27   : > { %4871 = vmatmul.mubr.msk.bf16.gmra.mrb[8].mxu0 %vm707_vm1, %v5482_v32  ;;  %4738 = vmatprep.mubr.msk.bf16.mxu1 %vm707_vm1, %v5482_v32  ;;  %v5627_v54 = vpack.c.bf16 %v4244_v44, %v4243_v43  ;;  %v278_v57 = vld [vmem:[%s5426_s30 + $0x50] sm:$0xff]  ;;  %v4245_v21 = vld [vmem:[%s5426_s30 + $0x122] sm:$0xff]  ;;  %v4247_v61 = vld [vmem:[%s5426_s30 + $0x13a] sm:$0xff] }
  0x28   : > { %4874 = vmatprep.mubr.msk.bf16.mxu0 %vm707_vm1, %v5484_v33  ;;  %v4246_v58 = vld [vmem:[%s5426_s30 + $0x12a] sm:$0xff]  ;;  %v4248_v4 = vld [vmem:[%s5426_s30 + $0x142] sm:$0xff]  ;;  %v5652_v5 = vpack.c.bf16 %v278_v57, %v277_v56  ;;  %v281_v9 = vld [vmem:[%s5426_s30 + $0x78] sm:$0xff] }
  0x29   : > { %v280_v60 = vld [vmem:[%s5426_s30 + $0x68] sm:$0xff]  ;;  %v5654_v6 = vpack.c.bf16 %v4246_v58, %v4245_v21  ;;  %v5658_v8 = vpack.c.bf16 %v4248_v4, %v4247_v61  ;;  %v282_v10 = vld [vmem:[%s5426_s30 + $0x80] sm:$0xff]  ;;  %v4249_v11 = vld [vmem:[%s5426_s30 + $0x152] sm:$0xff]  ;;  %v2408_v61 = vsel %vm756_vm0, %v5532_v53, 0 }
  0x2a   : > { %v5656_v7 = vpack.c.bf16 %v280_v60, %v279_v59  ;;  %v4250_v17 = vld [vmem:[%s5426_s30 + $0x15a] sm:$0xff]  ;;  %v283_v18 = vld [vmem:[%s5426_s30 + $0x90] sm:$0xff]  ;;  %v5676_v24 = vpack.c.bf16 %v282_v10, %v281_v9  ;;  %v285_v35 = vld [vmem:[%s5426_s30 + $0xa8] sm:$0xff] }
  0x2b   : > { %v284_v20 = vld [vmem:[%s5426_s30 + $0x98] sm:$0xff]  ;;  %v4251_v22 = vld [vmem:[%s5426_s30 + $0x16a] sm:$0xff]  ;;  %v5678_v25 = vpack.c.bf16 %v4250_v17, %v4249_v11  ;;  %v4253_v37 = vld [vmem:[%s5426_s30 + $0x182] sm:$0xff] }
  0x2c   : > { %v4252_v23 = vld [vmem:[%s5426_s30 + $0x172] sm:$0xff]  ;;  %v5680_v28 = vpack.c.bf16 %v284_v20, %v283_v18  ;;  %v4254_v40 = vld [vmem:[%s5426_s30 + $0x18a] sm:$0xff]  ;;  %v290_v57 = vld [vmem:[%s5426_s30 + $0xe0] sm:$0xff] }
  0x2d   : > { %v286_v36 = vld [vmem:[%s5426_s30 + $0xb0] sm:$0xff]  ;;  %v5700_v44 = vpack.c.bf16 %v4254_v40, %v4253_v37  ;;  %v289_v56 = vld [vmem:[%s5426_s30 + $0xd8] sm:$0xff]  ;;  %v2603_v4 = vld [vmem:[%s6431_s1 + $0x20] sm:$0xf] }
  0x2e   : > { %4739 = vmatmul.mubr.msk.bf16.gmra.mrb[12].mxu1 %vm707_vm1, %v5484_v33  ;;  %v5698_v43 = vpack.c.bf16 %v286_v36, %v285_v35  ;;  %v291_v21 = vld [vmem:[%s5426_s30 + $0xf0] sm:$0xff]  ;;  %v292_v58 = vld [vmem:[%s5426_s30 + $0xf8] sm:$0xff]  ;;  %v5716_v59 = vpack.c.bf16 %v290_v57, %v289_v56  ;;  %v293_v9 = vld [vmem:[%s5426_s30 + $0x108] sm:$0xff] }
  0x2f   : > { %4875 = vmatmul.mubr.msk.bf16.gmra.mrb[12].mxu0 %vm707_vm1, %v5498_v38  ;;  %4742 = vmatprep.mubr.msk.bf16.mxu1 %vm707_vm1, %v5498_v38  ;;  %v5718_v60 = vpack.c.bf16 %v292_v58, %v291_v21  ;;  %v294_v10 = vld [vmem:[%s5426_s30 + $0x110] sm:$0xff]  ;;  %v296_v11 = vld [vmem:[%s5426_s30 + $0x128] sm:$0xff]  ;;  %v297_v20 = vld [vmem:[%s5426_s30 + $0x138] sm:$0xff]  ;;  %v1428_v58 = vsel %vm756_vm0, %v5634_v55, 0 }
  0x30   : > { %4896 = vmatprep.mubr.msk.bf16.mxu0 %vm707_vm1, %v5500_v39  ;;  %v5738_v17 = vpack.c.bf16 %v294_v10, %v293_v9  ;;  %v300_v35 = vld [vmem:[%s5426_s30 + $0x158] sm:$0xff]  ;;  %v301_v40 = vld [vmem:[%s5426_s30 + $0x168] sm:$0xff]  ;;  %v4286_v9 = vld [vmem:[%s5426_s30 + $0x1a0] sm:$0xff] }
  0x31   : > { %v368_v56 = vld [vmem:[%s5426_s30 + $0xa] sm:$0xff] }
  0x36   : > { %4743 = vmatmul.mubr.msk.bf16.gmra.mrb[16].mxu1 %vm707_vm1, %v5518_v48 }
  0x37   : > { %4897 = vmatmul.mubr.msk.bf16.vlgmr.msra.gmra.mrb[0].mxu0 %vm707_vm1, %v5520_v49  ;;  %4746 = vmatprep.mubr.msk.bf16.mxu1 %vm707_vm1, %v5522_v50 }
  0x38   : > { %4929 = vmatpush3.bf16.msra.mxu0 %v2163_v52  ;;  %4900 = vmatprep.mubr.msk.bf16.mxu0 %vm707_vm1, %v5524_v51  ;;  %v5625_v52 = vpack.c.bf16 %v276_v42, %v275_v41  ;;  %v287_v41 = vld [vmem:[%s5426_s30 + $0xc0] sm:$0xff]  ;;  %v288_v42 = vld [vmem:[%s5426_s30 + $0xc8] sm:$0xff] }
  0x39   : > { %5296 = vmatprep.subr.msk.bf16.mxu0 %vm756_vm0, %v5532_v53  ;;  %v295_v53 = vld [vmem:[%s5426_s30 + $0x120] sm:$0xff] }
  0x3a   : > { %v5740_v18 = vpack.c.bf16 %v296_v11, %v295_v53  ;;  %v2653_v53 = vsel %vm756_vm0, %v2603_v4, 0 }
  0x3e   : > { %4747 = vmatmul.mubr.msk.bf16.gmra.mrb[20].mxu1 %vm707_vm1, %v5550_v62 }
  0x3f   : > { %4901 = vmatmul.mubr.msk.bf16.gmra.mrb[4].mxu0 %vm707_vm1, %v5552_v63  ;;  %4750 = vmatprep.mubr.msk.bf16.mxu1 %vm707_vm1, %v5554_v0 }
  0x40   : > { %4904 = vmatprep.mubr.msk.bf16.mxu0 %vm707_vm1, %v5556_v2 }
  0x46   : > { %4751 = vmatmul.mubr.msk.bf16.gmra.mrb[24].mxu1 %vm707_vm1, %v5574_v12 }
  0x47   : > { %4905 = vmatmul.mubr.msk.bf16.gmra.mrb[8].mxu0 %vm707_vm1, %v5576_v13  ;;  %4754 = vmatprep.mubr.msk.bf16.mxu1 %vm707_vm1, %v5578_v14 }
  0x48   : > { %4908 = vmatprep.mubr.msk.bf16.mxu0 %vm707_vm1, %v5580_v16 }
  0x4e   : > { %4755 = vmatmul.mubr.msk.bf16.gmra.mrb[28].mxu1 %vm707_vm1, %v5598_v29 }
  0x4f   : > { %4909 = vmatmul.mubr.msk.bf16.gmra.mrb[12].mxu0 %vm707_vm1, %v5600_v30  ;;  %4760 = vmatprep.mubr.msk.bf16.mxu1 %vm707_vm1, %v303_v31  ;;  %v5682_v31 = vpack.c.bf16 %v4252_v23, %v4251_v22  ;;  %v298_v22 = vld [vmem:[%s5426_s30 + $0x140] sm:$0xff]  ;;  %v299_v23 = vld [vmem:[%s5426_s30 + $0x150] sm:$0xff] }
  0x50   : > { %4912 = vmatprep.mubr.msk.bf16.mxu0 %vm707_vm1, %v5602_v34  ;;  %v5754_v36 = vpack.c.bf16 %v298_v22, %v297_v20  ;;  %v5756_v37 = vpack.c.bf16 %v300_v35, %v299_v23 }
  0x56   : > { %4761 = vmatmul.mubr.msk.bf16.vlgmr.msra.gmra.mrb[0].mxu1 %vm707_vm1, %v5619_v45 }
  0x57   : > { %4793 = vmatpush3.bf16.msra.mxu1 %v1183_v47  ;;  %4913 = vmatmul.mubr.msk.bf16.gmra.mrb[16].mxu0 %vm707_vm1, %v5621_v46  ;;  %v5702_v47 = vpack.c.bf16 %v288_v42, %v287_v41  ;;  %v302_v41 = vld [vmem:[%s5426_s30 + $0x170] sm:$0xff]  ;;  %v367_v42 = vld [vmem:[%s5426_s30 + $0x2] sm:$0xff] }
  0x58   : > { %4764 = vmatprep.mubr.msk.bf16.mxu1 %vm707_vm1, %v5625_v52  ;;  %4916 = vmatprep.mubr.msk.bf16.mxu0 %vm707_vm1, %v5627_v54  ;;  %v5770_v57 = vpack.c.bf16 %v302_v41, %v301_v40  ;;  %v399_v21 = vpack.c.bf16 %v368_v56, %v367_v42 }
  0x59   : > { %5291 = vmatprep.subr.msk.bf16.mxu1 %vm756_vm0, %v5634_v55  ;;  %v4284_v55 = vld [vmem:[%s5426_s30 + $0x188] sm:$0xff] }
  0x5e   : > { %4765 = vmatmul.mubr.msk.bf16.gmra.mrb[4].mxu1 %vm707_vm1, %v5652_v5 }
  0x5f   : > { %4917 = vmatmul.mubr.msk.bf16.gmra.mrb[20].mxu0 %vm707_vm1, %v5654_v6  ;;  %4768 = vmatprep.mubr.msk.bf16.mxu1 %vm707_vm1, %v5656_v7 }
  0x60   : > { %4920 = vmatprep.mubr.msk.bf16.mxu0 %vm707_vm1, %v5658_v8 }
  0x66   : > { %4769 = vmatmul.mubr.msk.bf16.gmra.mrb[8].mxu1 %vm707_vm1, %v5676_v24 }
  0x67   : > { %4921 = vmatmul.mubr.msk.bf16.gmra.mrb[24].mxu0 %vm707_vm1, %v5678_v25  ;;  %4772 = vmatprep.mubr.msk.bf16.mxu1 %vm707_vm1, %v5680_v28 }
  0x68   : > { %4924 = vmatprep.mubr.msk.bf16.mxu0 %vm707_vm1, %v5682_v31 }
  0x6e   : > { %4773 = vmatmul.mubr.msk.bf16.gmra.mrb[12].mxu1 %vm707_vm1, %v5698_v43 }
  0x6f   : > { %4925 = vmatmul.mubr.msk.bf16.gmra.mrb[28].mxu0 %vm707_vm1, %v5700_v44  ;;  %4776 = vmatprep.mubr.msk.bf16.mxu1 %vm707_vm1, %v5702_v47 }
  0x70   : > { %4930 = vmatprep.mubr.msk.bf16.mxu0 %vm707_vm1, %v5625_v52 }
  0x76   : > { %4777 = vmatmul.mubr.msk.bf16.gmra.mrb[16].mxu1 %vm707_vm1, %v5716_v59 }
  0x77   : > { %4931 = vmatmul.mubr.msk.bf16.vlgmr.msra.gmra.mrb[0].mxu0 %vm707_vm1, %v5652_v5  ;;  %4780 = vmatprep.mubr.msk.bf16.mxu1 %vm707_vm1, %v5718_v60 }
  0x78   : > { %4963 = vmatpush3.bf16.msra.mxu0 %v2408_v61  ;;  %4934 = vmatprep.mubr.msk.bf16.mxu0 %vm707_vm1, %v5656_v7 }
  0x79   : > { %5297 = vmatprep.subr.msk.bf16.mxu0 %vm756_vm0, %v2603_v4 }
  0x7e   : > { %4781 = vmatmul.mubr.msk.bf16.gmra.mrb[20].mxu1 %vm707_vm1, %v5738_v17 }
  0x7f   : > { %4935 = vmatmul.mubr.msk.bf16.gmra.mrb[4].mxu0 %vm707_vm1, %v5676_v24  ;;  %4784 = vmatprep.mubr.msk.bf16.mxu1 %vm707_vm1, %v5740_v18 }
  0x80   : > { %4938 = vmatprep.mubr.msk.bf16.mxu0 %vm707_vm1, %v5680_v28 }
  0x86   : > { %4785 = vmatmul.mubr.msk.bf16.gmra.mrb[24].mxu1 %vm707_vm1, %v5754_v36 }
  0x87   : > { %4939 = vmatmul.mubr.msk.bf16.gmra.mrb[8].mxu0 %vm707_vm1, %v5698_v43  ;;  %4788 = vmatprep.mubr.msk.bf16.mxu1 %vm707_vm1, %v5756_v37 }
  0x88   : > { %4942 = vmatprep.mubr.msk.bf16.mxu0 %vm707_vm1, %v5702_v47 }
  0x8e   : > { %4789 = vmatmul.mubr.msk.bf16.gmra.mrb[28].mxu1 %vm707_vm1, %v5770_v57 }
  0x8f   : > { %4943 = vmatmul.mubr.msk.bf16.gmra.mrb[12].mxu0 %vm707_vm1, %v5716_v59  ;;  %4794 = vmatprep.mubr.msk.bf16.mxu1 %vm707_vm1, %v399_v21 }
  0x90   : > { %4946 = vmatprep.mubr.msk.bf16.mxu0 %vm707_vm1, %v5718_v60 }
  0x96   : > { %4795 = vmatmul.mubr.msk.bf16.vlgmr.msra.gmra.mrb[0].mxu1 %vm707_vm1, %v5500_v39  ;;  %v4283_v39 = vld [vmem:[%s5426_s30 + $0x180] sm:$0xff] }
  0x97   : > { %4827 = vmatpush3.bf16.msra.mxu1 %v1428_v58  ;;  %4947 = vmatmul.mubr.msk.bf16.gmra.mrb[16].mxu0 %vm707_vm1, %v5738_v17  ;;  %v5801_v61 = vpack.c.bf16 %v4284_v55, %v4283_v39 }
  0x98   : > { %4798 = vmatprep.mubr.msk.bf16.mxu1 %vm707_vm1, %v5520_v49  ;;  %4950 = vmatprep.mubr.msk.bf16.mxu0 %vm707_vm1, %v5740_v18 }
  0x99   : > { %5293 = vmatprep.subr.msk.bf16.mxu1 %vm756_vm0, %v5401_v1  ;;  %v4285_v1 = vld [vmem:[%s5426_s30 + $0x198] sm:$0xff] }
  0x9a   : > { %v608_v10 = vpack.c.bf16 %v4286_v9, %v4285_v1 }
  0x9e   : > { %4799 = vmatmul.mubr.msk.bf16.gmra.mrb[4].mxu1 %vm707_vm1, %v5524_v51 }
  0x9f   : > { %4951 = vmatmul.mubr.msk.bf16.gmra.mrb[20].mxu0 %vm707_vm1, %v5754_v36  ;;  %4802 = vmatprep.mubr.msk.bf16.mxu1 %vm707_vm1, %v5552_v63 }
  0xa0   : > { %4954 = vmatprep.mubr.msk.bf16.mxu0 %vm707_vm1, %v5756_v37 }
  0xa6   : > { %4803 = vmatmul.mubr.msk.bf16.gmra.mrb[8].mxu1 %vm707_vm1, %v5556_v2 }
  0xa7   : > { %4955 = vmatmul.mubr.msk.bf16.gmra.mrb[24].mxu0 %vm707_vm1, %v5770_v57  ;;  %4806 = vmatprep.mubr.msk.bf16.mxu1 %vm707_vm1, %v5576_v13 }
  0xa8   : > { %4958 = vmatprep.mubr.msk.bf16.mxu0 %vm707_vm1, %v5801_v61 }
  0xae   : > { %4807 = vmatmul.mubr.msk.bf16.gmra.mrb[12].mxu1 %vm707_vm1, %v5580_v16 }
  0xaf   : > { %4959 = vmatmul.mubr.msk.bf16.gmra.mrb[28].mxu0 %vm707_vm1, %v608_v10  ;;  %4810 = vmatprep.mubr.msk.bf16.mxu1 %vm707_vm1, %v5600_v30 }
  0xb0   : > { %4964 = vmatprep.mubr.msk.bf16.mxu0 %vm707_vm1, %v5435_v15  ;;  %v4316_v15 = vld [vmem:[%s5426_s30 + $0x189] sm:$0xff] }
  0xb6   : > { %4811 = vmatmul.mubr.msk.bf16.gmra.mrb[16].mxu1 %vm707_vm1, %v5602_v34 }
  0xb7   : > { %4965 = vmatmul.mubr.msk.bf16.vlgmr.msra.gmra.mrb[0].mxu0 %vm707_vm1, %v5441_v19  ;;  %4814 = vmatprep.mubr.msk.bf16.mxu1 %vm707_vm1, %v5621_v46 }
  0xb8   : > { %4997 = vmatpush3.bf16.msra.mxu0 %v2653_v53  ;;  %4968 = vmatprep.mubr.msk.bf16.mxu0 %vm707_vm1, %v5466_v26  ;;  %v4317_v26 = vld [vmem:[%s5426_s30 + $0x199] sm:$0xff] }
  0xbe   : > { %4815 = vmatmul.mubr.msk.bf16.gmra.mrb[20].mxu1 %vm707_vm1, %v5627_v54 }
  0xbf   : > { %4969 = vmatmul.mubr.msk.bf16.gmra.mrb[4].mxu0 %vm707_vm1, %v5468_v27  ;;  %4818 = vmatprep.mubr.msk.bf16.mxu1 %vm707_vm1, %v5654_v6  ;;  %v4318_v27 = vld [vmem:[%s5426_s30 + $0x1a1] sm:$0xff] }
  0xc0   : > { %4972 = vmatprep.mubr.msk.bf16.mxu0 %vm707_vm1, %v5482_v32  ;;  %v656_v32 = vpack.c.bf16 %v4318_v27, %v4317_v26 }
  0xc6   : > { %4819 = vmatmul.mubr.msk.bf16.gmra.mrb[24].mxu1 %vm707_vm1, %v5658_v8 }
  0xc7   : > { %4973 = vmatmul.mubr.msk.bf16.gmra.mrb[8].mxu0 %vm707_vm1, %v5484_v33  ;;  %4822 = vmatprep.mubr.msk.bf16.mxu1 %vm707_vm1, %v5678_v25  ;;  %v4349_v33 = vld [vmem:[%s5426_s30 + $0x19a] sm:$0xff] }
  0xc8   : > { %4976 = vmatprep.mubr.msk.bf16.mxu0 %vm707_vm1, %v5498_v38  ;;  %v4350_v38 = vld [vmem:[%s5426_s30 + $0x1a2] sm:$0xff] }
  0xce   : > { %4823 = vmatmul.mubr.msk.bf16.gmra.mrb[28].mxu1 %vm707_vm1, %v5682_v31 }
  0xcf   : > { %4977 = vmatmul.mubr.msk.bf16.gmra.mrb[12].mxu0 %vm707_vm1, %v5518_v48  ;;  %4828 = vmatprep.mubr.msk.bf16.mxu1 %vm707_vm1, %v5619_v45 }
  0xd0   : > { %4980 = vmatprep.mubr.msk.bf16.mxu0 %vm707_vm1, %v5522_v50 }
  0xd6   : > { %4829 = vmatmul.mubr.msk.bf16.vlgmr.msra.gmra.mrb[0].mxu1 %vm707_vm1, %v5625_v52 }
  0xd7   : > { %5031 = vmatpush3.bf16.msra.mxu1 %v5409_v3  ;;  %4981 = vmatmul.mubr.msk.bf16.gmra.mrb[16].mxu0 %vm707_vm1, %v5550_v62  ;;  %v4315_v3 = vld [vmem:[%s5426_s30 + $0x181] sm:$0xff] }
  0xd8   : > { %4832 = vmatprep.mubr.msk.bf16.mxu1 %vm707_vm1, %v5652_v5  ;;  %4984 = vmatprep.mubr.msk.bf16.mxu0 %vm707_vm1, %v5554_v0  ;;  %v655_v19 = vpack.c.bf16 %v4316_v15, %v4315_v3 }
  0xde   : > { %4833 = vmatmul.mubr.msk.bf16.gmra.mrb[4].mxu1 %vm707_vm1, %v5656_v7 }
  0xdf   : > { %4985 = vmatmul.mubr.msk.bf16.gmra.mrb[20].mxu0 %vm707_vm1, %v5574_v12  ;;  %4836 = vmatprep.mubr.msk.bf16.mxu1 %vm707_vm1, %v5676_v24 }
  0xe0   : > { %4988 = vmatprep.mubr.msk.bf16.mxu0 %vm707_vm1, %v5578_v14 }
  0xe6   : > { %4837 = vmatmul.mubr.msk.bf16.gmra.mrb[8].mxu1 %vm707_vm1, %v5680_v28 }
  0xe7   : > { %4989 = vmatmul.mubr.msk.bf16.gmra.mrb[24].mxu0 %vm707_vm1, %v5598_v29  ;;  %4840 = vmatprep.mubr.msk.bf16.mxu1 %vm707_vm1, %v5698_v43 }
  0xe8   : > { %4992 = vmatprep.mubr.msk.bf16.mxu0 %vm707_vm1, %v655_v19 }
  0xee   : > { %4841 = vmatmul.mubr.msk.bf16.gmra.mrb[12].mxu1 %vm707_vm1, %v5702_v47 }
  0xef   : > { %4993 = vmatmul.mubr.msk.bf16.gmra.mrb[28].mxu0 %vm707_vm1, %v656_v32  ;;  %4844 = vmatprep.mubr.msk.bf16.mxu1 %vm707_vm1, %v5716_v59 }
  0xf0   : > { %4998 = vmatprep.mubr.msk.bf16.mxu0 %vm707_vm1, %v5520_v49  ;;  %v5350_v49 = vmov 0.0  }
  0xf1   : > { %3575 = vst.msk [vmem:[%s5952_s22] sm:$0xff] %vm707_vm1, %v5350_v49  ;;  %3578 = vst.msk [vmem:[%s5952_s22 + $0x10] sm:$0xff] %vm707_vm1, %v5350_v49 }
  0xf2   : > { %3577 = vst.msk [vmem:[%s5952_s22 + $0x8] sm:$0x3] %vm3576_vm2, %v5350_v49  ;;  %3579 = vst.msk [vmem:[%s5952_s22 + $0x18] sm:$0x3] %vm3576_vm2, %v5350_v49 }
  0xf3   : > { %3594 = vst.msk [vmem:[%s5952_s22 + $0x90] sm:$0xff] %vm707_vm1, %v5350_v49  ;;  %3580 = vst.msk [vmem:[%s5952_s22 + $0x20] sm:$0xff] %vm707_vm1, %v5350_v49 }
  0xf4   : > { %3595 = vst.msk [vmem:[%s5952_s22 + $0x98] sm:$0x3] %vm3576_vm2, %v5350_v49  ;;  %3581 = vst.msk [vmem:[%s5952_s22 + $0x28] sm:$0x3] %vm3576_vm2, %v5350_v49 }
  0xf5   : > { %3582 = vst.msk [vmem:[%s5952_s22 + $0x30] sm:$0xff] %vm707_vm1, %v5350_v49  ;;  %3584 = vst.msk [vmem:[%s5952_s22 + $0x40] sm:$0xff] %vm707_vm1, %v5350_v49 }
  0xf6   : > { %4845 = vmatmul.mubr.msk.bf16.gmra.mrb[16].mxu1 %vm707_vm1, %v5718_v60  ;;  %3583 = vst.msk [vmem:[%s5952_s22 + $0x38] sm:$0x3] %vm3576_vm2, %v5350_v49  ;;  %3585 = vst.msk [vmem:[%s5952_s22 + $0x48] sm:$0x3] %vm3576_vm2, %v5350_v49 }
  0xf7   : > { %4999 = vmatmul.mubr.msk.bf16.vlgmr.msra.gmra.mrb[0].mxu0 %vm707_vm1, %v5524_v51  ;;  %4848 = vmatprep.mubr.msk.bf16.mxu1 %vm707_vm1, %v5738_v17  ;;  %3586 = vst.msk [vmem:[%s5952_s22 + $0x50] sm:$0xff] %vm707_vm1, %v5350_v49  ;;  %3588 = vst.msk [vmem:[%s5952_s22 + $0x60] sm:$0xff] %vm707_vm1, %v5350_v49 }
  0xf8   : > { %5002 = vmatprep.mubr.msk.bf16.mxu0 %vm707_vm1, %v5552_v63  ;;  %3587 = vst.msk [vmem:[%s5952_s22 + $0x58] sm:$0x3] %vm3576_vm2, %v5350_v49  ;;  %3589 = vst.msk [vmem:[%s5952_s22 + $0x68] sm:$0x3] %vm3576_vm2, %v5350_v49 }
  0xf9   : > { %3590 = vst.msk [vmem:[%s5952_s22 + $0x70] sm:$0xff] %vm707_vm1, %v5350_v49  ;;  %3592 = vst.msk [vmem:[%s5952_s22 + $0x80] sm:$0xff] %vm707_vm1, %v5350_v49 }
  0xfa   : > { %3591 = vst.msk [vmem:[%s5952_s22 + $0x78] sm:$0x3] %vm3576_vm2, %v5350_v49  ;;  %3593 = vst.msk [vmem:[%s5952_s22 + $0x88] sm:$0x3] %vm3576_vm2, %v5350_v49 }
  0xfe   : > { %4849 = vmatmul.mubr.msk.bf16.gmra.mrb[20].mxu1 %vm707_vm1, %v5740_v18 }
  0xff   : > { %5003 = vmatmul.mubr.msk.bf16.gmra.mrb[4].mxu0 %vm707_vm1, %v5556_v2  ;;  %4852 = vmatprep.mubr.msk.bf16.mxu1 %vm707_vm1, %v5754_v36 }
 0x100   : > { %5006 = vmatprep.mubr.msk.bf16.mxu0 %vm707_vm1, %v5576_v13 }
 0x106   : > { %4853 = vmatmul.mubr.msk.bf16.gmra.mrb[24].mxu1 %vm707_vm1, %v5756_v37 }
 0x107   : > { %5007 = vmatmul.mubr.msk.bf16.gmra.mrb[8].mxu0 %vm707_vm1, %v5580_v16  ;;  %4856 = vmatprep.mubr.msk.bf16.mxu1 %vm707_vm1, %v5770_v57 }
 0x108   : > { %5010 = vmatprep.mubr.msk.bf16.mxu0 %vm707_vm1, %v5600_v30 }
 0x10e   : > { %4857 = vmatmul.mubr.msk.bf16.gmra.mrb[28].mxu1 %vm707_vm1, %v5801_v61 }
 0x10f   : > { %5011 = vmatmul.mubr.msk.bf16.gmra.mrb[12].mxu0 %vm707_vm1, %v5602_v34  ;;  %4878 = vmatprep.mubr.msk.bf16.mxu1 %vm707_vm1, %v5518_v48  ;;  %v704_v48 = vpack.c.bf16 %v4350_v38, %v4349_v33 }
 0x110   : > { %5014 = vmatprep.mubr.msk.bf16.mxu0 %vm707_vm1, %v5621_v46 }
 0x116   : > { %4879 = vmatmul.mubr.msk.bf16.vlgmr.msra.gmra.mrb[16].mxu1 %vm707_vm1, %v5522_v50 }
 0x117   : > { %5015 = vmatmul.mubr.msk.bf16.gmra.mrb[16].mxu0 %vm707_vm1, %v5627_v54  ;;  %4882 = vmatprep.mubr.msk.bf16.mxu1 %vm707_vm1, %v5550_v62  ;;  %v5351_v54 = vmov 1983009808  }
 0x118   : > { %5018 = vmatprep.mubr.msk.bf16.mxu0 %vm707_vm1, %v5654_v6  ;;  %v2985_v5 = vunpack.c.l.s4 %v5351_v54  ;;  %v2987_v6 = vlaneseq }
 0x11a   : > { %v2988_v43 = vshrl.u32 %v2987_v6, 7 }
 0x11c   : > { %v6037_v41 = vsub.s32 0, %v2988_v43 }
 0x11e   : > { %4883 = vmatmul.mubr.msk.bf16.gmra.mrb[20].mxu1 %vm707_vm1, %v5554_v0 }
 0x11f   : > { %5019 = vmatmul.mubr.msk.bf16.gmra.mrb[20].mxu0 %vm707_vm1, %v5658_v8  ;;  %4886 = vmatprep.mubr.msk.bf16.mxu1 %vm707_vm1, %v5574_v12  ;;  %v6016_v8 = vld [vmem:[%s6432_s2] ss:$0 sm:$0xff] }
 0x120   : > { %5022 = vmatprep.mubr.msk.bf16.mxu0 %vm707_vm1, %v5678_v25 }
 0x126   : > { %4887 = vmatmul.mubr.msk.bf16.gmra.mrb[24].mxu1 %vm707_vm1, %v5578_v14 }
 0x127   : > { %5023 = vmatmul.mubr.msk.bf16.gmra.mrb[24].mxu0 %vm707_vm1, %v5682_v31  ;;  %4890 = vmatprep.mubr.msk.bf16.mxu1 %vm707_vm1, %v5598_v29  ;;  %v2986_v31 = vunpack.c.0.s8 %v2985_v5 }
 0x128   : > { %5026 = vmatprep.mubr.msk.bf16.mxu0 %vm707_vm1, %v5700_v44 }
 0x129   : > { %v6030_v22 = vsub.s32 %v2986_v31, %v2988_v43 }
 0x12e   : > { %4891 = vmatmul.mubr.msk.bf16.gmra.mrb[28].mxu1 %vm707_vm1, %v655_v19 }
 0x12f   : > { %5027 = vmatmul.mubr.msk.bf16.gmra.mrb[28].mxu0 %vm707_vm1, %v704_v48 }
 0x1a9   : > { %v4830_v50 = vpop.f32.mrb[0].mxu1 }
 0x1aa   : > { %v1464_v51 = vpop.f32.mrb[1].mxu1 }
 0x1ab   : > { %v4831_v62 = vpop.f32.mrb[2].mxu1 }
 0x1ac   : > { %v1467_v63 = vpop.f32.mrb[3].mxu1 }
 0x1b1   : > { %v4834_v0 = vpop.f32.mrb[4].mxu1 }
 0x1b2   : > { %v1480_v2 = vpop.f32.mrb[5].mxu1 }
 0x1b3   : > { %v4835_v12 = vpop.f32.mrb[6].mxu1 }
 0x1b4   : > { %v5994_v13 = vpop.f32.mrb[7].mxu1 }
 0x1b9   : > { %v5996_v14 = vpop.f32.mrb[8].mxu1 }
 0x1ba   : > { %v5998_v16 = vpop.f32.mrb[9].mxu1 }
 0x1bb   : > { %v6000_v29 = vpop.f32.mrb[10].mxu1 }
 0x1bc   : > { %v6002_v30 = vpop.f32.mrb[11].mxu1 }
 0x1c1   : > { %v6004_v34 = vpop.f32.mrb[12].mxu1 }
 0x1c2   : > { %v6006_v45 = vpop.f32.mrb[13].mxu1 }
 0x1c3   : > { %v6008_v46 = vpop.f32.mrb[14].mxu1 }
 0x1c4   : > { %v6010_v52 = vpop.f32.mrb[15].mxu1 }
 0x1ca   : > { %v5000_v7 = vpop.f32.mrb[0].mxu0 }
 0x1cb   : > { %v5032_v24 = vadd.f32 %v5000_v7, %v4830_v50  ;;  %v2689_v25 = vpop.f32.mrb[1].mxu0 }
 0x1cc   : > { %v5033_v28 = vadd.f32 %v2689_v25, %v1464_v51  ;;  %v5001_v44 = vpop.f32.mrb[2].mxu0 }
 0x1cd   : > { %v2857_v47 = vadd.f32 %v5032_v24, %v6016_v8  ;;  %v5034_v59 = vadd.f32 %v5001_v44, %v4831_v62  ;;  %v2692_v60 = vpop.f32.mrb[3].mxu0 }
 0x1ce   : > { %v2855_v4 = vadd.f32 %v5033_v28, %v6016_v8  ;;  %v5035_v11 = vadd.f32 %v2692_v60, %v1467_v63 }
 0x1cf   : > { %2889 = vst.msk [vmem:[%s6021_s28 + $0x10] sm:$0xff] %vm707_vm1, %v2857_v47  ;;  %v2921_v17 = vmax.f32 %v2857_v47, 0.0  ;;  %v2858_v18 = vadd.f32 %v5034_v59, %v6016_v8 }
 0x1d0   : > { %2887 = vst.msk [vmem:[%s6021_s28] sm:$0xff] %vm707_vm1, %v2855_v4  ;;  %v2919_v20 = vmax.f32 %v2855_v4, 0.0  ;;  %v2856_v23 = vadd.f32 %v5035_v11, %v6016_v8 }
 0x1d1   : > { %2890 = vst.msk [vmem:[%s6021_s28 + $0x18] sm:$0xff] %vm707_vm1, %v2858_v18  ;;  %v2922_v35 = vmax.f32 %v2858_v18, 0.0 }
 0x1d2   : > { %v2951_v36 = vmax.f32 %v2919_v20, %v2921_v17  ;;  %2888 = vst.msk [vmem:[%s6021_s28 + $0x8] sm:$0xff] %vm707_vm1, %v2856_v23  ;;  %v2920_v37 = vmax.f32 %v2856_v23, 0.0  ;;  %v5004_v40 = vpop.f32.mrb[4].mxu0 }
 0x1d3   : > { %v5036_v42 = vadd.f32 %v5004_v40, %v4834_v0  ;;  %v2705_v56 = vpop.f32.mrb[5].mxu0 }
 0x1d4   : > { %v2983_v57 = vcombine.high %v2951_v36, %v2951_v36  ;;  %v2990_v21 = vrot.slane %v2951_v36, %v6030_v22  ;;  %v2952_v58 = vmax.f32 %v2920_v37, %v2922_v35  ;;  %v5037_v39 = vadd.f32 %v2705_v56, %v1480_v2  ;;  %v5005_v55 = vpop.f32.mrb[6].mxu0 }
 0x1d5   : > { %v2861_v61 = vadd.f32 %v5036_v42, %v6016_v8  ;;  %v5038_v1 = vadd.f32 %v5005_v55, %v4835_v12  ;;  %v2708_v9 = vpop.f32.mrb[7].mxu0 }
 0x1d6   : > { %v2997_v10 = vrot.slane %v2983_v57, %v6030_v22  ;;  %v2998_v53 = vcombine.high %v2990_v21, %v2990_v21  ;;  %v4496_v3 = vrot.slane %v2990_v21, 9  ;;  %v3000_v15 = vcombine.high %v2952_v58, %v2952_v58 }
 0x1d7   : > { %v3007_v19 = vrot.slane %v2952_v58, %v6030_v22  ;;  %2893 = vst.msk [vmem:[%s6021_s28 + $0x30] sm:$0xff] %vm707_vm1, %v2861_v61  ;;  %v2925_v26 = vmax.f32 %v2861_v61, 0.0  ;;  %v2859_v27 = vadd.f32 %v5037_v39, %v6016_v8  ;;  %v6047_v32 = vadd.f32 %v5038_v1, %v6016_v8 }
 0x1d8   : > { %v2999_v33 = vcombine.high %v2997_v10, %v2997_v10  ;;  %v4497_v38 = vrot.slane %v2998_v53, 9  ;;  %v4498_v48 = vrot.slane %v2997_v10, 9  ;;  %v3511_v49 = vmax.f32 %v2990_v21, %v4496_v3 }
 0x1d9   : > { %v3014_v50 = vrot.slane %v3000_v15, %v6030_v22  ;;  %v3015_v51 = vcombine.high %v3007_v19, %v3007_v19  ;;  %v4500_v62 = vrot.slane %v3007_v19, 9  ;;  %2891 = vst.msk [vmem:[%s6021_s28 + $0x20] sm:$0xff] %vm707_vm1, %v2859_v27  ;;  %v2923_v63 = vmax.f32 %v2859_v27, 0.0  ;;  %2894 = vst.msk [vmem:[%s6021_s28 + $0x38] sm:$0xff] %vm707_vm1, %v6047_v32 }
 0x1da   : > { %v4499_v0 = vrot.slane %v2999_v33, 9  ;;  %v3512_v2 = vmax.f32 %v2998_v53, %v4497_v38  ;;  %v3513_v12 = vmax.f32 %v2997_v10, %v4498_v48  ;;  %v3663_v54 = vrot.slane %v3511_v49, %v6037_v41  ;;  %v5008_v5 = vpop.f32.mrb[8].mxu0 }
 0x1db   : > { %v3016_v6 = vcombine.high %v3014_v50, %v3014_v50  ;;  %v4501_v7 = vrot.slane %v3015_v51, 9  ;;  %v4502_v24 = vrot.slane %v3014_v50, 9  ;;  %v3515_v25 = vmax.f32 %v3007_v19, %v4500_v62  ;;  %v2721_v28 = vpop.f32.mrb[9].mxu0 }
 0x1dc   : > { %v3514_v31 = vmax.f32 %v2999_v33, %v4499_v0  ;;  %v3667_v43 = vrot.slane %v3512_v2, %v6037_v41  ;;  %v3671_v44 = vrot.slane %v3513_v12, %v6037_v41  ;;  %v2953_v47 = vmax.f32 %v2923_v63, %v2925_v26  ;;  %v5009_v59 = vpop.f32.mrb[10].mxu0 }
 0x1dd   : > { %v4503_v60 = vrot.slane %v3016_v6, 9  ;;  %v3516_v4 = vmax.f32 %v3015_v51, %v4501_v7  ;;  %v3517_v11 = vmax.f32 %v3014_v50, %v4502_v24  ;;  %v3679_v17 = vrot.slane %v3515_v25, %v6037_v41  ;;  %v2724_v18 = vpop.f32.mrb[11].mxu0 }
 0x1de   : > { %v3675_v20 = vrot.slane %v3514_v31, %v6037_v41  ;;  %v3917_v23 = vsel %vm3916_vm3, %v3667_v43, %v3663_v54  ;;  %v3017_v35 = vcombine.high %v2953_v47, %v2953_v47  ;;  %v3024_v36 = vrot.slane %v2953_v47, %v6030_v22 }
 0x1df   : > { %v3919_v37 = vsel %vm3918_vm4, %v3671_v44, %v3917_v23  ;;  %v3518_v40 = vmax.f32 %v3016_v6, %v4503_v60  ;;  %v3683_v42 = vrot.slane %v3516_v4, %v6037_v41  ;;  %v3687_v56 = vrot.slane %v3517_v11, %v6037_v41 }
 0x1e0   : > { %v3921_v57 = vsel %vm3920_vm5, %v3675_v20, %v3919_v37  ;;  %v3031_v21 = vrot.slane %v3017_v35, %v6030_v22  ;;  %v3032_v58 = vcombine.high %v3024_v36, %v3024_v36  ;;  %v4504_v39 = vrot.slane %v3024_v36, 9 }
 0x1e1   : > { %v3691_v55 = vrot.slane %v3518_v40, %v6037_v41  ;;  %v3923_v61 = vsel %vm3922_vm6, %v3679_v17, %v3921_v57  ;;  %v2926_v1 = vmax.f32 %v6047_v32, 0.0  ;;  %v5039_v10 = vadd.f32 %v2708_v9, %v5994_v13 }
 0x1e2   : > { %v3925_v53 = vsel %vm3924_vm7, %v3683_v42, %v3923_v61  ;;  %v3033_v3 = vcombine.high %v3031_v21, %v3031_v21  ;;  %v4505_v15 = vrot.slane %v3032_v58, 9  ;;  %v4506_v19 = vrot.slane %v3031_v21, 9  ;;  %v5012_v26 = vpop.f32.mrb[12].mxu0 }
 0x1e3   : > { %v3927_v27 = vsel %vm3926_vm8, %v3687_v56, %v3925_v53  ;;  %v3519_v33 = vmax.f32 %v3024_v36, %v4504_v39  ;;  %v2860_v38 = vadd.f32 %v5039_v10, %v6016_v8  ;;  %v5040_v48 = vadd.f32 %v5008_v5, %v5996_v14  ;;  %v2737_v49 = vpop.f32.mrb[13].mxu0 }
 0x1e4   : > { %v3929_v32 = vsel %vm3928_vm9, %v3691_v55, %v3927_v27  ;;  %v4507_v50 = vrot.slane %v3033_v3, 9  ;;  %v3520_v13 = vmax.f32 %v3032_v58, %v4505_v15  ;;  %v3521_v9 = vmax.f32 %v3031_v21, %v4506_v19  ;;  %v5013_v51 = vpop.f32.mrb[14].mxu0 }
 0x1e5   : > { %4560 = vst.msk [vmem:[%s5952_s22 + $0x11] sm:$0xff] %vm707_vm1, %v3929_v32  ;;  %v3695_v62 = vrot.slane %v3519_v33, %v6037_v41  ;;  %2892 = vst.msk [vmem:[%s6021_s28 + $0x28] sm:$0xff] %vm707_vm1, %v2860_v38  ;;  %v2924_v63 = vmax.f32 %v2860_v38, 0.0  ;;  %v2865_v0 = vadd.f32 %v5040_v48, %v6016_v8  ;;  %v5041_v2 = vadd.f32 %v2721_v28, %v5998_v16  ;;  %v6083_v14 = vpop.f32.mrb[15].mxu0 }
 0x1e6   : > { %v3522_v12 = vmax.f32 %v3033_v3, %v4507_v50  ;;  %v3699_v54 = vrot.slane %v3520_v13, %v6037_v41  ;;  %v3703_v5 = vrot.slane %v3521_v9, %v6037_v41  ;;  %v5042_v6 = vadd.f32 %v5009_v59, %v6000_v29 }
 0x1e7   : > { %v2954_v7 = vmax.f32 %v2924_v63, %v2926_v1  ;;  %2897 = vst.msk [vmem:[%s6021_s28 + $0x50] sm:$0xff] %vm707_vm1, %v2865_v0  ;;  %v2929_v24 = vmax.f32 %v2865_v0, 0.0  ;;  %v2863_v25 = vadd.f32 %v5041_v2, %v6016_v8  ;;  %v5043_v31 = vadd.f32 %v2724_v18, %v6002_v30 }
 0x1e8   : > { %v3707_v16 = vrot.slane %v3522_v12, %v6037_v41  ;;  %v3930_v28 = vsel %vm3916_vm3, %v3699_v54, %v3695_v62  ;;  %v2866_v43 = vadd.f32 %v5042_v6, %v6016_v8  ;;  %v5044_v44 = vadd.f32 %v5012_v26, %v6004_v34 }
 0x1e9   : > { %v3931_v47 = vsel %vm3918_vm4, %v3703_v5, %v3930_v28  ;;  %v3034_v29 = vcombine.high %v2954_v7, %v2954_v7  ;;  %v3041_v59 = vrot.slane %v2954_v7, %v6030_v22  ;;  %2895 = vst.msk [vmem:[%s6021_s28 + $0x40] sm:$0xff] %vm707_vm1, %v2863_v25  ;;  %v2927_v60 = vmax.f32 %v2863_v25, 0.0  ;;  %v6100_v4 = vpop.f32.mrb[16].mxu1 }
 0x1ea   : > { %v3932_v30 = vsel %vm3920_vm5, %v3707_v16, %v3931_v47  ;;  %2898 = vst.msk [vmem:[%s6021_s28 + $0x58] sm:$0xff] %vm707_vm1, %v2866_v43  ;;  %v2930_v11 = vmax.f32 %v2866_v43, 0.0  ;;  %v2864_v17 = vadd.f32 %v5043_v31, %v6016_v8  ;;  %v6107_v34 = vadd.f32 %v5044_v44, %v6016_v8  ;;  %v6109_v18 = vpop.f32.mrb[16].mxu0  ;;  %v6111_v20 = vpop.f32.mrb[17].mxu1 }
 0x1eb   : > { %v3048_v23 = vrot.slane %v3034_v29, %v6030_v22  ;;  %v3049_v35 = vcombine.high %v3041_v59, %v3041_v59  ;;  %v4508_v36 = vrot.slane %v3041_v59, 9  ;;  %v2955_v37 = vmax.f32 %v2927_v60, %v2929_v24  ;;  %v6114_v40 = vpop.f32.mrb[17].mxu0  ;;  %v6116_v42 = vpop.f32.mrb[18].mxu1 }
 0x1ec   : > { %2896 = vst.msk [vmem:[%s6021_s28 + $0x48] sm:$0xff] %vm707_vm1, %v2864_v17  ;;  %v2928_v56 = vmax.f32 %v2864_v17, 0.0  ;;  %2901 = vst.msk [vmem:[%s6021_s28 + $0x70] sm:$0xff] %vm707_vm1, %v6107_v34  ;;  %v2933_v57 = vmax.f32 %v6107_v34, 0.0  ;;  %v5045_v21 = vadd.f32 %v2737_v49, %v6006_v45  ;;  %v5046_v58 = vadd.f32 %v5013_v51, %v6008_v46  ;;  %v6126_v39 = vpop.f32.mrb[18].mxu0  ;;  %v6128_v55 = vpop.f32.mrb[19].mxu1 }
 0x1ed   : > { %v3050_v61 = vcombine.high %v3048_v23, %v3048_v23  ;;  %v4509_v1 = vrot.slane %v3049_v35, 9  ;;  %v4510_v10 = vrot.slane %v3048_v23, 9  ;;  %v3523_v53 = vmax.f32 %v3041_v59, %v4508_v36  ;;  %v6130_v3 = vpop.f32.mrb[19].mxu0 }
 0x1ee   : > { %v3051_v15 = vcombine.high %v2955_v37, %v2955_v37  ;;  %v3058_v19 = vrot.slane %v2955_v37, %v6030_v22  ;;  %v2956_v26 = vmax.f32 %v2928_v56, %v2930_v11  ;;  %v2867_v27 = vadd.f32 %v5045_v21, %v6016_v8 }
 0x1ef   : > { %v4511_v45 = vrot.slane %v3050_v61, 9  ;;  %v3524_v33 = vmax.f32 %v3049_v35, %v4509_v1  ;;  %v3525_v46 = vmax.f32 %v3048_v23, %v4510_v10  ;;  %v3711_v38 = vrot.slane %v3523_v53, %v6037_v41 }
 0x1f0   : > { %v3065_v48 = vrot.slane %v3051_v15, %v6030_v22  ;;  %v3066_v49 = vcombine.high %v3058_v19, %v3058_v19  ;;  %v4512_v32 = vrot.slane %v3058_v19, 9  ;;  %v3068_v50 = vcombine.high %v2956_v26, %v2956_v26  ;;  %2899 = vst.msk [vmem:[%s6021_s28 + $0x60] sm:$0xff] %vm707_vm1, %v2867_v27 }
 0x1f1   : > { %v3526_v13 = vmax.f32 %v3050_v61, %v4511_v45  ;;  %v3715_v9 = vrot.slane %v3524_v33, %v6037_v41  ;;  %v3719_v51 = vrot.slane %v3525_v46, %v6037_v41  ;;  %v3933_v62 = vsel %vm3922_vm6, %v3711_v38, %v3932_v30  ;;  %v6141_v63 = vpop.f32.mrb[20].mxu1 }
 0x1f2   : > { %v3067_v0 = vcombine.high %v3065_v48, %v3065_v48  ;;  %v4513_v2 = vrot.slane %v3066_v49, 9  ;;  %v4514_v12 = vrot.slane %v3065_v48, 9  ;;  %v3527_v54 = vmax.f32 %v3058_v19, %v4512_v32  ;;  %v6143_v5 = vpop.f32.mrb[20].mxu0  ;;  %v6145_v6 = vpop.f32.mrb[21].mxu1 }
 0x1f3   : > { %v3723_v7 = vrot.slane %v3526_v13, %v6037_v41  ;;  %v3934_v24 = vsel %vm3924_vm7, %v3715_v9, %v3933_v62  ;;  %v3075_v25 = vrot.slane %v2956_v26, %v6030_v22  ;;  %v3082_v31 = vrot.slane %v3068_v50, %v6030_v22  ;;  %v6151_v16 = vpop.f32.mrb[21].mxu0  ;;  %v6153_v28 = vpop.f32.mrb[22].mxu1 }
 0x1f4   : > { %v3935_v43 = vsel %vm3926_vm8, %v3719_v51, %v3934_v24  ;;  %v4515_v44 = vrot.slane %v3067_v0, 9  ;;  %v3528_v47 = vmax.f32 %v3066_v49, %v4513_v2  ;;  %v3529_v29 = vmax.f32 %v3065_v48, %v4514_v12  ;;  %v6156_v59 = vpop.f32.mrb[22].mxu0  ;;  %v6158_v60 = vpop.f32.mrb[23].mxu1 }
 0x1f5   : > { %v3936_v30 = vsel %vm3928_vm9, %v3723_v7, %v3935_v43  ;;  %v3727_v11 = vrot.slane %v3527_v54, %v6037_v41  ;;  %v3083_v17 = vcombine.high %v3075_v25, %v3075_v25  ;;  %v3084_v23 = vcombine.high %v3082_v31, %v3082_v31  ;;  %v6162_v35 = vpop.f32.mrb[23].mxu0 }
 0x1f6   : > { %4561 = vst.msk [vmem:[%s5952_s22 + $0x21] sm:$0xff] %vm707_vm1, %v3936_v30  ;;  %v3530_v36 = vmax.f32 %v3067_v0, %v4515_v44  ;;  %v3731_v37 = vrot.slane %v3528_v47, %v6037_v41  ;;  %v3735_v56 = vrot.slane %v3529_v29, %v6037_v41  ;;  %v4516_v21 = vrot.slane %v3075_v25, 9 }
 0x1f7   : > { %v4517_v61 = vrot.slane %v3083_v17, 9  ;;  %v4518_v1 = vrot.slane %v3082_v31, 9  ;;  %v4519_v10 = vrot.slane %v3084_v23, 9  ;;  %v2931_v53 = vmax.f32 %v2867_v27, 0.0 }
 0x1f8   : > { %v3739_v15 = vrot.slane %v3530_v36, %v6037_v41  ;;  %v3937_v19 = vsel %vm3916_vm3, %v3731_v37, %v3727_v11  ;;  %v3531_v26 = vmax.f32 %v3075_v25, %v4516_v21  ;;  %v2870_v45 = vadd.f32 %v5046_v58, %v6016_v8 }
 0x1f9   : > { %v3938_v33 = vsel %vm3918_vm4, %v3735_v56, %v3937_v19  ;;  %v3532_v46 = vmax.f32 %v3083_v17, %v4517_v61  ;;  %v3533_v38 = vmax.f32 %v3082_v31, %v4518_v1  ;;  %v3534_v48 = vmax.f32 %v3084_v23, %v4519_v10  ;;  %v6172_v49 = vpop.f32.mrb[24].mxu1 }
 0x1fa   : > { %v3743_v32 = vrot.slane %v3531_v26, %v6037_v41  ;;  %v3939_v50 = vsel %vm3920_vm5, %v3739_v15, %v3938_v33  ;;  %v2957_v27 = vmax.f32 %v2931_v53, %v2933_v57  ;;  %2902 = vst.msk [vmem:[%s6021_s28 + $0x78] sm:$0xff] %vm707_vm1, %v2870_v45  ;;  %v2934_v13 = vmax.f32 %v2870_v45, 0.0  ;;  %v6180_v9 = vpop.f32.mrb[24].mxu0  ;;  %v6182_v58 = vpop.f32.mrb[25].mxu1 }
 0x1fb   : > { %v3747_v51 = vrot.slane %v3532_v46, %v6037_v41  ;;  %v3751_v62 = vrot.slane %v3533_v38, %v6037_v41  ;;  %v3755_v0 = vrot.slane %v3534_v48, %v6037_v41  ;;  %v5047_v2 = vadd.f32 %v6083_v14, %v6010_v52  ;;  %v6189_v12 = vpop.f32.mrb[25].mxu0  ;;  %v6191_v34 = vpop.f32.mrb[26].mxu1 }
 0x1fc   : > { %v3940_v57 = vsel %vm3922_vm6, %v3743_v32, %v3939_v50  ;;  %v3085_v54 = vcombine.high %v2957_v27, %v2957_v27  ;;  %v3092_v7 = vrot.slane %v2957_v27, %v6030_v22  ;;  %v5048_v24 = vadd.f32 %v6109_v18, %v6100_v4  ;;  %v6197_v25 = vpop.f32.mrb[26].mxu0  ;;  %v6199_v31 = vpop.f32.mrb[27].mxu1 }
 0x1fd   : > { %v3941_v52 = vsel %vm3924_vm7, %v3747_v51, %v3940_v57  ;;  %v2868_v14 = vadd.f32 %v5047_v2, %v6016_v8  ;;  %v5049_v43 = vadd.f32 %v6114_v40, %v6111_v20  ;;  %v5050_v44 = vadd.f32 %v6126_v39, %v6116_v42  ;;  %v6207_v47 = vpop.f32.mrb[27].mxu0 }
 0x1fe   : > { %v3942_v4 = vsel %vm3926_vm8, %v3751_v62, %v3941_v52  ;;  %v3099_v18 = vrot.slane %v3085_v54, %v6030_v22  ;;  %v3100_v29 = vcombine.high %v3092_v7, %v3092_v7  ;;  %v4520_v30 = vrot.slane %v3092_v7, 9 }
 0x1ff   : > { %v3943_v11 = vsel %vm3928_vm9, %v3755_v0, %v3942_v4  ;;  %2900 = vst.msk [vmem:[%s6021_s28 + $0x68] sm:$0xff] %vm707_vm1, %v2868_v14  ;;  %v2932_v17 = vmax.f32 %v2868_v14, 0.0  ;;  %v2873_v20 = vadd.f32 %v5048_v24, %v6016_v8  ;;  %v2871_v40 = vadd.f32 %v5049_v43, %v6016_v8 }
 0x200   : > { %4562 = vst.msk [vmem:[%s5952_s22 + $0x31] sm:$0xff] %vm707_vm1, %v3943_v11  ;;  %v3101_v42 = vcombine.high %v3099_v18, %v3099_v18  ;;  %v4521_v39 = vrot.slane %v3100_v29, 9  ;;  %v4522_v23 = vrot.slane %v3099_v18, 9  ;;  %v3535_v36 = vmax.f32 %v3092_v7, %v4520_v30 }
 0x201   : > { %v2958_v37 = vmax.f32 %v2932_v17, %v2934_v13  ;;  %2905 = vst.msk [vmem:[%s6021_s28 + $0x90] sm:$0xff] %vm707_vm1, %v2873_v20  ;;  %v2937_v56 = vmax.f32 %v2873_v20, 0.0  ;;  %2903 = vst.msk [vmem:[%s6021_s28 + $0x80] sm:$0xff] %vm707_vm1, %v2871_v40  ;;  %v2935_v21 = vmax.f32 %v2871_v40, 0.0  ;;  %v6223_v61 = vadd.f32 %v5050_v44, %v6016_v8  ;;  %v6225_v1 = vpop.f32.mrb[28].mxu1 }
 0x202   : > { %v4523_v10 = vrot.slane %v3101_v42, 9  ;;  %v3536_v53 = vmax.f32 %v3100_v29, %v4521_v39  ;;  %v3537_v15 = vmax.f32 %v3099_v18, %v4522_v23  ;;  %v3759_v19 = vrot.slane %v3535_v36, %v6037_v41  ;;  %v6228_v26 = vpop.f32.mrb[28].mxu0  ;;  %v6230_v45 = vpop.f32.mrb[29].mxu1 }
 0x203   : > { %v3102_v33 = vcombine.high %v2958_v37, %v2958_v37  ;;  %v3109_v46 = vrot.slane %v2958_v37, %v6030_v22  ;;  %v2959_v38 = vmax.f32 %v2935_v21, %v2937_v56  ;;  %2906 = vst.msk [vmem:[%s6021_s28 + $0x98] sm:$0xff] %vm707_vm1, %v6223_v61  ;;  %v2938_v48 = vmax.f32 %v6223_v61, 0.0  ;;  %v6237_v32 = vpop.f32.mrb[29].mxu0  ;;  %v6239_v50 = vpop.f32.mrb[30].mxu1 }
 0x204   : > { %v3538_v27 = vmax.f32 %v3101_v42, %v4523_v10  ;;  %v3763_v13 = vrot.slane %v3536_v53, %v6037_v41  ;;  %v3767_v51 = vrot.slane %v3537_v15, %v6037_v41  ;;  %v5051_v62 = vadd.f32 %v6130_v3, %v6128_v55  ;;  %v6245_v0 = vpop.f32.mrb[30].mxu0  ;;  %v6247_v2 = vpop.f32.mrb[31].mxu1 }
 0x205   : > { %v3116_v57 = vrot.slane %v3102_v33, %v6030_v22  ;;  %v3117_v54 = vcombine.high %v3109_v46, %v3109_v46  ;;  %v4524_v7 = vrot.slane %v3109_v46, 9  ;;  %v3119_v24 = vcombine.high %v2959_v38, %v2959_v38  ;;  %v6250_v52 = vpop.f32.mrb[31].mxu0 }
 0x206   : > { %v3771_v14 = vrot.slane %v3538_v27, %v6037_v41  ;;  %v3944_v43 = vsel %vm3916_vm3, %v3763_v13, %v3759_v19  ;;  %v3126_v44 = vrot.slane %v2959_v38, %v6030_v22  ;;  %v2872_v55 = vadd.f32 %v5051_v62, %v6016_v8 }
 0x207   : > { %v3945_v3 = vsel %vm3918_vm4, %v3767_v51, %v3944_v43  ;;  %v3118_v4 = vcombine.high %v3116_v57, %v3116_v57  ;;  %v4525_v18 = vrot.slane %v3117_v54, 9  ;;  %v4526_v29 = vrot.slane %v3116_v57, 9 }
 0x208   : > { %v3539_v30 = vmax.f32 %v3109_v46, %v4524_v7  ;;  %v3946_v11 = vsel %vm3920_vm5, %v3771_v14, %v3945_v3  ;;  %v3133_v17 = vrot.slane %v3119_v24, %v6030_v22  ;;  %v3134_v20 = vcombine.high %v3126_v44, %v3126_v44  ;;  %2904 = vst.msk [vmem:[%s6021_s28 + $0x88] sm:$0xff] %vm707_vm1, %v2872_v55 }
 0x209   : > { %v4527_v40 = vrot.slane %v3118_v4, 9  ;;  %v3540_v42 = vmax.f32 %v3117_v54, %v4525_v18  ;;  %v3541_v39 = vmax.f32 %v3116_v57, %v4526_v29  ;;  %v4528_v23 = vrot.slane %v3126_v44, 9 }
 0x20a   : > { %v3775_v36 = vrot.slane %v3539_v30, %v6037_v41  ;;  %v3135_v37 = vcombine.high %v3133_v17, %v3133_v17  ;;  %v4529_v56 = vrot.slane %v3134_v20, 9  ;;  %v4530_v21 = vrot.slane %v3133_v17, 9 }
 0x20b   : > { %v3542_v61 = vmax.f32 %v3118_v4, %v4527_v40  ;;  %v3779_v10 = vrot.slane %v3540_v42, %v6037_v41  ;;  %v3783_v53 = vrot.slane %v3541_v39, %v6037_v41  ;;  %v3543_v15 = vmax.f32 %v3126_v44, %v4528_v23 }
 0x20c   : > { %v3947_v19 = vsel %vm3922_vm6, %v3775_v36, %v3946_v11  ;;  %v4531_v33 = vrot.slane %v3135_v37, 9  ;;  %v3544_v46 = vmax.f32 %v3134_v20, %v4529_v56  ;;  %v3545_v38 = vmax.f32 %v3133_v17, %v4530_v21 }
 0x20d   : > { %v3787_v27 = vrot.slane %v3542_v61, %v6037_v41  ;;  %v3948_v13 = vsel %vm3924_vm7, %v3779_v10, %v3947_v19  ;;  %v3791_v51 = vrot.slane %v3543_v15, %v6037_v41  ;;  %v2936_v62 = vmax.f32 %v2872_v55, 0.0 }
 0x20e   : > { %v3949_v57 = vsel %vm3926_vm8, %v3783_v53, %v3948_v13  ;;  %v3546_v54 = vmax.f32 %v3135_v37, %v4531_v33  ;;  %v3795_v7 = vrot.slane %v3544_v46, %v6037_v41  ;;  %v3799_v24 = vrot.slane %v3545_v38, %v6037_v41 }
 0x20f   : > { %v3950_v14 = vsel %vm3928_vm9, %v3787_v27, %v3949_v57  ;;  %v2960_v43 = vmax.f32 %v2936_v62, %v2938_v48  ;;  %v5052_v44 = vadd.f32 %v6143_v5, %v6141_v63  ;;  %v5053_v3 = vadd.f32 %v6151_v16, %v6145_v6 }
 0x210   : > { %4563 = vst.msk [vmem:[%s5952_s22 + $0x41] sm:$0xff] %vm707_vm1, %v3950_v14  ;;  %v3803_v55 = vrot.slane %v3546_v54, %v6037_v41  ;;  %v3951_v4 = vsel %vm3916_vm3, %v3795_v7, %v3791_v51  ;;  %v5054_v18 = vadd.f32 %v6156_v59, %v6153_v28  ;;  %v5055_v48 = vadd.f32 %v6162_v35, %v6158_v60 }
 0x211   : > { %v3952_v63 = vsel %vm3918_vm4, %v3799_v24, %v3951_v4  ;;  %v3136_v5 = vcombine.high %v2960_v43, %v2960_v43  ;;  %v3143_v6 = vrot.slane %v2960_v43, %v6030_v22  ;;  %v2877_v16 = vadd.f32 %v5052_v44, %v6016_v8 }
 0x212   : > { %v3953_v29 = vsel %vm3920_vm5, %v3803_v55, %v3952_v63  ;;  %v2875_v30 = vadd.f32 %v5053_v3, %v6016_v8  ;;  %v2878_v11 = vadd.f32 %v5054_v18, %v6016_v8  ;;  %v2876_v28 = vadd.f32 %v5055_v48, %v6016_v8 }
 0x213   : > { %v3150_v59 = vrot.slane %v3136_v5, %v6030_v22  ;;  %v3151_v60 = vcombine.high %v3143_v6, %v3143_v6  ;;  %v4532_v35 = vrot.slane %v3143_v6, 9  ;;  %2909 = vst.msk [vmem:[%s6021_s28 + $0xb0] sm:$0xff] %vm707_vm1, %v2877_v16  ;;  %v2941_v17 = vmax.f32 %v2877_v16, 0.0 }
 0x214   : > { %2907 = vst.msk [vmem:[%s6021_s28 + $0xa0] sm:$0xff] %vm707_vm1, %v2875_v30  ;;  %v2939_v20 = vmax.f32 %v2875_v30, 0.0  ;;  %2910 = vst.msk [vmem:[%s6021_s28 + $0xb8] sm:$0xff] %vm707_vm1, %v2878_v11  ;;  %v2942_v40 = vmax.f32 %v2878_v11, 0.0  ;;  %v2940_v42 = vmax.f32 %v2876_v28, 0.0  ;;  %v5056_v39 = vadd.f32 %v6180_v9, %v6172_v49 }
 0x215   : > { %2908 = vst.msk [vmem:[%s6021_s28 + $0xa8] sm:$0xff] %vm707_vm1, %v2876_v28  ;;  %v3152_v23 = vcombine.high %v3150_v59, %v3150_v59  ;;  %v4533_v36 = vrot.slane %v3151_v60, 9  ;;  %v4534_v37 = vrot.slane %v3150_v59, 9  ;;  %v3547_v56 = vmax.f32 %v3143_v6, %v4532_v35 }
 0x216   : > { %v2961_v21 = vmax.f32 %v2939_v20, %v2941_v17  ;;  %v2962_v61 = vmax.f32 %v2940_v42, %v2942_v40  ;;  %v6303_v10 = vadd.f32 %v5056_v39, %v6016_v8  ;;  %v5057_v53 = vadd.f32 %v6189_v12, %v6182_v58 }
 0x217   : > { %v4535_v15 = vrot.slane %v3152_v23, 9  ;;  %v3548_v19 = vmax.f32 %v3151_v60, %v4533_v36  ;;  %v3549_v33 = vmax.f32 %v3150_v59, %v4534_v37  ;;  %v3807_v46 = vrot.slane %v3547_v56, %v6037_v41 }
 0x218   : > { %v3153_v38 = vcombine.high %v2961_v21, %v2961_v21  ;;  %v3160_v49 = vrot.slane %v2961_v21, %v6030_v22  ;;  %v3170_v9 = vcombine.high %v2962_v61, %v2962_v61  ;;  %v3177_v27 = vrot.slane %v2962_v61, %v6030_v22  ;;  %2913 = vst.msk [vmem:[%s6021_s28 + $0xd0] sm:$0xff] %vm707_vm1, %v6303_v10 }
 0x219   : > { %v3550_v13 = vmax.f32 %v3152_v23, %v4535_v15  ;;  %v3811_v51 = vrot.slane %v3548_v19, %v6037_v41  ;;  %v3815_v62 = vrot.slane %v3549_v33, %v6037_v41  ;;  %v3954_v58 = vsel %vm3922_vm6, %v3807_v46, %v3953_v29 }
 0x21a   : > { %v3167_v12 = vrot.slane %v3153_v38, %v6030_v22  ;;  %v3168_v57 = vcombine.high %v3160_v49, %v3160_v49  ;;  %v4536_v54 = vrot.slane %v3160_v49, 9  ;;  %v3184_v7 = vrot.slane %v3170_v9, %v6030_v22 }
 0x21b   : > { %v3819_v24 = vrot.slane %v3550_v13, %v6037_v41  ;;  %v3955_v14 = vsel %vm3924_vm7, %v3811_v51, %v3954_v58  ;;  %v3185_v43 = vcombine.high %v3177_v27, %v3177_v27  ;;  %v4540_v44 = vrot.slane %v3177_v27, 9 }
 0x21c   : > { %v3956_v3 = vsel %vm3926_vm8, %v3815_v62, %v3955_v14  ;;  %v3169_v55 = vcombine.high %v3167_v12, %v3167_v12  ;;  %v4537_v4 = vrot.slane %v3168_v57, 9  ;;  %v4538_v18 = vrot.slane %v3167_v12, 9 }
 0x21d   : > { %v3957_v48 = vsel %vm3928_vm9, %v3819_v24, %v3956_v3  ;;  %v3551_v63 = vmax.f32 %v3160_v49, %v4536_v54  ;;  %v3186_v5 = vcombine.high %v3184_v7, %v3184_v7  ;;  %v4541_v6 = vrot.slane %v3185_v43, 9 }
 0x21e   : > { %4564 = vst.msk [vmem:[%s5952_s22 + $0x51] sm:$0xff] %vm707_vm1, %v3957_v48  ;;  %v4539_v16 = vrot.slane %v3169_v55, 9  ;;  %v3552_v29 = vmax.f32 %v3168_v57, %v4537_v4  ;;  %v3553_v30 = vmax.f32 %v3167_v12, %v4538_v18  ;;  %v4542_v11 = vrot.slane %v3184_v7, 9 }
 0x21f   : > { %v3823_v28 = vrot.slane %v3551_v63, %v6037_v41  ;;  %v4543_v59 = vrot.slane %v3186_v5, 9  ;;  %v3555_v60 = vmax.f32 %v3177_v27, %v4540_v44  ;;  %v3556_v35 = vmax.f32 %v3185_v43, %v4541_v6 }
 0x220   : > { %v3554_v17 = vmax.f32 %v3169_v55, %v4539_v16  ;;  %v3827_v20 = vrot.slane %v3552_v29, %v6037_v41  ;;  %v3831_v40 = vrot.slane %v3553_v30, %v6037_v41  ;;  %v3557_v42 = vmax.f32 %v3184_v7, %v4542_v11 }
 0x221   : > { %v3558_v39 = vmax.f32 %v3186_v5, %v4543_v59  ;;  %v3839_v23 = vrot.slane %v3555_v60, %v6037_v41  ;;  %v3843_v36 = vrot.slane %v3556_v35, %v6037_v41  ;;  %v2945_v37 = vmax.f32 %v6303_v10, 0.0 }
 0x222   : > { %v3835_v56 = vrot.slane %v3554_v17, %v6037_v41  ;;  %v3958_v21 = vsel %vm3916_vm3, %v3827_v20, %v3823_v28  ;;  %v3847_v61 = vrot.slane %v3557_v42, %v6037_v41  ;;  %v2879_v15 = vadd.f32 %v5057_v53, %v6016_v8 }
 0x223   : > { %v3959_v19 = vsel %vm3918_vm4, %v3831_v40, %v3958_v21  ;;  %v3851_v33 = vrot.slane %v3558_v39, %v6037_v41  ;;  %v5058_v46 = vadd.f32 %v6197_v25, %v6191_v34  ;;  %v5059_v38 = vadd.f32 %v6207_v47, %v6199_v31 }
 0x224   : > { %v3960_v10 = vsel %vm3920_vm5, %v3835_v56, %v3959_v19  ;;  %2911 = vst.msk [vmem:[%s6021_s28 + $0xc0] sm:$0xff] %vm707_vm1, %v2879_v15  ;;  %v2943_v49 = vmax.f32 %v2879_v15, 0.0  ;;  %v5060_v53 = vadd.f32 %v6228_v26, %v6225_v1  ;;  %v5061_v9 = vadd.f32 %v6237_v32, %v6230_v45 }
 0x225   : > { %v3961_v27 = vsel %vm3922_vm6, %v3839_v23, %v3960_v10  ;;  %v2882_v34 = vadd.f32 %v5058_v46, %v6016_v8  ;;  %v2880_v25 = vadd.f32 %v5059_v38, %v6016_v8  ;;  %v5062_v31 = vadd.f32 %v6245_v0, %v6239_v50 }
 0x226   : > { %v3962_v47 = vsel %vm3924_vm7, %v3843_v36, %v3961_v27  ;;  %v2963_v13 = vmax.f32 %v2943_v49, %v2945_v37  ;;  %v2885_v1 = vadd.f32 %v5060_v53, %v6016_v8  ;;  %v2883_v26 = vadd.f32 %v5061_v9, %v6016_v8 }
 0x227   : > { %v3963_v45 = vsel %vm3926_vm8, %v3847_v61, %v3962_v47  ;;  %2914 = vst.msk [vmem:[%s6021_s28 + $0xd8] sm:$0xff] %vm707_vm1, %v2882_v34  ;;  %v2946_v32 = vmax.f32 %v2882_v34, 0.0  ;;  %2912 = vst.msk [vmem:[%s6021_s28 + $0xc8] sm:$0xff] %vm707_vm1, %v2880_v25  ;;  %v2944_v51 = vmax.f32 %v2880_v25, 0.0  ;;  %v6361_v50 = vadd.f32 %v5062_v31, %v6016_v8 }
 0x228   : > { %v3964_v0 = vsel %vm3928_vm9, %v3851_v33, %v3963_v45  ;;  %v3187_v62 = vcombine.high %v2963_v13, %v2963_v13  ;;  %v3194_v58 = vrot.slane %v2963_v13, %v6030_v22  ;;  %2917 = vst.msk [vmem:[%s6021_s28 + $0xf0] sm:$0xff] %vm707_vm1, %v2885_v1  ;;  %v2949_v12 = vmax.f32 %v2885_v1, 0.0  ;;  %2915 = vst.msk [vmem:[%s6021_s28 + $0xe0] sm:$0xff] %vm707_vm1, %v2883_v26 }
 0x229   : > { %4565 = vst.msk [vmem:[%s5952_s22 + $0x61] sm:$0xff] %vm707_vm1, %v3964_v0  ;;  %v2964_v57 = vmax.f32 %v2944_v51, %v2946_v32  ;;  %v2947_v54 = vmax.f32 %v2883_v26, 0.0  ;;  %2918 = vst.msk [vmem:[%s6021_s28 + $0xf8] sm:$0xff] %vm707_vm1, %v6361_v50  ;;  %v5063_v7 = vadd.f32 %v6250_v52, %v6247_v2  ;;  %v2950_v44 = vmax.f32 %v6361_v50, 0.0 }
 0x22a   : > { %v3201_v24 = vrot.slane %v3187_v62, %v6030_v22  ;;  %v3202_v14 = vcombine.high %v3194_v58, %v3194_v58  ;;  %v4544_v43 = vrot.slane %v3194_v58, 9 }
 0x22b   : > { %v3204_v3 = vcombine.high %v2964_v57, %v2964_v57  ;;  %v3211_v55 = vrot.slane %v2964_v57, %v6030_v22  ;;  %v2965_v4 = vmax.f32 %v2947_v54, %v2949_v12  ;;  %v2884_v18 = vadd.f32 %v5063_v7, %v6016_v8 }
 0x22c   : > { %v3203_v48 = vcombine.high %v3201_v24, %v3201_v24  ;;  %v4545_v63 = vrot.slane %v3202_v14, 9  ;;  %v4546_v5 = vrot.slane %v3201_v24, 9  ;;  %v3559_v6 = vmax.f32 %v3194_v58, %v4544_v43 }
 0x22d   : > { %v3218_v16 = vrot.slane %v3204_v3, %v6030_v22  ;;  %v3219_v2 = vcombine.high %v3211_v55, %v3211_v55  ;;  %v4548_v52 = vrot.slane %v3211_v55, 9  ;;  %v3221_v29 = vcombine.high %v2965_v4, %v2965_v4  ;;  %2916 = vst.msk [vmem:[%s6021_s28 + $0xe8] sm:$0xff] %vm707_vm1, %v2884_v18 }
 0x22e   : > { %v4547_v30 = vrot.slane %v3203_v48, 9  ;;  %v3560_v11 = vmax.f32 %v3202_v14, %v4545_v63  ;;  %v3561_v28 = vmax.f32 %v3201_v24, %v4546_v5  ;;  %v3855_v59 = vrot.slane %v3559_v6, %v6037_v41 }
 0x22f   : > { %v3220_v60 = vcombine.high %v3218_v16, %v3218_v16  ;;  %v4549_v35 = vrot.slane %v3219_v2, 9  ;;  %v4550_v17 = vrot.slane %v3218_v16, 9  ;;  %v3563_v8 = vmax.f32 %v3211_v55, %v4548_v52 }
 0x230   : > { %v3562_v20 = vmax.f32 %v3203_v48, %v4547_v30  ;;  %v3859_v40 = vrot.slane %v3560_v11, %v6037_v41  ;;  %v3863_v42 = vrot.slane %v3561_v28, %v6037_v41  ;;  %v3228_v39 = vrot.slane %v2965_v4, %v6030_v22 }
 0x231   : > { %v4551_v23 = vrot.slane %v3220_v60, 9  ;;  %v3564_v36 = vmax.f32 %v3219_v2, %v4549_v35  ;;  %v3565_v37 = vmax.f32 %v3218_v16, %v4550_v17  ;;  %v3871_v56 = vrot.slane %v3563_v8, %v6037_v41 }
 0x232   : > { %v3867_v21 = vrot.slane %v3562_v20, %v6037_v41  ;;  %v3965_v61 = vsel %vm3916_vm3, %v3859_v40, %v3855_v59  ;;  %v3235_v15 = vrot.slane %v3221_v29, %v6030_v22  ;;  %v3236_v19 = vcombine.high %v3228_v39, %v3228_v39 }
 0x233   : > { %v3966_v33 = vsel %vm3918_vm4, %v3863_v42, %v3965_v61  ;;  %v3566_v46 = vmax.f32 %v3220_v60, %v4551_v23  ;;  %v3875_v38 = vrot.slane %v3564_v36, %v6037_v41  ;;  %v3879_v10 = vrot.slane %v3565_v37, %v6037_v41 }
 0x234   : > { %v3967_v49 = vsel %vm3920_vm5, %v3867_v21, %v3966_v33  ;;  %v3237_v53 = vcombine.high %v3235_v15, %v3235_v15  ;;  %v4552_v9 = vrot.slane %v3228_v39, 9  ;;  %v4553_v27 = vrot.slane %v3236_v19, 9 }
 0x235   : > { %v3883_v34 = vrot.slane %v3566_v46, %v6037_v41  ;;  %v3968_v25 = vsel %vm3922_vm6, %v3871_v56, %v3967_v49  ;;  %v4554_v31 = vrot.slane %v3235_v15, 9  ;;  %v2948_v47 = vmax.f32 %v2884_v18, 0.0 }
 0x236   : > { %v3969_v13 = vsel %vm3924_vm7, %v3875_v38, %v3968_v25  ;;  %v4555_v1 = vrot.slane %v3237_v53, 9  ;;  %v3567_v26 = vmax.f32 %v3228_v39, %v4552_v9  ;;  %v3568_v45 = vmax.f32 %v3236_v19, %v4553_v27 }
 0x237   : > { %v3970_v32 = vsel %vm3926_vm8, %v3879_v10, %v3969_v13  ;;  %v3569_v51 = vmax.f32 %v3235_v15, %v4554_v31  ;;  %v2966_v50 = vmax.f32 %v2948_v47, %v2950_v44 }
 0x238   : > { %v3971_v0 = vsel %vm3928_vm9, %v3883_v34, %v3970_v32  ;;  %v3570_v62 = vmax.f32 %v3237_v53, %v4555_v1  ;;  %v3887_v58 = vrot.slane %v3567_v26, %v6037_v41  ;;  %v3891_v12 = vrot.slane %v3568_v45, %v6037_v41 }
 0x239   : > { %4566 = vst.msk [vmem:[%s5952_s22 + $0x71] sm:$0xff] %vm707_vm1, %v3971_v0  ;;  %v3895_v57 = vrot.slane %v3569_v51, %v6037_v41  ;;  %v3238_v54 = vcombine.high %v2966_v50, %v2966_v50  ;;  %v3245_v7 = vrot.slane %v2966_v50, %v6030_v22 }
 0x23a   : > { %v3899_v24 = vrot.slane %v3570_v62, %v6037_v41  ;;  %v3972_v14 = vsel %vm3916_vm3, %v3891_v12, %v3887_v58 }
 0x23b   : > { %v3973_v43 = vsel %vm3918_vm4, %v3895_v57, %v3972_v14  ;;  %v3252_v44 = vrot.slane %v3238_v54, %v6030_v22  ;;  %v3253_v3 = vcombine.high %v3245_v7, %v3245_v7  ;;  %v4556_v55 = vrot.slane %v3245_v7, 9 }
 0x23c   : > { %v3974_v5 = vsel %vm3920_vm5, %v3899_v24, %v3973_v43 }
 0x23d   : > { %v3254_v4 = vcombine.high %v3252_v44, %v3252_v44  ;;  %v4557_v18 = vrot.slane %v3253_v3, 9  ;;  %v4558_v48 = vrot.slane %v3252_v44, 9  ;;  %v3571_v63 = vmax.f32 %v3245_v7, %v4556_v55 }
 0x23f   : > { %v4559_v6 = vrot.slane %v3254_v4, 9  ;;  %v3572_v16 = vmax.f32 %v3253_v3, %v4557_v18  ;;  %v3573_v2 = vmax.f32 %v3252_v44, %v4558_v48  ;;  %v3903_v52 = vrot.slane %v3571_v63, %v6037_v41 }
 0x241   : > { %v3574_v29 = vmax.f32 %v3254_v4, %v4559_v6  ;;  %v3907_v30 = vrot.slane %v3572_v16, %v6037_v41  ;;  %v3975_v11 = vsel %vm3922_vm6, %v3903_v52, %v3974_v5  ;;  %v3911_v22 = vrot.slane %v3573_v2, %v6037_v41 }
 0x243   : > { %v3915_v28 = vrot.slane %v3574_v29, %v6037_v41  ;;  %v3976_v59 = vsel %vm3924_vm7, %v3907_v30, %v3975_v11 }
 0x244   : > { %v3977_v60 = vsel %vm3926_vm8, %v3911_v22, %v3976_v59 }
 0x245   : > { %v3978_v35 = vsel %vm3928_vm9, %v3915_v28, %v3977_v60 }
 0x246   : > { %4567 = vst.msk [vmem:[%s5952_s22 + $0x81] sm:$0xff] %vm707_vm1, %v3978_v35 }
 0x247 PF: > { %s15_s17 = sadd.s32 1, %s5348_s17   ;;  %s6435_s15 = smov %s5344_s16 }
 0x248   : > { %p12_p5 = scmp.ge.s32.totalorder %s15_s17, 4   ;;  %s6436_s16 = smov %s6438_s18 }
 0x24a   :  { %14 = sbr.rel (!%p12_p5) target bundleno = 2 (0x2), region = 83 }

</bundles_post_ra>
